<compile_context>
chip_gen: v5e
topology: v5e:2x2
jax: 0.10.0
libtpu: 0.0.40
codegen_flags: <defaults>
</compile_context>

<pallas_src>
import functools
import math

import jax
import jax.numpy as jnp
from jax.experimental import pallas as pl
from jax.experimental.pallas import tpu as pltpu

EPS = 1e-5
VMEM_LIMIT = 48 * 1024 * 1024   # explicit scoped-VMEM budget (under v7x's 64 MiB/TC)


def _pick_row_tile(h):
    """Largest divisor of h that is <= 32 rows while keeping >= 2 row tiles."""
    divs = [d for d in range(1, h + 1) if h % d == 0]
    cands = [d for d in divs if h // d >= 2]
    if not cands:
        return h
    small = [d for d in cands if d <= 32]
    return max(small) if small else min(cands)


# ----------------------------------------------------------------------------
# Kernel 1: InstanceNorm2d statistics -> folded per-(b, c) scale / shift
# ----------------------------------------------------------------------------
def _in_stats_kernel(x_ref, g_ref, b_ref, scale_ref, shift_ref, s_ref, ss_ref,
                     *, eps, count):
    r = pl.program_id(1)

    @pl.when(r == 0)
    def _():
        s_ref[...] = jnp.zeros_like(s_ref)
        ss_ref[...] = jnp.zeros_like(ss_ref)

    x = x_ref[0].astype(jnp.float32)                      # (th, W, C)
    xs = jnp.sum(x, axis=0, keepdims=True)                # (1, W, C)
    s_ref[...] += jnp.sum(xs, axis=1, keepdims=True)      # (1, 1, C)
    xss = jnp.sum(x * x, axis=0, keepdims=True)
    ss_ref[...] += jnp.sum(xss, axis=1, keepdims=True)

    @pl.when(r == pl.num_programs(1) - 1)
    def _():
        inv_n = 1.0 / count
        mean = s_ref[...] * inv_n
        var = ss_ref[...] * inv_n - mean * mean
        rstd = jax.lax.rsqrt(jnp.maximum(var, 0.0) + eps)
        g = g_ref[...]
        scale_ref[...] = g * rstd
        shift_ref[...] = b_ref[...] - mean * g * rstd


def instance_norm_scale_shift(x, gamma, beta, *, eps=EPS):
    """Per-(batch, channel) InstanceNorm2d folded into y = x*scale + shift."""
    B, H, W, C = x.shape
    th = _pick_row_tile(H)
    kernel = functools.partial(_in_stats_kernel, eps=eps, count=float(H * W))
    scale, shift = pl.pallas_call(
        kernel,
        out_shape=(jax.ShapeDtypeStruct((B, 1, C), jnp.float32),
                   jax.ShapeDtypeStruct((B, 1, C), jnp.float32)),
        grid_spec=pltpu.PrefetchScalarGridSpec(
            num_scalar_prefetch=0,
            grid=(B, H // th),
            in_specs=[
                pl.BlockSpec((1, th, W, C), lambda b, r: (b, r, 0, 0)),
                pl.BlockSpec((1, 1, C), lambda b, r: (0, 0, 0)),
                pl.BlockSpec((1, 1, C), lambda b, r: (0, 0, 0)),
            ],
            out_specs=[
                pl.BlockSpec((1, 1, C), lambda b, r: (b, 0, 0)),
                pl.BlockSpec((1, 1, C), lambda b, r: (b, 0, 0)),
            ],
            scratch_shapes=[pltpu.VMEM((1, 1, C), jnp.float32),
                            pltpu.VMEM((1, 1, C), jnp.float32)],
        ),
        compiler_params=pltpu.CompilerParams(
            dimension_semantics=("parallel", "arbitrary"),
            vmem_limit_bytes=VMEM_LIMIT),
    )(x, gamma, beta)
    return scale, shift


# ----------------------------------------------------------------------------
# Kernel 2: fused (InstanceNorm + ReLU) -> tap-based conv (+bias, +residual)
# ----------------------------------------------------------------------------
def _norm_relu_conv_kernel(a_ref, scale_ref, shift_ref, w_ref, cb_ref, *rest,
                           H, W, pad, kh, kw, th, add_residual):
    if add_residual:
        res_ref, o_ref = rest
    else:
        (o_ref,) = rest

    C = a_ref.shape[-1]
    Cout = o_ref.shape[-1]
    Wp = W + 2 * pad
    th2 = th + kh - 1
    m2 = th * W

    r = pl.program_id(1)
    row0 = r * th                                   # start row, padded coords
    if th % 8 == 0:
        row0 = pl.multiple_of(row0, 8)

    # Fused InstanceNorm + ReLU on the input slab (VMEM only, never hits HBM).
    slab = a_ref[0, pl.ds(row0, th2), :, :].astype(jnp.float32)    # (th2, Wp, C)
    y = jnp.maximum(slab * scale_ref[...] + shift_ref[...], 0.0)
    rows = jax.lax.broadcasted_iota(jnp.int32, (th2, Wp, 1), 0) + row0
    cols = jax.lax.broadcasted_iota(jnp.int32, (th2, Wp, 1), 1)
    interior = ((rows >= pad) & (rows < H + pad) &
                (cols >= pad) & (cols < W + pad))
    a_n = jnp.where(interior, y, 0.0).astype(jnp.bfloat16)          # (th2, Wp, C)

    # Tap-based conv: kh*kw bf16 MXU matmuls into an f32 accumulator seeded
    # with the conv bias (no im2col materialization, no K-revolve in HBM).
    acc = jnp.broadcast_to(cb_ref[0], (m2, Cout))                    # f32
    for di in range(kh):
        for dj in range(kw):
            a_tap = a_n[di:di + th, dj:dj + W, :].reshape(m2, C)
            acc = acc + jnp.dot(a_tap, w_ref[di * kw + dj],
                                preferred_element_type=jnp.float32)

    if add_residual:
        acc = acc + res_ref[0].reshape(m2, C).astype(jnp.float32)
    o_ref[0] = acc.reshape(th, W, Cout).astype(o_ref.dtype)


def norm_relu_conv(x_pad, scale, shift, w_taps, conv_bias, residual=None, *,
                   H, W, pad, kh, kw, out_dtype):
    """out = conv(relu(x*scale + shift)) [+ residual] on NHWC activations."""
    B, Hp, Wp, C = x_pad.shape
    assert Hp == H + 2 * pad and Wp == W + 2 * pad
    Cout = w_taps.shape[-1]
    th = _pick_row_tile(H)
    add_residual = residual is not None

    kernel = functools.partial(_norm_relu_conv_kernel, H=H, W=W, pad=pad,
                               kh=kh, kw=kw, th=th, add_residual=add_residual)

    in_specs = [
        # Whole padded image per batch sample; stays resident across row tiles.
        pl.BlockSpec((1, Hp, Wp, C), lambda b, r: (b, 0, 0, 0)),
        pl.BlockSpec((1, 1, C), lambda b, r: (b, 0, 0)),
        pl.BlockSpec((1, 1, C), lambda b, r: (b, 0, 0)),
        pl.BlockSpec((kh * kw, C, Cout), lambda b, r: (0, 0, 0)),
        pl.BlockSpec((1, 1, Cout), lambda b, r: (0, 0, 0)),
    ]
    args = [x_pad, scale, shift, w_taps, conv_bias]
    if add_residual:
        in_specs.append(pl.BlockSpec((1, th, W, C), lambda b, r: (b, r, 0, 0)))
        args.append(residual)

    return pl.pallas_call(
        kernel,
        out_shape=jax.ShapeDtypeStruct((B, H, W, Cout), out_dtype),
        grid_spec=pltpu.PrefetchScalarGridSpec(
            num_scalar_prefetch=0,
            grid=(B, H // th),
            in_specs=in_specs,
            out_specs=pl.BlockSpec((1, th, W, Cout), lambda b, r: (b, r, 0, 0)),
        ),
        compiler_params=pltpu.CompilerParams(
            dimension_semantics=("parallel", "parallel"),
            vmem_limit_bytes=VMEM_LIMIT),
    )(*args)


# ----------------------------------------------------------------------------
# ResBlock2d forward
# ----------------------------------------------------------------------------
def res_block_2d_forward(x_nchw, params, *, kernel_size, padding):
    kh = kw = kernel_size
    assert 2 * padding == kernel_size - 1, (
        "ResBlock2d's residual add requires spatial-preserving padding")
    x = jnp.transpose(x_nchw, (0, 2, 3, 1)).astype(jnp.float32)    # NCHW -> NHWC
    B, H, W, C = x.shape
    padw = ((0, 0), (padding, padding), (padding, padding), (0, 0))

    # conv1( relu(IN1(x)) )  — IN1 + ReLU fused into the conv input stage.
    s1, t1 = instance_norm_scale_shift(x, params["norm1_gamma"],
                                       params["norm1_beta"])
    h1 = norm_relu_conv(jnp.pad(x.astype(jnp.bfloat16), padw), s1, t1,
                        params["conv1_w"], params["conv1_b"], residual=None,
                        H=H, W=W, pad=padding, kh=kh, kw=kw,
                        out_dtype=jnp.bfloat16)

    # conv2( relu(IN2(h1)) ) + x  — residual add fused into conv2's epilogue.
    s2, t2 = instance_norm_scale_shift(h1, params["norm2_gamma"],
                                       params["norm2_beta"])
    out = norm_relu_conv(jnp.pad(h1, padw), s2, t2,
                         params["conv2_w"], params["conv2_b"], residual=x,
                         H=H, W=W, pad=padding, kh=kh, kw=kw,
                         out_dtype=jnp.float32)
    return jnp.transpose(out, (0, 3, 1, 2))                         # NHWC -> NCHW


# ----------------------------------------------------------------------------
# Deterministic parameter init + pure-JAX reference (for a sanity check)
# ----------------------------------------------------------------------------
def init_params(key, *, in_features, kernel_size):
    ks = jax.random.split(key, 8)
    fan_in = in_features * kernel_size * kernel_size
    bound = 1.0 / math.sqrt(fan_in)
    taps = kernel_size * kernel_size

    def conv_init(kw_key, kb_key):
        w = jax.random.uniform(
            kw_key, (kernel_size, kernel_size, in_features, in_features),
            jnp.float32, -bound, bound)
        b = jax.random.uniform(kb_key, (in_features,), jnp.float32, -bound, bound)
        return w, b

    w1, b1 = conv_init(ks[0], ks[1])
    w2, b2 = conv_init(ks[2], ks[3])
    g1 = jax.random.uniform(ks[4], (in_features,), jnp.float32, 0.5, 1.5)
    bn1 = 0.1 * jax.random.normal(ks[5], (in_features,), jnp.float32)
    g2 = jax.random.uniform(ks[6], (in_features,), jnp.float32, 0.5, 1.5)
    bn2 = 0.1 * jax.random.normal(ks[7], (in_features,), jnp.float32)

    # Kernel-side params: pre-reshaped to (taps, Cin, Cout), pre-cast to bf16,
    # biases/affine as (1, 1, C) — done once, OUTSIDE the jitted forward.
    params = {
        "conv1_w": w1.reshape(taps, in_features, in_features).astype(jnp.bfloat16),
        "conv2_w": w2.reshape(taps, in_features, in_features).astype(jnp.bfloat16),
        "conv1_b": b1.reshape(1, 1, in_features),
        "conv2_b": b2.reshape(1, 1, in_features),
        "norm1_gamma": g1.reshape(1, 1, in_features),
        "norm1_beta": bn1.reshape(1, 1, in_features),
        "norm2_gamma": g2.reshape(1, 1, in_features),
        "norm2_beta": bn2.reshape(1, 1, in_features),
    }
    ref_params = {"w1": w1, "b1": b1, "w2": w2, "b2": b2,
                  "g1": g1, "bn1": bn1, "g2": g2, "bn2": bn2}
    return params, ref_params


def reference_forward(x_nchw, rp, *, kernel_size, padding):
    def inorm(h, g, b):
        m = jnp.mean(h, axis=(2, 3), keepdims=True)
        v = jnp.mean(jnp.square(h - m), axis=(2, 3), keepdims=True)
        return ((h - m) * jax.lax.rsqrt(v + EPS) * g[None, :, None, None]
                + b[None, :, None, None])

    def conv(h, w, b):
        out = jax.lax.conv_general_dilated(
            h, w, window_strides=(1, 1),
            padding=[(padding, padding), (padding, padding)],
            dimension_numbers=("NCHW", "HWIO", "NCHW"),
            precision=jax.lax.Precision.HIGHEST)
        return out + b[None, :, None, None]

    h = jax.nn.relu(inorm(x_nchw, rp["g1"], rp["bn1"]))
    h = conv(h, rp["w1"], rp["b1"])
    h = jax.nn.relu(inorm(h, rp["g2"], rp["bn2"]))
    h = conv(h, rp["w2"], rp["b2"])
    return h + x_nchw


# ----------------------------------------------------------------------------
if __name__ == "__main__":
    B, C, H, W = 2, 32, 16, 16
    KSIZE, PAD = 3, 1

    key = jax.random.PRNGKey(0)
    pkey, xkey = jax.random.split(key)
    params, ref_params = init_params(pkey, in_features=C, kernel_size=KSIZE)
    x = jax.random.normal(xkey, (B, C, H, W), jnp.float32)

    fwd = jax.jit(functools.partial(res_block_2d_forward,
                                    kernel_size=KSIZE, padding=PAD))
    out = jax.block_until_ready(fwd(x, params))

    assert out.shape == (B, C, H, W), out.shape
    assert bool(jnp.all(jnp.isfinite(out)))

    ref = reference_forward(x, ref_params, kernel_size=KSIZE, padding=PAD)
    max_err = float(jnp.max(jnp.abs(out - ref)))
    assert max_err < 0.15, f"max |pallas - reference| = {max_err}"
    print("KERNEL_OK")
</pallas_src>

<mosaic_0001>
module attributes {stable_mosaic.version = 11 : i64} {
  func.func @_norm_relu_conv_kernel(%arg0: i32, %arg1: i32, %arg2: memref<1x18x18x32xbf16, #tpu.memory_space<vmem>>, %arg3: memref<1x1x32xf32, #tpu.memory_space<vmem>>, %arg4: memref<1x1x32xf32, #tpu.memory_space<vmem>>, %arg5: memref<9x32x32xbf16, #tpu.memory_space<vmem>>, %arg6: memref<1x1x32xf32, #tpu.memory_space<vmem>>, %arg7: memref<1x8x16x32xbf16, #tpu.memory_space<vmem>>) attributes {dimension_semantics = [#tpu.dimension_semantics<parallel>, #tpu.dimension_semantics<parallel>], iteration_bounds = array<i64: 2, 2>, scalar_prefetch = 0 : i64, scratch_operands = 0 : i64, tpu.core_type = #tpu.core_type<tc>, window_params = [{transform_indices = @transform_0, window_bounds = array<i64: 1, 18, 18, 32>}, {transform_indices = @transform_1, window_bounds = array<i64: 1, 1, 32>}, {transform_indices = @transform_2, window_bounds = array<i64: 1, 1, 32>}, {pipeline_mode = #tpu.pipeline_mode<synchronous>, transform_indices = @transform_3, window_bounds = array<i64: 9, 32, 32>}, {pipeline_mode = #tpu.pipeline_mode<synchronous>, transform_indices = @transform_4, window_bounds = array<i64: 1, 1, 32>}, {transform_indices = @transform_5, window_bounds = array<i64: 1, 8, 16, 32>}]} {
    %c8_i32 = arith.constant 8 : i32
    %0 = arith.muli %arg1, %c8_i32 : i32
    %1 = tpu.assume_multiple %0, 8 : i32
    %c0 = arith.constant 0 : index
    %2 = arith.index_cast %1 : i32 to index
    %c0_0 = arith.constant 0 : index
    %c0_1 = arith.constant 0 : index
    %3 = vector.load %arg2[%c0, %2, %c0_0, %c0_1] : memref<1x18x18x32xbf16, #tpu.memory_space<vmem>>, vector<1x10x18x32xbf16>
    %4 = vector.shape_cast %3 : vector<1x10x18x32xbf16> to vector<10x18x32xbf16>
    %5 = arith.extf %4 : vector<10x18x32xbf16> to vector<10x18x32xf32>
    %c0_2 = arith.constant 0 : index
    %c0_3 = arith.constant 0 : index
    %c0_4 = arith.constant 0 : index
    %6 = vector.load %arg3[%c0_2, %c0_3, %c0_4] : memref<1x1x32xf32, #tpu.memory_space<vmem>>, vector<1x1x32xf32>
    %7 = vector.broadcast %6 : vector<1x1x32xf32> to vector<10x18x32xf32>
    %8 = arith.mulf %5, %7 : vector<10x18x32xf32>
    %c0_5 = arith.constant 0 : index
    %c0_6 = arith.constant 0 : index
    %c0_7 = arith.constant 0 : index
    %9 = vector.load %arg4[%c0_5, %c0_6, %c0_7] : memref<1x1x32xf32, #tpu.memory_space<vmem>>, vector<1x1x32xf32>
    %10 = vector.broadcast %9 : vector<1x1x32xf32> to vector<10x18x32xf32>
    %11 = arith.addf %8, %10 : vector<10x18x32xf32>
    %cst = arith.constant 0.000000e+00 : f32
    %12 = vector.broadcast %cst : f32 to vector<10x18x32xf32>
    %13 = arith.maximumf %11, %12 : vector<10x18x32xf32>
    %14 = tpu.iota {dimensions = array<i32: 0>} : vector<10x18x1xi32>
    %15 = vector.broadcast %1 : i32 to vector<10x18x1xi32>
    %16 = arith.addi %14, %15 : vector<10x18x1xi32>
    %17 = tpu.iota {dimensions = array<i32: 1>} : vector<10x18x1xi32>
    %c1_i32 = arith.constant 1 : i32
    %18 = vector.broadcast %c1_i32 : i32 to vector<10x18x1xi32>
    %19 = arith.cmpi sge, %16, %18 : vector<10x18x1xi32>
    %c17_i32 = arith.constant 17 : i32
    %20 = vector.broadcast %c17_i32 : i32 to vector<10x18x1xi32>
    %21 = arith.cmpi slt, %16, %20 : vector<10x18x1xi32>
    %22 = arith.andi %19, %21 : vector<10x18x1xi1>
    %c1_i32_8 = arith.constant 1 : i32
    %23 = vector.broadcast %c1_i32_8 : i32 to vector<10x18x1xi32>
    %24 = arith.cmpi sge, %17, %23 : vector<10x18x1xi32>
    %25 = arith.andi %22, %24 : vector<10x18x1xi1>
    %c17_i32_9 = arith.constant 17 : i32
    %26 = vector.broadcast %c17_i32_9 : i32 to vector<10x18x1xi32>
    %27 = arith.cmpi slt, %17, %26 : vector<10x18x1xi32>
    %28 = arith.andi %25, %27 : vector<10x18x1xi1>
    %cst_10 = arith.constant 0.000000e+00 : f32
    %29 = vector.shape_cast %28 : vector<10x18x1xi1> to vector<10x18x1xi1>
    %30 = vector.broadcast %29 : vector<10x18x1xi1> to vector<10x18x32xi1>
    %31 = vector.broadcast %cst_10 : f32 to vector<10x18x32xf32>
    %32 = arith.select %30, %13, %31 : vector<10x18x32xi1>, vector<10x18x32xf32>
    %33 = arith.truncf %32 : vector<10x18x32xf32> to vector<10x18x32xbf16>
    %c0_11 = arith.constant 0 : index
    %c0_12 = arith.constant 0 : index
    %c0_13 = arith.constant 0 : index
    %34 = vector.load %arg6[%c0_11, %c0_12, %c0_13] : memref<1x1x32xf32, #tpu.memory_space<vmem>>, vector<1x1x32xf32>
    %35 = vector.shape_cast %34 : vector<1x1x32xf32> to vector<1x32xf32>
    %36 = vector.shape_cast %35 : vector<1x32xf32> to vector<1x32xf32>
    %37 = vector.broadcast %36 : vector<1x32xf32> to vector<128x32xf32>
    %38 = vector.extract_strided_slice %33 {offsets = [0, 0, 0], sizes = [8, 16, 32], strides = [1, 1, 1]} : vector<10x18x32xbf16> to vector<8x16x32xbf16>
    %39 = vector.shape_cast %38 : vector<8x16x32xbf16> to vector<128x32xbf16>
    %c0_14 = arith.constant 0 : index
    %c0_15 = arith.constant 0 : index
    %c0_16 = arith.constant 0 : index
    %40 = vector.load %arg5[%c0_14, %c0_15, %c0_16] : memref<9x32x32xbf16, #tpu.memory_space<vmem>>, vector<1x32x32xbf16>
    %41 = vector.shape_cast %40 : vector<1x32x32xbf16> to vector<32x32xbf16>
    %cst_17 = arith.constant dense<0.000000e+00> : vector<128x32xf32>
    %42 = tpu.matmul %39, %41, %cst_17 {dimension_numbers = #tpu.dot_dimension_numbers<[1], [0], [0], [1], [0, 0, 1, 1], [], []>} : vector<128x32xbf16>, vector<32x32xbf16>, vector<128x32xf32> -> vector<128x32xf32>
    %43 = arith.addf %37, %42 : vector<128x32xf32>
    %44 = vector.extract_strided_slice %33 {offsets = [0, 1, 0], sizes = [8, 16, 32], strides = [1, 1, 1]} : vector<10x18x32xbf16> to vector<8x16x32xbf16>
    %45 = vector.shape_cast %44 : vector<8x16x32xbf16> to vector<128x32xbf16>
    %c1 = arith.constant 1 : index
    %c0_18 = arith.constant 0 : index
    %c0_19 = arith.constant 0 : index
    %46 = vector.load %arg5[%c1, %c0_18, %c0_19] : memref<9x32x32xbf16, #tpu.memory_space<vmem>>, vector<1x32x32xbf16>
    %47 = vector.shape_cast %46 : vector<1x32x32xbf16> to vector<32x32xbf16>
    %cst_20 = arith.constant dense<0.000000e+00> : vector<128x32xf32>
    %48 = tpu.matmul %45, %47, %cst_20 {dimension_numbers = #tpu.dot_dimension_numbers<[1], [0], [0], [1], [0, 0, 1, 1], [], []>} : vector<128x32xbf16>, vector<32x32xbf16>, vector<128x32xf32> -> vector<128x32xf32>
    %49 = arith.addf %43, %48 : vector<128x32xf32>
    %50 = vector.extract_strided_slice %33 {offsets = [0, 2, 0], sizes = [8, 16, 32], strides = [1, 1, 1]} : vector<10x18x32xbf16> to vector<8x16x32xbf16>
    %51 = vector.shape_cast %50 : vector<8x16x32xbf16> to vector<128x32xbf16>
    %c2 = arith.constant 2 : index
    %c0_21 = arith.constant 0 : index
    %c0_22 = arith.constant 0 : index
    %52 = vector.load %arg5[%c2, %c0_21, %c0_22] : memref<9x32x32xbf16, #tpu.memory_space<vmem>>, vector<1x32x32xbf16>
    %53 = vector.shape_cast %52 : vector<1x32x32xbf16> to vector<32x32xbf16>
    %cst_23 = arith.constant dense<0.000000e+00> : vector<128x32xf32>
    %54 = tpu.matmul %51, %53, %cst_23 {dimension_numbers = #tpu.dot_dimension_numbers<[1], [0], [0], [1], [0, 0, 1, 1], [], []>} : vector<128x32xbf16>, vector<32x32xbf16>, vector<128x32xf32> -> vector<128x32xf32>
    %55 = arith.addf %49, %54 : vector<128x32xf32>
    %56 = vector.extract_strided_slice %33 {offsets = [1, 0, 0], sizes = [8, 16, 32], strides = [1, 1, 1]} : vector<10x18x32xbf16> to vector<8x16x32xbf16>
    %57 = vector.shape_cast %56 : vector<8x16x32xbf16> to vector<128x32xbf16>
    %c3 = arith.constant 3 : index
    %c0_24 = arith.constant 0 : index
    %c0_25 = arith.constant 0 : index
    %58 = vector.load %arg5[%c3, %c0_24, %c0_25] : memref<9x32x32xbf16, #tpu.memory_space<vmem>>, vector<1x32x32xbf16>
    %59 = vector.shape_cast %58 : vector<1x32x32xbf16> to vector<32x32xbf16>
    %cst_26 = arith.constant dense<0.000000e+00> : vector<128x32xf32>
    %60 = tpu.matmul %57, %59, %cst_26 {dimension_numbers = #tpu.dot_dimension_numbers<[1], [0], [0], [1], [0, 0, 1, 1], [], []>} : vector<128x32xbf16>, vector<32x32xbf16>, vector<128x32xf32> -> vector<128x32xf32>
    %61 = arith.addf %55, %60 : vector<128x32xf32>
    %62 = vector.extract_strided_slice %33 {offsets = [1, 1, 0], sizes = [8, 16, 32], strides = [1, 1, 1]} : vector<10x18x32xbf16> to vector<8x16x32xbf16>
    %63 = vector.shape_cast %62 : vector<8x16x32xbf16> to vector<128x32xbf16>
    %c4 = arith.constant 4 : index
    %c0_27 = arith.constant 0 : index
    %c0_28 = arith.constant 0 : index
    %64 = vector.load %arg5[%c4, %c0_27, %c0_28] : memref<9x32x32xbf16, #tpu.memory_space<vmem>>, vector<1x32x32xbf16>
    %65 = vector.shape_cast %64 : vector<1x32x32xbf16> to vector<32x32xbf16>
    %cst_29 = arith.constant dense<0.000000e+00> : vector<128x32xf32>
    %66 = tpu.matmul %63, %65, %cst_29 {dimension_numbers = #tpu.dot_dimension_numbers<[1], [0], [0], [1], [0, 0, 1, 1], [], []>} : vector<128x32xbf16>, vector<32x32xbf16>, vector<128x32xf32> -> vector<128x32xf32>
    %67 = arith.addf %61, %66 : vector<128x32xf32>
    %68 = vector.extract_strided_slice %33 {offsets = [1, 2, 0], sizes = [8, 16, 32], strides = [1, 1, 1]} : vector<10x18x32xbf16> to vector<8x16x32xbf16>
    %69 = vector.shape_cast %68 : vector<8x16x32xbf16> to vector<128x32xbf16>
    %c5 = arith.constant 5 : index
    %c0_30 = arith.constant 0 : index
    %c0_31 = arith.constant 0 : index
    %70 = vector.load %arg5[%c5, %c0_30, %c0_31] : memref<9x32x32xbf16, #tpu.memory_space<vmem>>, vector<1x32x32xbf16>
    %71 = vector.shape_cast %70 : vector<1x32x32xbf16> to vector<32x32xbf16>
    %cst_32 = arith.constant dense<0.000000e+00> : vector<128x32xf32>
    %72 = tpu.matmul %69, %71, %cst_32 {dimension_numbers = #tpu.dot_dimension_numbers<[1], [0], [0], [1], [0, 0, 1, 1], [], []>} : vector<128x32xbf16>, vector<32x32xbf16>, vector<128x32xf32> -> vector<128x32xf32>
    %73 = arith.addf %67, %72 : vector<128x32xf32>
    %74 = vector.extract_strided_slice %33 {offsets = [2, 0, 0], sizes = [8, 16, 32], strides = [1, 1, 1]} : vector<10x18x32xbf16> to vector<8x16x32xbf16>
    %75 = vector.shape_cast %74 : vector<8x16x32xbf16> to vector<128x32xbf16>
    %c6 = arith.constant 6 : index
    %c0_33 = arith.constant 0 : index
    %c0_34 = arith.constant 0 : index
    %76 = vector.load %arg5[%c6, %c0_33, %c0_34] : memref<9x32x32xbf16, #tpu.memory_space<vmem>>, vector<1x32x32xbf16>
    %77 = vector.shape_cast %76 : vector<1x32x32xbf16> to vector<32x32xbf16>
    %cst_35 = arith.constant dense<0.000000e+00> : vector<128x32xf32>
    %78 = tpu.matmul %75, %77, %cst_35 {dimension_numbers = #tpu.dot_dimension_numbers<[1], [0], [0], [1], [0, 0, 1, 1], [], []>} : vector<128x32xbf16>, vector<32x32xbf16>, vector<128x32xf32> -> vector<128x32xf32>
    %79 = arith.addf %73, %78 : vector<128x32xf32>
    %80 = vector.extract_strided_slice %33 {offsets = [2, 1, 0], sizes = [8, 16, 32], strides = [1, 1, 1]} : vector<10x18x32xbf16> to vector<8x16x32xbf16>
    %81 = vector.shape_cast %80 : vector<8x16x32xbf16> to vector<128x32xbf16>
    %c7 = arith.constant 7 : index
    %c0_36 = arith.constant 0 : index
    %c0_37 = arith.constant 0 : index
    %82 = vector.load %arg5[%c7, %c0_36, %c0_37] : memref<9x32x32xbf16, #tpu.memory_space<vmem>>, vector<1x32x32xbf16>
    %83 = vector.shape_cast %82 : vector<1x32x32xbf16> to vector<32x32xbf16>
    %cst_38 = arith.constant dense<0.000000e+00> : vector<128x32xf32>
    %84 = tpu.matmul %81, %83, %cst_38 {dimension_numbers = #tpu.dot_dimension_numbers<[1], [0], [0], [1], [0, 0, 1, 1], [], []>} : vector<128x32xbf16>, vector<32x32xbf16>, vector<128x32xf32> -> vector<128x32xf32>
    %85 = arith.addf %79, %84 : vector<128x32xf32>
    %86 = vector.extract_strided_slice %33 {offsets = [2, 2, 0], sizes = [8, 16, 32], strides = [1, 1, 1]} : vector<10x18x32xbf16> to vector<8x16x32xbf16>
    %87 = vector.shape_cast %86 : vector<8x16x32xbf16> to vector<128x32xbf16>
    %c8 = arith.constant 8 : index
    %c0_39 = arith.constant 0 : index
    %c0_40 = arith.constant 0 : index
    %88 = vector.load %arg5[%c8, %c0_39, %c0_40] : memref<9x32x32xbf16, #tpu.memory_space<vmem>>, vector<1x32x32xbf16>
    %89 = vector.shape_cast %88 : vector<1x32x32xbf16> to vector<32x32xbf16>
    %cst_41 = arith.constant dense<0.000000e+00> : vector<128x32xf32>
    %90 = tpu.matmul %87, %89, %cst_41 {dimension_numbers = #tpu.dot_dimension_numbers<[1], [0], [0], [1], [0, 0, 1, 1], [], []>} : vector<128x32xbf16>, vector<32x32xbf16>, vector<128x32xf32> -> vector<128x32xf32>
    %91 = arith.addf %85, %90 : vector<128x32xf32>
    %92 = vector.shape_cast %91 : vector<128x32xf32> to vector<8x16x32xf32>
    %93 = arith.truncf %92 : vector<8x16x32xf32> to vector<8x16x32xbf16>
    %c0_42 = arith.constant 0 : index
    %c0_43 = arith.constant 0 : index
    %c0_44 = arith.constant 0 : index
    %c0_45 = arith.constant 0 : index
    %94 = vector.load %arg7[%c0_42, %c0_43, %c0_44, %c0_45] : memref<1x8x16x32xbf16, #tpu.memory_space<vmem>>, vector<1x8x16x32xbf16>
    %95 = vector.shape_cast %94 : vector<1x8x16x32xbf16> to vector<8x16x32xbf16>
    %96 = vector.shape_cast %93 : vector<8x16x32xbf16> to vector<1x8x16x32xbf16>
    tpu.vector_store %arg7[%c0_42, %c0_43, %c0_44, %c0_45], %96 {strides = array<i32>} : memref<1x8x16x32xbf16, #tpu.memory_space<vmem>>, vector<1x8x16x32xbf16>,
    return
  }
  func.func @transform_0(%arg0: i32, %arg1: i32) -> (i32, i32, i32, i32) {
    %c0_i32 = arith.constant 0 : i32
    %c0_i32_0 = arith.constant 0 : i32
    %c0_i32_1 = arith.constant 0 : i32
    %c0_i32_2 = arith.constant 0 : i32
    return %arg0, %c0_i32, %c0_i32_0, %c0_i32_1 : i32, i32, i32, i32
  }
  func.func @transform_1(%arg0: i32, %arg1: i32) -> (i32, i32, i32) {
    %c0_i32 = arith.constant 0 : i32
    %c0_i32_0 = arith.constant 0 : i32
    %c0_i32_1 = arith.constant 0 : i32
    return %arg0, %c0_i32, %c0_i32_0 : i32, i32, i32
  }
  func.func @transform_2(%arg0: i32, %arg1: i32) -> (i32, i32, i32) {
    %c0_i32 = arith.constant 0 : i32
    %c0_i32_0 = arith.constant 0 : i32
    %c0_i32_1 = arith.constant 0 : i32
    return %arg0, %c0_i32, %c0_i32_0 : i32, i32, i32
  }
  func.func @transform_3(%arg0: i32, %arg1: i32) -> (i32, i32, i32) {
    %c0_i32 = arith.constant 0 : i32
    %c0_i32_0 = arith.constant 0 : i32
    %c0_i32_1 = arith.constant 0 : i32
    %c0_i32_2 = arith.constant 0 : i32
    return %c0_i32, %c0_i32_0, %c0_i32_1 : i32, i32, i32
  }
  func.func @transform_4(%arg0: i32, %arg1: i32) -> (i32, i32, i32) {
    %c0_i32 = arith.constant 0 : i32
    %c0_i32_0 = arith.constant 0 : i32
    %c0_i32_1 = arith.constant 0 : i32
    %c0_i32_2 = arith.constant 0 : i32
    return %c0_i32, %c0_i32_0, %c0_i32_1 : i32, i32, i32
  }
  func.func @transform_5(%arg0: i32, %arg1: i32) -> (i32, i32, i32, i32) {
    %c0_i32 = arith.constant 0 : i32
    %c0_i32_0 = arith.constant 0 : i32
    %c0_i32_1 = arith.constant 0 : i32
    return %arg0, %arg1, %c0_i32, %c0_i32_0 : i32, i32, i32, i32
  }
}

module attributes {stable_mosaic.version = 11 : i64} {
  func.func @_in_stats_kernel(%arg0: i32, %arg1: i32, %arg2: memref<1x8x16x32xf32, #tpu.memory_space<vmem>>, %arg3: memref<1x1x32xf32, #tpu.memory_space<vmem>>, %arg4: memref<1x1x32xf32, #tpu.memory_space<vmem>>, %arg5: memref<1x1x32xf32, #tpu.memory_space<vmem>>, %arg6: memref<1x1x32xf32, #tpu.memory_space<vmem>>, %arg7: memref<1x1x32xf32, #tpu.memory_space<vmem>>, %arg8: memref<1x1x32xf32, #tpu.memory_space<vmem>>) attributes {dimension_semantics = [#tpu.dimension_semantics<parallel>, #tpu.dimension_semantics<arbitrary>], iteration_bounds = array<i64: 2, 2>, scalar_prefetch = 0 : i64, scratch_operands = 2 : i64, tpu.core_type = #tpu.core_type<tc>, window_params = [{transform_indices = @transform_0, window_bounds = array<i64: 1, 8, 16, 32>}, {pipeline_mode = #tpu.pipeline_mode<synchronous>, transform_indices = @transform_1, window_bounds = array<i64: 1, 1, 32>}, {pipeline_mode = #tpu.pipeline_mode<synchronous>, transform_indices = @transform_2, window_bounds = array<i64: 1, 1, 32>}, {transform_indices = @transform_3, window_bounds = array<i64: 1, 1, 32>}, {transform_indices = @transform_4, window_bounds = array<i64: 1, 1, 32>}]} {
    %c0_i32 = arith.constant 0 : i32
    %0 = arith.cmpi eq, %arg1, %c0_i32 : i32
    %1 = arith.extui %0 : i1 to i32
    %c0_i32_0 = arith.constant 0 : i32
    %2 = arith.cmpi ne, %1, %c0_i32_0 : i32
    scf.if %2 {
      %cst_20 = arith.constant 0.000000e+00 : f32
      %23 = vector.broadcast %cst_20 : f32 to vector<1x1x32xf32>
      %c0_21 = arith.constant 0 : index
      %c0_22 = arith.constant 0 : index
      %c0_23 = arith.constant 0 : index
      %24 = vector.load %arg7[%c0_21, %c0_22, %c0_23] : memref<1x1x32xf32, #tpu.memory_space<vmem>>, vector<1x1x32xf32>
      tpu.vector_store %arg7[%c0_21, %c0_22, %c0_23], %23 {strides = array<i32>} : memref<1x1x32xf32, #tpu.memory_space<vmem>>, vector<1x1x32xf32>,
      %cst_24 = arith.constant 0.000000e+00 : f32
      %25 = vector.broadcast %cst_24 : f32 to vector<1x1x32xf32>
      %c0_25 = arith.constant 0 : index
      %c0_26 = arith.constant 0 : index
      %c0_27 = arith.constant 0 : index
      %26 = vector.load %arg8[%c0_25, %c0_26, %c0_27] : memref<1x1x32xf32, #tpu.memory_space<vmem>>, vector<1x1x32xf32>
      tpu.vector_store %arg8[%c0_25, %c0_26, %c0_27], %25 {strides = array<i32>} : memref<1x1x32xf32, #tpu.memory_space<vmem>>, vector<1x1x32xf32>,
    } else {
    }
    %c0 = arith.constant 0 : index
    %c0_1 = arith.constant 0 : index
    %c0_2 = arith.constant 0 : index
    %c0_3 = arith.constant 0 : index
    %3 = vector.load %arg2[%c0, %c0_1, %c0_2, %c0_3] : memref<1x8x16x32xf32, #tpu.memory_space<vmem>>, vector<1x8x16x32xf32>
    %4 = vector.shape_cast %3 : vector<1x8x16x32xf32> to vector<8x16x32xf32>
    %cst = arith.constant dense<0.000000e+00> : vector<16x32xf32>
    %5 = vector.multi_reduction <add>, %4, %cst [0] : vector<8x16x32xf32> to vector<16x32xf32>
    %6 = vector.shape_cast %5 : vector<16x32xf32> to vector<1x16x32xf32>
    %c0_4 = arith.constant 0 : index
    %c0_5 = arith.constant 0 : index
    %c0_6 = arith.constant 0 : index
    %7 = vector.load %arg7[%c0_4, %c0_5, %c0_6] : memref<1x1x32xf32, #tpu.memory_space<vmem>>, vector<1x1x32xf32>
    %cst_7 = arith.constant dense<0.000000e+00> : vector<1x32xf32>
    %8 = vector.multi_reduction <add>, %6, %cst_7 [1] : vector<1x16x32xf32> to vector<1x32xf32>
    %9 = vector.shape_cast %8 : vector<1x32xf32> to vector<1x1x32xf32>
    %10 = arith.addf %7, %9 : vector<1x1x32xf32>
    %c0_8 = arith.constant 0 : index
    %c0_9 = arith.constant 0 : index
    %c0_10 = arith.constant 0 : index
    %11 = vector.load %arg7[%c0_8, %c0_9, %c0_10] : memref<1x1x32xf32, #tpu.memory_space<vmem>>, vector<1x1x32xf32>
    tpu.vector_store %arg7[%c0_8, %c0_9, %c0_10], %10 {strides = array<i32>} : memref<1x1x32xf32, #tpu.memory_space<vmem>>, vector<1x1x32xf32>,
    %12 = arith.mulf %4, %4 : vector<8x16x32xf32>
    %cst_11 = arith.constant dense<0.000000e+00> : vector<16x32xf32>
    %13 = vector.multi_reduction <add>, %12, %cst_11 [0] : vector<8x16x32xf32> to vector<16x32xf32>
    %14 = vector.shape_cast %13 : vector<16x32xf32> to vector<1x16x32xf32>
    %c0_12 = arith.constant 0 : index
    %c0_13 = arith.constant 0 : index
    %c0_14 = arith.constant 0 : index
    %15 = vector.load %arg8[%c0_12, %c0_13, %c0_14] : memref<1x1x32xf32, #tpu.memory_space<vmem>>, vector<1x1x32xf32>
    %cst_15 = arith.constant dense<0.000000e+00> : vector<1x32xf32>
    %16 = vector.multi_reduction <add>, %14, %cst_15 [1] : vector<1x16x32xf32> to vector<1x32xf32>
    %17 = vector.shape_cast %16 : vector<1x32xf32> to vector<1x1x32xf32>
    %18 = arith.addf %15, %17 : vector<1x1x32xf32>
    %c0_16 = arith.constant 0 : index
    %c0_17 = arith.constant 0 : index
    %c0_18 = arith.constant 0 : index
    %19 = vector.load %arg8[%c0_16, %c0_17, %c0_18] : memref<1x1x32xf32, #tpu.memory_space<vmem>>, vector<1x1x32xf32>
    tpu.vector_store %arg8[%c0_16, %c0_17, %c0_18], %18 {strides = array<i32>} : memref<1x1x32xf32, #tpu.memory_space<vmem>>, vector<1x1x32xf32>,
    %c1_i32 = arith.constant 1 : i32
    %20 = arith.cmpi eq, %arg1, %c1_i32 : i32
    %21 = arith.extui %20 : i1 to i32
    %c0_i32_19 = arith.constant 0 : i32
    %22 = arith.cmpi ne, %21, %c0_i32_19 : i32
    scf.if %22 {
      %c0_20 = arith.constant 0 : index
      %c0_21 = arith.constant 0 : index
      %c0_22 = arith.constant 0 : index
      %23 = vector.load %arg7[%c0_20, %c0_21, %c0_22] : memref<1x1x32xf32, #tpu.memory_space<vmem>>, vector<1x1x32xf32>
      %cst_23 = arith.constant 3.906250e-03 : f32
      %24 = vector.broadcast %cst_23 : f32 to vector<1x1x32xf32>
      %25 = arith.mulf %23, %24 : vector<1x1x32xf32>
      %c0_24 = arith.constant 0 : index
      %c0_25 = arith.constant 0 : index
      %c0_26 = arith.constant 0 : index
      %26 = vector.load %arg8[%c0_24, %c0_25, %c0_26] : memref<1x1x32xf32, #tpu.memory_space<vmem>>, vector<1x1x32xf32>
      %cst_27 = arith.constant 3.906250e-03 : f32
      %27 = vector.broadcast %cst_27 : f32 to vector<1x1x32xf32>
      %28 = arith.mulf %26, %27 : vector<1x1x32xf32>
      %29 = arith.mulf %25, %25 : vector<1x1x32xf32>
      %30 = arith.subf %28, %29 : vector<1x1x32xf32>
      %cst_28 = arith.constant 0.000000e+00 : f32
      %31 = vector.broadcast %cst_28 : f32 to vector<1x1x32xf32>
      %32 = arith.maximumf %30, %31 : vector<1x1x32xf32>
      %cst_29 = arith.constant 9.99999974E-6 : f32
      %33 = vector.broadcast %cst_29 : f32 to vector<1x1x32xf32>
      %34 = arith.addf %32, %33 : vector<1x1x32xf32>
      %35 = math.rsqrt %34 : vector<1x1x32xf32>
      %c0_30 = arith.constant 0 : index
      %c0_31 = arith.constant 0 : index
      %c0_32 = arith.constant 0 : index
      %36 = vector.load %arg3[%c0_30, %c0_31, %c0_32] : memref<1x1x32xf32, #tpu.memory_space<vmem>>, vector<1x1x32xf32>
      %37 = arith.mulf %36, %35 : vector<1x1x32xf32>
      %c0_33 = arith.constant 0 : index
      %c0_34 = arith.constant 0 : index
      %c0_35 = arith.constant 0 : index
      %38 = vector.load %arg5[%c0_33, %c0_34, %c0_35] : memref<1x1x32xf32, #tpu.memory_space<vmem>>, vector<1x1x32xf32>
      tpu.vector_store %arg5[%c0_33, %c0_34, %c0_35], %37 {strides = array<i32>} : memref<1x1x32xf32, #tpu.memory_space<vmem>>, vector<1x1x32xf32>,
      %c0_36 = arith.constant 0 : index
      %c0_37 = arith.constant 0 : index
      %c0_38 = arith.constant 0 : index
      %39 = vector.load %arg4[%c0_36, %c0_37, %c0_38] : memref<1x1x32xf32, #tpu.memory_space<vmem>>, vector<1x1x32xf32>
      %40 = arith.mulf %25, %36 : vector<1x1x32xf32>
      %41 = arith.mulf %40, %35 : vector<1x1x32xf32>
      %42 = arith.subf %39, %41 : vector<1x1x32xf32>
      %c0_39 = arith.constant 0 : index
      %c0_40 = arith.constant 0 : index
      %c0_41 = arith.constant 0 : index
      %43 = vector.load %arg6[%c0_39, %c0_40, %c0_41] : memref<1x1x32xf32, #tpu.memory_space<vmem>>, vector<1x1x32xf32>
      tpu.vector_store %arg6[%c0_39, %c0_40, %c0_41], %42 {strides = array<i32>} : memref<1x1x32xf32, #tpu.memory_space<vmem>>, vector<1x1x32xf32>,
    } else {
    }
    return
  }
  func.func @transform_0(%arg0: i32, %arg1: i32) -> (i32, i32, i32, i32) {
    %c0_i32 = arith.constant 0 : i32
    %c0_i32_0 = arith.constant 0 : i32
    %c0_i32_1 = arith.constant 0 : i32
    return %arg0, %arg1, %c0_i32, %c0_i32_0 : i32, i32, i32, i32
  }
  func.func @transform_1(%arg0: i32, %arg1: i32) -> (i32, i32, i32) {
    %c0_i32 = arith.constant 0 : i32
    %c0_i32_0 = arith.constant 0 : i32
    %c0_i32_1 = arith.constant 0 : i32
    %c0_i32_2 = arith.constant 0 : i32
    return %c0_i32, %c0_i32_0, %c0_i32_1 : i32, i32, i32
  }
  func.func @transform_2(%arg0: i32, %arg1: i32) -> (i32, i32, i32) {
    %c0_i32 = arith.constant 0 : i32
    %c0_i32_0 = arith.constant 0 : i32
    %c0_i32_1 = arith.constant 0 : i32
    %c0_i32_2 = arith.constant 0 : i32
    return %c0_i32, %c0_i32_0, %c0_i32_1 : i32, i32, i32
  }
  func.func @transform_3(%arg0: i32, %arg1: i32) -> (i32, i32, i32) {
    %c0_i32 = arith.constant 0 : i32
    %c0_i32_0 = arith.constant 0 : i32
    %c0_i32_1 = arith.constant 0 : i32
    return %arg0, %c0_i32, %c0_i32_0 : i32, i32, i32
  }
  func.func @transform_4(%arg0: i32, %arg1: i32) -> (i32, i32, i32) {
    %c0_i32 = arith.constant 0 : i32
    %c0_i32_0 = arith.constant 0 : i32
    %c0_i32_1 = arith.constant 0 : i32
    return %arg0, %c0_i32, %c0_i32_0 : i32, i32, i32
  }
}

module attributes {stable_mosaic.version = 11 : i64} {
  func.func @_in_stats_kernel(%arg0: i32, %arg1: i32, %arg2: memref<1x8x16x32xbf16, #tpu.memory_space<vmem>>, %arg3: memref<1x1x32xf32, #tpu.memory_space<vmem>>, %arg4: memref<1x1x32xf32, #tpu.memory_space<vmem>>, %arg5: memref<1x1x32xf32, #tpu.memory_space<vmem>>, %arg6: memref<1x1x32xf32, #tpu.memory_space<vmem>>, %arg7: memref<1x1x32xf32, #tpu.memory_space<vmem>>, %arg8: memref<1x1x32xf32, #tpu.memory_space<vmem>>) attributes {dimension_semantics = [#tpu.dimension_semantics<parallel>, #tpu.dimension_semantics<arbitrary>], iteration_bounds = array<i64: 2, 2>, scalar_prefetch = 0 : i64, scratch_operands = 2 : i64, tpu.core_type = #tpu.core_type<tc>, window_params = [{transform_indices = @transform_0, window_bounds = array<i64: 1, 8, 16, 32>}, {pipeline_mode = #tpu.pipeline_mode<synchronous>, transform_indices = @transform_1, window_bounds = array<i64: 1, 1, 32>}, {pipeline_mode = #tpu.pipeline_mode<synchronous>, transform_indices = @transform_2, window_bounds = array<i64: 1, 1, 32>}, {transform_indices = @transform_3, window_bounds = array<i64: 1, 1, 32>}, {transform_indices = @transform_4, window_bounds = array<i64: 1, 1, 32>}]} {
    %c0_i32 = arith.constant 0 : i32
    %0 = arith.cmpi eq, %arg1, %c0_i32 : i32
    %1 = arith.extui %0 : i1 to i32
    %c0_i32_0 = arith.constant 0 : i32
    %2 = arith.cmpi ne, %1, %c0_i32_0 : i32
    scf.if %2 {
      %cst_20 = arith.constant 0.000000e+00 : f32
      %24 = vector.broadcast %cst_20 : f32 to vector<1x1x32xf32>
      %c0_21 = arith.constant 0 : index
      %c0_22 = arith.constant 0 : index
      %c0_23 = arith.constant 0 : index
      %25 = vector.load %arg7[%c0_21, %c0_22, %c0_23] : memref<1x1x32xf32, #tpu.memory_space<vmem>>, vector<1x1x32xf32>
      tpu.vector_store %arg7[%c0_21, %c0_22, %c0_23], %24 {strides = array<i32>} : memref<1x1x32xf32, #tpu.memory_space<vmem>>, vector<1x1x32xf32>,
      %cst_24 = arith.constant 0.000000e+00 : f32
      %26 = vector.broadcast %cst_24 : f32 to vector<1x1x32xf32>
      %c0_25 = arith.constant 0 : index
      %c0_26 = arith.constant 0 : index
      %c0_27 = arith.constant 0 : index
      %27 = vector.load %arg8[%c0_25, %c0_26, %c0_27] : memref<1x1x32xf32, #tpu.memory_space<vmem>>, vector<1x1x32xf32>
      tpu.vector_store %arg8[%c0_25, %c0_26, %c0_27], %26 {strides = array<i32>} : memref<1x1x32xf32, #tpu.memory_space<vmem>>, vector<1x1x32xf32>,
    } else {
    }
    %c0 = arith.constant 0 : index
    %c0_1 = arith.constant 0 : index
    %c0_2 = arith.constant 0 : index
    %c0_3 = arith.constant 0 : index
    %3 = vector.load %arg2[%c0, %c0_1, %c0_2, %c0_3] : memref<1x8x16x32xbf16, #tpu.memory_space<vmem>>, vector<1x8x16x32xbf16>
    %4 = vector.shape_cast %3 : vector<1x8x16x32xbf16> to vector<8x16x32xbf16>
    %5 = arith.extf %4 : vector<8x16x32xbf16> to vector<8x16x32xf32>
    %cst = arith.constant dense<0.000000e+00> : vector<16x32xf32>
    %6 = vector.multi_reduction <add>, %5, %cst [0] : vector<8x16x32xf32> to vector<16x32xf32>
    %7 = vector.shape_cast %6 : vector<16x32xf32> to vector<1x16x32xf32>
    %c0_4 = arith.constant 0 : index
    %c0_5 = arith.constant 0 : index
    %c0_6 = arith.constant 0 : index
    %8 = vector.load %arg7[%c0_4, %c0_5, %c0_6] : memref<1x1x32xf32, #tpu.memory_space<vmem>>, vector<1x1x32xf32>
    %cst_7 = arith.constant dense<0.000000e+00> : vector<1x32xf32>
    %9 = vector.multi_reduction <add>, %7, %cst_7 [1] : vector<1x16x32xf32> to vector<1x32xf32>
    %10 = vector.shape_cast %9 : vector<1x32xf32> to vector<1x1x32xf32>
    %11 = arith.addf %8, %10 : vector<1x1x32xf32>
    %c0_8 = arith.constant 0 : index
    %c0_9 = arith.constant 0 : index
    %c0_10 = arith.constant 0 : index
    %12 = vector.load %arg7[%c0_8, %c0_9, %c0_10] : memref<1x1x32xf32, #tpu.memory_space<vmem>>, vector<1x1x32xf32>
    tpu.vector_store %arg7[%c0_8, %c0_9, %c0_10], %11 {strides = array<i32>} : memref<1x1x32xf32, #tpu.memory_space<vmem>>, vector<1x1x32xf32>,
    %13 = arith.mulf %5, %5 : vector<8x16x32xf32>
    %cst_11 = arith.constant dense<0.000000e+00> : vector<16x32xf32>
    %14 = vector.multi_reduction <add>, %13, %cst_11 [0] : vector<8x16x32xf32> to vector<16x32xf32>
    %15 = vector.shape_cast %14 : vector<16x32xf32> to vector<1x16x32xf32>
    %c0_12 = arith.constant 0 : index
    %c0_13 = arith.constant 0 : index
    %c0_14 = arith.constant 0 : index
    %16 = vector.load %arg8[%c0_12, %c0_13, %c0_14] : memref<1x1x32xf32, #tpu.memory_space<vmem>>, vector<1x1x32xf32>
    %cst_15 = arith.constant dense<0.000000e+00> : vector<1x32xf32>
    %17 = vector.multi_reduction <add>, %15, %cst_15 [1] : vector<1x16x32xf32> to vector<1x32xf32>
    %18 = vector.shape_cast %17 : vector<1x32xf32> to vector<1x1x32xf32>
    %19 = arith.addf %16, %18 : vector<1x1x32xf32>
    %c0_16 = arith.constant 0 : index
    %c0_17 = arith.constant 0 : index
    %c0_18 = arith.constant 0 : index
    %20 = vector.load %arg8[%c0_16, %c0_17, %c0_18] : memref<1x1x32xf32, #tpu.memory_space<vmem>>, vector<1x1x32xf32>
    tpu.vector_store %arg8[%c0_16, %c0_17, %c0_18], %19 {strides = array<i32>} : memref<1x1x32xf32, #tpu.memory_space<vmem>>, vector<1x1x32xf32>,
    %c1_i32 = arith.constant 1 : i32
    %21 = arith.cmpi eq, %arg1, %c1_i32 : i32
    %22 = arith.extui %21 : i1 to i32
    %c0_i32_19 = arith.constant 0 : i32
    %23 = arith.cmpi ne, %22, %c0_i32_19 : i32
    scf.if %23 {
      %c0_20 = arith.constant 0 : index
      %c0_21 = arith.constant 0 : index
      %c0_22 = arith.constant 0 : index
      %24 = vector.load %arg7[%c0_20, %c0_21, %c0_22] : memref<1x1x32xf32, #tpu.memory_space<vmem>>, vector<1x1x32xf32>
      %cst_23 = arith.constant 3.906250e-03 : f32
      %25 = vector.broadcast %cst_23 : f32 to vector<1x1x32xf32>
      %26 = arith.mulf %24, %25 : vector<1x1x32xf32>
      %c0_24 = arith.constant 0 : index
      %c0_25 = arith.constant 0 : index
      %c0_26 = arith.constant 0 : index
      %27 = vector.load %arg8[%c0_24, %c0_25, %c0_26] : memref<1x1x32xf32, #tpu.memory_space<vmem>>, vector<1x1x32xf32>
      %cst_27 = arith.constant 3.906250e-03 : f32
      %28 = vector.broadcast %cst_27 : f32 to vector<1x1x32xf32>
      %29 = arith.mulf %27, %28 : vector<1x1x32xf32>
      %30 = arith.mulf %26, %26 : vector<1x1x32xf32>
      %31 = arith.subf %29, %30 : vector<1x1x32xf32>
      %cst_28 = arith.constant 0.000000e+00 : f32
      %32 = vector.broadcast %cst_28 : f32 to vector<1x1x32xf32>
      %33 = arith.maximumf %31, %32 : vector<1x1x32xf32>
      %cst_29 = arith.constant 9.99999974E-6 : f32
      %34 = vector.broadcast %cst_29 : f32 to vector<1x1x32xf32>
      %35 = arith.addf %33, %34 : vector<1x1x32xf32>
      %36 = math.rsqrt %35 : vector<1x1x32xf32>
      %c0_30 = arith.constant 0 : index
      %c0_31 = arith.constant 0 : index
      %c0_32 = arith.constant 0 : index
      %37 = vector.load %arg3[%c0_30, %c0_31, %c0_32] : memref<1x1x32xf32, #tpu.memory_space<vmem>>, vector<1x1x32xf32>
      %38 = arith.mulf %37, %36 : vector<1x1x32xf32>
      %c0_33 = arith.constant 0 : index
      %c0_34 = arith.constant 0 : index
      %c0_35 = arith.constant 0 : index
      %39 = vector.load %arg5[%c0_33, %c0_34, %c0_35] : memref<1x1x32xf32, #tpu.memory_space<vmem>>, vector<1x1x32xf32>
      tpu.vector_store %arg5[%c0_33, %c0_34, %c0_35], %38 {strides = array<i32>} : memref<1x1x32xf32, #tpu.memory_space<vmem>>, vector<1x1x32xf32>,
      %c0_36 = arith.constant 0 : index
      %c0_37 = arith.constant 0 : index
      %c0_38 = arith.constant 0 : index
      %40 = vector.load %arg4[%c0_36, %c0_37, %c0_38] : memref<1x1x32xf32, #tpu.memory_space<vmem>>, vector<1x1x32xf32>
      %41 = arith.mulf %26, %37 : vector<1x1x32xf32>
      %42 = arith.mulf %41, %36 : vector<1x1x32xf32>
      %43 = arith.subf %40, %42 : vector<1x1x32xf32>
      %c0_39 = arith.constant 0 : index
      %c0_40 = arith.constant 0 : index
      %c0_41 = arith.constant 0 : index
      %44 = vector.load %arg6[%c0_39, %c0_40, %c0_41] : memref<1x1x32xf32, #tpu.memory_space<vmem>>, vector<1x1x32xf32>
      tpu.vector_store %arg6[%c0_39, %c0_40, %c0_41], %43 {strides = array<i32>} : memref<1x1x32xf32, #tpu.memory_space<vmem>>, vector<1x1x32xf32>,
    } else {
    }
    return
  }
  func.func @transform_0(%arg0: i32, %arg1: i32) -> (i32, i32, i32, i32) {
    %c0_i32 = arith.constant 0 : i32
    %c0_i32_0 = arith.constant 0 : i32
    %c0_i32_1 = arith.constant 0 : i32
    return %arg0, %arg1, %c0_i32, %c0_i32_0 : i32, i32, i32, i32
  }
  func.func @transform_1(%arg0: i32, %arg1: i32) -> (i32, i32, i32) {
    %c0_i32 = arith.constant 0 : i32
    %c0_i32_0 = arith.constant 0 : i32
    %c0_i32_1 = arith.constant 0 : i32
    %c0_i32_2 = arith.constant 0 : i32
    return %c0_i32, %c0_i32_0, %c0_i32_1 : i32, i32, i32
  }
  func.func @transform_2(%arg0: i32, %arg1: i32) -> (i32, i32, i32) {
    %c0_i32 = arith.constant 0 : i32
    %c0_i32_0 = arith.constant 0 : i32
    %c0_i32_1 = arith.constant 0 : i32
    %c0_i32_2 = arith.constant 0 : i32
    return %c0_i32, %c0_i32_0, %c0_i32_1 : i32, i32, i32
  }
  func.func @transform_3(%arg0: i32, %arg1: i32) -> (i32, i32, i32) {
    %c0_i32 = arith.constant 0 : i32
    %c0_i32_0 = arith.constant 0 : i32
    %c0_i32_1 = arith.constant 0 : i32
    return %arg0, %c0_i32, %c0_i32_0 : i32, i32, i32
  }
  func.func @transform_4(%arg0: i32, %arg1: i32) -> (i32, i32, i32) {
    %c0_i32 = arith.constant 0 : i32
    %c0_i32_0 = arith.constant 0 : i32
    %c0_i32_1 = arith.constant 0 : i32
    return %arg0, %c0_i32, %c0_i32_0 : i32, i32, i32
  }
}

module attributes {stable_mosaic.version = 11 : i64} {
  func.func @_norm_relu_conv_kernel(%arg0: i32, %arg1: i32, %arg2: memref<1x18x18x32xbf16, #tpu.memory_space<vmem>>, %arg3: memref<1x1x32xf32, #tpu.memory_space<vmem>>, %arg4: memref<1x1x32xf32, #tpu.memory_space<vmem>>, %arg5: memref<9x32x32xbf16, #tpu.memory_space<vmem>>, %arg6: memref<1x1x32xf32, #tpu.memory_space<vmem>>, %arg7: memref<1x8x16x32xf32, #tpu.memory_space<vmem>>, %arg8: memref<1x8x16x32xf32, #tpu.memory_space<vmem>>) attributes {dimension_semantics = [#tpu.dimension_semantics<parallel>, #tpu.dimension_semantics<parallel>], iteration_bounds = array<i64: 2, 2>, scalar_prefetch = 0 : i64, scratch_operands = 0 : i64, tpu.core_type = #tpu.core_type<tc>, window_params = [{transform_indices = @transform_0, window_bounds = array<i64: 1, 18, 18, 32>}, {transform_indices = @transform_1, window_bounds = array<i64: 1, 1, 32>}, {transform_indices = @transform_2, window_bounds = array<i64: 1, 1, 32>}, {pipeline_mode = #tpu.pipeline_mode<synchronous>, transform_indices = @transform_3, window_bounds = array<i64: 9, 32, 32>}, {pipeline_mode = #tpu.pipeline_mode<synchronous>, transform_indices = @transform_4, window_bounds = array<i64: 1, 1, 32>}, {transform_indices = @transform_5, window_bounds = array<i64: 1, 8, 16, 32>}, {transform_indices = @transform_6, window_bounds = array<i64: 1, 8, 16, 32>}]} {
    %c8_i32 = arith.constant 8 : i32
    %0 = arith.muli %arg1, %c8_i32 : i32
    %1 = tpu.assume_multiple %0, 8 : i32
    %c0 = arith.constant 0 : index
    %2 = arith.index_cast %1 : i32 to index
    %c0_0 = arith.constant 0 : index
    %c0_1 = arith.constant 0 : index
    %3 = vector.load %arg2[%c0, %2, %c0_0, %c0_1] : memref<1x18x18x32xbf16, #tpu.memory_space<vmem>>, vector<1x10x18x32xbf16>
    %4 = vector.shape_cast %3 : vector<1x10x18x32xbf16> to vector<10x18x32xbf16>
    %5 = arith.extf %4 : vector<10x18x32xbf16> to vector<10x18x32xf32>
    %c0_2 = arith.constant 0 : index
    %c0_3 = arith.constant 0 : index
    %c0_4 = arith.constant 0 : index
    %6 = vector.load %arg3[%c0_2, %c0_3, %c0_4] : memref<1x1x32xf32, #tpu.memory_space<vmem>>, vector<1x1x32xf32>
    %7 = vector.broadcast %6 : vector<1x1x32xf32> to vector<10x18x32xf32>
    %8 = arith.mulf %5, %7 : vector<10x18x32xf32>
    %c0_5 = arith.constant 0 : index
    %c0_6 = arith.constant 0 : index
    %c0_7 = arith.constant 0 : index
    %9 = vector.load %arg4[%c0_5, %c0_6, %c0_7] : memref<1x1x32xf32, #tpu.memory_space<vmem>>, vector<1x1x32xf32>
    %10 = vector.broadcast %9 : vector<1x1x32xf32> to vector<10x18x32xf32>
    %11 = arith.addf %8, %10 : vector<10x18x32xf32>
    %cst = arith.constant 0.000000e+00 : f32
    %12 = vector.broadcast %cst : f32 to vector<10x18x32xf32>
    %13 = arith.maximumf %11, %12 : vector<10x18x32xf32>
    %14 = tpu.iota {dimensions = array<i32: 0>} : vector<10x18x1xi32>
    %15 = vector.broadcast %1 : i32 to vector<10x18x1xi32>
    %16 = arith.addi %14, %15 : vector<10x18x1xi32>
    %17 = tpu.iota {dimensions = array<i32: 1>} : vector<10x18x1xi32>
    %c1_i32 = arith.constant 1 : i32
    %18 = vector.broadcast %c1_i32 : i32 to vector<10x18x1xi32>
    %19 = arith.cmpi sge, %16, %18 : vector<10x18x1xi32>
    %c17_i32 = arith.constant 17 : i32
    %20 = vector.broadcast %c17_i32 : i32 to vector<10x18x1xi32>
    %21 = arith.cmpi slt, %16, %20 : vector<10x18x1xi32>
    %22 = arith.andi %19, %21 : vector<10x18x1xi1>
    %c1_i32_8 = arith.constant 1 : i32
    %23 = vector.broadcast %c1_i32_8 : i32 to vector<10x18x1xi32>
    %24 = arith.cmpi sge, %17, %23 : vector<10x18x1xi32>
    %25 = arith.andi %22, %24 : vector<10x18x1xi1>
    %c17_i32_9 = arith.constant 17 : i32
    %26 = vector.broadcast %c17_i32_9 : i32 to vector<10x18x1xi32>
    %27 = arith.cmpi slt, %17, %26 : vector<10x18x1xi32>
    %28 = arith.andi %25, %27 : vector<10x18x1xi1>
    %cst_10 = arith.constant 0.000000e+00 : f32
    %29 = vector.shape_cast %28 : vector<10x18x1xi1> to vector<10x18x1xi1>
    %30 = vector.broadcast %29 : vector<10x18x1xi1> to vector<10x18x32xi1>
    %31 = vector.broadcast %cst_10 : f32 to vector<10x18x32xf32>
    %32 = arith.select %30, %13, %31 : vector<10x18x32xi1>, vector<10x18x32xf32>
    %33 = arith.truncf %32 : vector<10x18x32xf32> to vector<10x18x32xbf16>
    %c0_11 = arith.constant 0 : index
    %c0_12 = arith.constant 0 : index
    %c0_13 = arith.constant 0 : index
    %34 = vector.load %arg6[%c0_11, %c0_12, %c0_13] : memref<1x1x32xf32, #tpu.memory_space<vmem>>, vector<1x1x32xf32>
    %35 = vector.shape_cast %34 : vector<1x1x32xf32> to vector<1x32xf32>
    %36 = vector.shape_cast %35 : vector<1x32xf32> to vector<1x32xf32>
    %37 = vector.broadcast %36 : vector<1x32xf32> to vector<128x32xf32>
    %38 = vector.extract_strided_slice %33 {offsets = [0, 0, 0], sizes = [8, 16, 32], strides = [1, 1, 1]} : vector<10x18x32xbf16> to vector<8x16x32xbf16>
    %39 = vector.shape_cast %38 : vector<8x16x32xbf16> to vector<128x32xbf16>
    %c0_14 = arith.constant 0 : index
    %c0_15 = arith.constant 0 : index
    %c0_16 = arith.constant 0 : index
    %40 = vector.load %arg5[%c0_14, %c0_15, %c0_16] : memref<9x32x32xbf16, #tpu.memory_space<vmem>>, vector<1x32x32xbf16>
    %41 = vector.shape_cast %40 : vector<1x32x32xbf16> to vector<32x32xbf16>
    %cst_17 = arith.constant dense<0.000000e+00> : vector<128x32xf32>
    %42 = tpu.matmul %39, %41, %cst_17 {dimension_numbers = #tpu.dot_dimension_numbers<[1], [0], [0], [1], [0, 0, 1, 1], [], []>} : vector<128x32xbf16>, vector<32x32xbf16>, vector<128x32xf32> -> vector<128x32xf32>
    %43 = arith.addf %37, %42 : vector<128x32xf32>
    %44 = vector.extract_strided_slice %33 {offsets = [0, 1, 0], sizes = [8, 16, 32], strides = [1, 1, 1]} : vector<10x18x32xbf16> to vector<8x16x32xbf16>
    %45 = vector.shape_cast %44 : vector<8x16x32xbf16> to vector<128x32xbf16>
    %c1 = arith.constant 1 : index
    %c0_18 = arith.constant 0 : index
    %c0_19 = arith.constant 0 : index
    %46 = vector.load %arg5[%c1, %c0_18, %c0_19] : memref<9x32x32xbf16, #tpu.memory_space<vmem>>, vector<1x32x32xbf16>
    %47 = vector.shape_cast %46 : vector<1x32x32xbf16> to vector<32x32xbf16>
    %cst_20 = arith.constant dense<0.000000e+00> : vector<128x32xf32>
    %48 = tpu.matmul %45, %47, %cst_20 {dimension_numbers = #tpu.dot_dimension_numbers<[1], [0], [0], [1], [0, 0, 1, 1], [], []>} : vector<128x32xbf16>, vector<32x32xbf16>, vector<128x32xf32> -> vector<128x32xf32>
    %49 = arith.addf %43, %48 : vector<128x32xf32>
    %50 = vector.extract_strided_slice %33 {offsets = [0, 2, 0], sizes = [8, 16, 32], strides = [1, 1, 1]} : vector<10x18x32xbf16> to vector<8x16x32xbf16>
    %51 = vector.shape_cast %50 : vector<8x16x32xbf16> to vector<128x32xbf16>
    %c2 = arith.constant 2 : index
    %c0_21 = arith.constant 0 : index
    %c0_22 = arith.constant 0 : index
    %52 = vector.load %arg5[%c2, %c0_21, %c0_22] : memref<9x32x32xbf16, #tpu.memory_space<vmem>>, vector<1x32x32xbf16>
    %53 = vector.shape_cast %52 : vector<1x32x32xbf16> to vector<32x32xbf16>
    %cst_23 = arith.constant dense<0.000000e+00> : vector<128x32xf32>
    %54 = tpu.matmul %51, %53, %cst_23 {dimension_numbers = #tpu.dot_dimension_numbers<[1], [0], [0], [1], [0, 0, 1, 1], [], []>} : vector<128x32xbf16>, vector<32x32xbf16>, vector<128x32xf32> -> vector<128x32xf32>
    %55 = arith.addf %49, %54 : vector<128x32xf32>
    %56 = vector.extract_strided_slice %33 {offsets = [1, 0, 0], sizes = [8, 16, 32], strides = [1, 1, 1]} : vector<10x18x32xbf16> to vector<8x16x32xbf16>
    %57 = vector.shape_cast %56 : vector<8x16x32xbf16> to vector<128x32xbf16>
    %c3 = arith.constant 3 : index
    %c0_24 = arith.constant 0 : index
    %c0_25 = arith.constant 0 : index
    %58 = vector.load %arg5[%c3, %c0_24, %c0_25] : memref<9x32x32xbf16, #tpu.memory_space<vmem>>, vector<1x32x32xbf16>
    %59 = vector.shape_cast %58 : vector<1x32x32xbf16> to vector<32x32xbf16>
    %cst_26 = arith.constant dense<0.000000e+00> : vector<128x32xf32>
    %60 = tpu.matmul %57, %59, %cst_26 {dimension_numbers = #tpu.dot_dimension_numbers<[1], [0], [0], [1], [0, 0, 1, 1], [], []>} : vector<128x32xbf16>, vector<32x32xbf16>, vector<128x32xf32> -> vector<128x32xf32>
    %61 = arith.addf %55, %60 : vector<128x32xf32>
    %62 = vector.extract_strided_slice %33 {offsets = [1, 1, 0], sizes = [8, 16, 32], strides = [1, 1, 1]} : vector<10x18x32xbf16> to vector<8x16x32xbf16>
    %63 = vector.shape_cast %62 : vector<8x16x32xbf16> to vector<128x32xbf16>
    %c4 = arith.constant 4 : index
    %c0_27 = arith.constant 0 : index
    %c0_28 = arith.constant 0 : index
    %64 = vector.load %arg5[%c4, %c0_27, %c0_28] : memref<9x32x32xbf16, #tpu.memory_space<vmem>>, vector<1x32x32xbf16>
    %65 = vector.shape_cast %64 : vector<1x32x32xbf16> to vector<32x32xbf16>
    %cst_29 = arith.constant dense<0.000000e+00> : vector<128x32xf32>
    %66 = tpu.matmul %63, %65, %cst_29 {dimension_numbers = #tpu.dot_dimension_numbers<[1], [0], [0], [1], [0, 0, 1, 1], [], []>} : vector<128x32xbf16>, vector<32x32xbf16>, vector<128x32xf32> -> vector<128x32xf32>
    %67 = arith.addf %61, %66 : vector<128x32xf32>
    %68 = vector.extract_strided_slice %33 {offsets = [1, 2, 0], sizes = [8, 16, 32], strides = [1, 1, 1]} : vector<10x18x32xbf16> to vector<8x16x32xbf16>
    %69 = vector.shape_cast %68 : vector<8x16x32xbf16> to vector<128x32xbf16>
    %c5 = arith.constant 5 : index
    %c0_30 = arith.constant 0 : index
    %c0_31 = arith.constant 0 : index
    %70 = vector.load %arg5[%c5, %c0_30, %c0_31] : memref<9x32x32xbf16, #tpu.memory_space<vmem>>, vector<1x32x32xbf16>
    %71 = vector.shape_cast %70 : vector<1x32x32xbf16> to vector<32x32xbf16>
    %cst_32 = arith.constant dense<0.000000e+00> : vector<128x32xf32>
    %72 = tpu.matmul %69, %71, %cst_32 {dimension_numbers = #tpu.dot_dimension_numbers<[1], [0], [0], [1], [0, 0, 1, 1], [], []>} : vector<128x32xbf16>, vector<32x32xbf16>, vector<128x32xf32> -> vector<128x32xf32>
    %73 = arith.addf %67, %72 : vector<128x32xf32>
    %74 = vector.extract_strided_slice %33 {offsets = [2, 0, 0], sizes = [8, 16, 32], strides = [1, 1, 1]} : vector<10x18x32xbf16> to vector<8x16x32xbf16>
    %75 = vector.shape_cast %74 : vector<8x16x32xbf16> to vector<128x32xbf16>
    %c6 = arith.constant 6 : index
    %c0_33 = arith.constant 0 : index
    %c0_34 = arith.constant 0 : index
    %76 = vector.load %arg5[%c6, %c0_33, %c0_34] : memref<9x32x32xbf16, #tpu.memory_space<vmem>>, vector<1x32x32xbf16>
    %77 = vector.shape_cast %76 : vector<1x32x32xbf16> to vector<32x32xbf16>
    %cst_35 = arith.constant dense<0.000000e+00> : vector<128x32xf32>
    %78 = tpu.matmul %75, %77, %cst_35 {dimension_numbers = #tpu.dot_dimension_numbers<[1], [0], [0], [1], [0, 0, 1, 1], [], []>} : vector<128x32xbf16>, vector<32x32xbf16>, vector<128x32xf32> -> vector<128x32xf32>
    %79 = arith.addf %73, %78 : vector<128x32xf32>
    %80 = vector.extract_strided_slice %33 {offsets = [2, 1, 0], sizes = [8, 16, 32], strides = [1, 1, 1]} : vector<10x18x32xbf16> to vector<8x16x32xbf16>
    %81 = vector.shape_cast %80 : vector<8x16x32xbf16> to vector<128x32xbf16>
    %c7 = arith.constant 7 : index
    %c0_36 = arith.constant 0 : index
    %c0_37 = arith.constant 0 : index
    %82 = vector.load %arg5[%c7, %c0_36, %c0_37] : memref<9x32x32xbf16, #tpu.memory_space<vmem>>, vector<1x32x32xbf16>
    %83 = vector.shape_cast %82 : vector<1x32x32xbf16> to vector<32x32xbf16>
    %cst_38 = arith.constant dense<0.000000e+00> : vector<128x32xf32>
    %84 = tpu.matmul %81, %83, %cst_38 {dimension_numbers = #tpu.dot_dimension_numbers<[1], [0], [0], [1], [0, 0, 1, 1], [], []>} : vector<128x32xbf16>, vector<32x32xbf16>, vector<128x32xf32> -> vector<128x32xf32>
    %85 = arith.addf %79, %84 : vector<128x32xf32>
    %86 = vector.extract_strided_slice %33 {offsets = [2, 2, 0], sizes = [8, 16, 32], strides = [1, 1, 1]} : vector<10x18x32xbf16> to vector<8x16x32xbf16>
    %87 = vector.shape_cast %86 : vector<8x16x32xbf16> to vector<128x32xbf16>
    %c8 = arith.constant 8 : index
    %c0_39 = arith.constant 0 : index
    %c0_40 = arith.constant 0 : index
    %88 = vector.load %arg5[%c8, %c0_39, %c0_40] : memref<9x32x32xbf16, #tpu.memory_space<vmem>>, vector<1x32x32xbf16>
    %89 = vector.shape_cast %88 : vector<1x32x32xbf16> to vector<32x32xbf16>
    %cst_41 = arith.constant dense<0.000000e+00> : vector<128x32xf32>
    %90 = tpu.matmul %87, %89, %cst_41 {dimension_numbers = #tpu.dot_dimension_numbers<[1], [0], [0], [1], [0, 0, 1, 1], [], []>} : vector<128x32xbf16>, vector<32x32xbf16>, vector<128x32xf32> -> vector<128x32xf32>
    %91 = arith.addf %85, %90 : vector<128x32xf32>
    %c0_42 = arith.constant 0 : index
    %c0_43 = arith.constant 0 : index
    %c0_44 = arith.constant 0 : index
    %c0_45 = arith.constant 0 : index
    %92 = vector.load %arg7[%c0_42, %c0_43, %c0_44, %c0_45] : memref<1x8x16x32xf32, #tpu.memory_space<vmem>>, vector<1x8x16x32xf32>
    %93 = vector.shape_cast %92 : vector<1x8x16x32xf32> to vector<8x16x32xf32>
    %94 = vector.shape_cast %93 : vector<8x16x32xf32> to vector<128x32xf32>
    %95 = arith.addf %91, %94 : vector<128x32xf32>
    %96 = vector.shape_cast %95 : vector<128x32xf32> to vector<8x16x32xf32>
    %c0_46 = arith.constant 0 : index
    %c0_47 = arith.constant 0 : index
    %c0_48 = arith.constant 0 : index
    %c0_49 = arith.constant 0 : index
    %97 = vector.load %arg8[%c0_46, %c0_47, %c0_48, %c0_49] : memref<1x8x16x32xf32, #tpu.memory_space<vmem>>, vector<1x8x16x32xf32>
    %98 = vector.shape_cast %97 : vector<1x8x16x32xf32> to vector<8x16x32xf32>
    %99 = vector.shape_cast %96 : vector<8x16x32xf32> to vector<1x8x16x32xf32>
    tpu.vector_store %arg8[%c0_46, %c0_47, %c0_48, %c0_49], %99 {strides = array<i32>} : memref<1x8x16x32xf32, #tpu.memory_space<vmem>>, vector<1x8x16x32xf32>,
    return
  }
  func.func @transform_0(%arg0: i32, %arg1: i32) -> (i32, i32, i32, i32) {
    %c0_i32 = arith.constant 0 : i32
    %c0_i32_0 = arith.constant 0 : i32
    %c0_i32_1 = arith.constant 0 : i32
    %c0_i32_2 = arith.constant 0 : i32
    return %arg0, %c0_i32, %c0_i32_0, %c0_i32_1 : i32, i32, i32, i32
  }
  func.func @transform_1(%arg0: i32, %arg1: i32) -> (i32, i32, i32) {
    %c0_i32 = arith.constant 0 : i32
    %c0_i32_0 = arith.constant 0 : i32
    %c0_i32_1 = arith.constant 0 : i32
    return %arg0, %c0_i32, %c0_i32_0 : i32, i32, i32
  }
  func.func @transform_2(%arg0: i32, %arg1: i32) -> (i32, i32, i32) {
    %c0_i32 = arith.constant 0 : i32
    %c0_i32_0 = arith.constant 0 : i32
    %c0_i32_1 = arith.constant 0 : i32
    return %arg0, %c0_i32, %c0_i32_0 : i32, i32, i32
  }
  func.func @transform_3(%arg0: i32, %arg1: i32) -> (i32, i32, i32) {
    %c0_i32 = arith.constant 0 : i32
    %c0_i32_0 = arith.constant 0 : i32
    %c0_i32_1 = arith.constant 0 : i32
    %c0_i32_2 = arith.constant 0 : i32
    return %c0_i32, %c0_i32_0, %c0_i32_1 : i32, i32, i32
  }
  func.func @transform_4(%arg0: i32, %arg1: i32) -> (i32, i32, i32) {
    %c0_i32 = arith.constant 0 : i32
    %c0_i32_0 = arith.constant 0 : i32
    %c0_i32_1 = arith.constant 0 : i32
    %c0_i32_2 = arith.constant 0 : i32
    return %c0_i32, %c0_i32_0, %c0_i32_1 : i32, i32, i32
  }
  func.func @transform_5(%arg0: i32, %arg1: i32) -> (i32, i32, i32, i32) {
    %c0_i32 = arith.constant 0 : i32
    %c0_i32_0 = arith.constant 0 : i32
    %c0_i32_1 = arith.constant 0 : i32
    return %arg0, %arg1, %c0_i32, %c0_i32_0 : i32, i32, i32, i32
  }
  func.func @transform_6(%arg0: i32, %arg1: i32) -> (i32, i32, i32, i32) {
    %c0_i32 = arith.constant 0 : i32
    %c0_i32_0 = arith.constant 0 : i32
    %c0_i32_1 = arith.constant 0 : i32
    return %arg0, %arg1, %c0_i32, %c0_i32_0 : i32, i32, i32, i32
  }
}

</mosaic_0001>

<bundles_post_ra>
// kernel: res_block_2d_forward.4
= control target key start
LH: loop header
LB: loop body
LE: loop exit
PB: predicated region body
PF: predicated region fallthrough
CT: control target
= control target key end

     0   :  { %10 = vsyncpa [#allocation5], 0  ;;  %s910_s0 = inlined_call_operand.hbm [shape: f32[2,16,16,32], index: 0, kind: input, shape index: {}]   ;;  %s911_s1 = inlined_call_operand.vmem [shape: f32[1,1,32], index: 1, kind: input, shape index: {}]   ;;  %s912_s2 = inlined_call_operand.vmem [shape: f32[1,1,32], index: 2, kind: input, shape index: {}]   ;;  %s913_s3 = inlined_call_operand.vmem [shape: f32[2,1,32], index: 3, kind: output, shape index: {0}]   ;;  %s914_s4 = inlined_call_operand.vmem [shape: f32[2,1,32], index: 4, kind: output, shape index: {1}]  }
   0x1   :  { %12 = vsyncpa [#allocation5 + $0x1], 0  ;;  %s714_s15 = smov 0   ;;  %s716_s16 = smov 0  }
   0x2   :  { %s718_s17 = smov 0   ;;  %s720_s18 = smov 0  }
   0x3   :  { %s722_s19 = smov 0   ;;  %s724_s20 = smov 0  }
   0x4   :  { %s726_s21 = smov 0   ;;  %s728_s22 = smov 0  }
   0x5 LB: > { %s496_s23 = sadd.s32 4294967295, %s684_s22   ;;  %s27_s24 = sadd.s32 1, %s676_s20  ;;  %s684_s22 = sphi %s728_s22, %s18_s22   ;;  %s680_s21 = sphi %s726_s21, %s926_s21   ;;  %s676_s20 = sphi %s724_s20, %s925_s20   ;;  %s672_s19 = sphi %s722_s19, %s924_s19   ;;  %s668_s18 = sphi %s720_s18, %s923_s18   ;;  %s664_s17 = sphi %s718_s17, %s922_s17   ;;  %s660_s16 = sphi %s716_s16, %s921_s16   ;;  %s656_s15 = sphi %s714_s15, %s920_s15  }
   0x6   : > { %p28_p0 = scmp.ge.s32.totalorder %s27_s24, 2  ;;  %s30_s25 = sadd.s32 1, %s680_s21 }
   0x7   : > { %s39_s26 = sadd.s32 1, %s664_s17  ;;  %p46_p1 = scmp.ne.s32.totalorder %s664_s17, %s660_s16 }
   0x8   : > { %s928_s24 = smov (%p28_p0, %s27_s24), 0  ;;  %s930_s25 = smov (!%p28_p0, %s30_s25), %s680_s21 }
   0x9   : > { %s35_s27 = ssub.s32 %s676_s20, %s928_s24  ;;  %p47_p2 = scmp.eq.s32.totalorder %s684_s22, 0 }
   0xa   : > { %p32_p3 = scmp.ge.s32.totalorder %s930_s25, 2  ;;  %p52_p4 = scmp.ne.s32.totalorder %s660_s16, %s656_s15 }
   0xb   : > { %p765_p5 = por %p47_p2, %p46_p1  ;;  %p53_p6 = scmp.eq.s32.totalorder %s496_s23, 0 }
   0xc   : > { %s932_s25 = smov (%p32_p3, %s930_s25), 0  ;;  %p518_p8 = scmp.lt.s32.totalorder %s684_s22, 4 }
   0xd   : > { %917 = sst [smem:[#allocation7_spill]] %s932_s25  ;;  %p771_p7 = por %p53_p6, %p52_p4 }
   0xe   : > { %s34_s30 = ssub.s32 %s680_s21, %s932_s25  ;;  %s176_s6 = sand.u32 1, %s664_s17  }
   0xf   : > { %s36_s5 = sor.u32 %s35_s27, %s34_s30  ;;  %s500_s7 = sshll.u32 %s176_s6, 7 }
  0x10   : > { %p37_p9 = scmp.eq.s32.totalorder %s36_s5, 0  ;;  %s511_s8 = sshll.u32 %s676_s20, 4 }
  0x11   : > { %s503_s10 = sshll.u32 %s680_s21, 5  ;;  %s180_s12 = scalar_lea.vmem [#allocation4], %s500_s7 }
  0x12   : > { %s781_s9 = scalar_select %p37_p9, %s664_s17, %s39_s26  }
  0x13   : > { %s186_s11 = sadd.s32 %s511_s8, %s503_s10  ;;  %s191_s13 = sshll.u32 %s180_s12, 4  ;;  %s192_s13 = int_to_ptr.vmem [resolvable:$true] %s191_s13 }
  0x14   : > { %s504_s14 = sshll.u32 %s186_s11, 3  ;;  %p515_p10 = pnand %p518_p8, %p765_p5 }
  0x15   : > { %s188_s25 = scalar_lea.hbm %s910_s0, %s504_s14  ;;  %p505_p11 = scmp.ge.s32.totalorder %s684_s22, 1 }
  0x16   : > { %s189_s27 = sshll.u32 %s188_s25, 4  ;;  %s177_s30 = scalar_lea.sflag [#allocation5], %s176_s6  ;;  %s190_s27 = int_to_ptr.hbm [resolvable:$true] %s189_s27 }
  0x17   : > { %s686_s26 = smov 128   ;;  %s687_s5 = smov 8  }
  0x18   : > { %517 = dma.hbm_to_vmem [thread:$0]  (!%p515_p10), %s190_s27, 2048, %s192_s13, %s177_s30, %s686_s26, %s686_s26, %s687_s5  }
  0x19   : > { %p199_p12 = scmp.lt.s32.totalorder %s684_s22, 5 }
  0x1b   : > { %p200_p13 = pnand %p505_p11, %p199_p12 }
  0x1c   : > { %s205_s7 = sand.u32 (!%p200_p13), 1, %s660_s16  }
  0x1d   : > { %203 = sbr.rel (%p200_p13) target bundleno = 128 (0x80), region = 32  ;;  %s506_s8 = sshll.u32 (!%p200_p13), %s205_s7, 7 }
  0x1e   : > { %s206_s10 = scalar_lea.sflag (!%p200_p13), [#allocation5], %s205_s7  ;;  %s794_s11 = scalar_lea.vmem (!%p200_p13), [#allocation4], %s506_s8 }
  0x22   : > { %651 = dma.done.wait (%p771_p7), %s206_s10, 2048  }
  0x23   : > { %653 = vsyncadd (%p771_p7), %s206_s10, 4294965248  ;;  %p237_p0 = scmp.lt.s32.totalorder %s672_s19, 1  ;;  %p507_p1 = scmp.ne.s32.totalorder %s668_s18, 0 }
  0x25   : > { %s934_s19 = smov (!%p237_p0, %s672_s19), 1  ;;  %246 = sbr.rel (%p507_p1) target bundleno = 45 (0x2d), region = 40 }
  0x26   : > { %s239_s6 = scalar_lea.vmem %s913_s3, %s934_s19  ;;  %s242_s14 = scalar_lea.vmem %s914_s4, %s934_s19 }
  0x2a   : > { %vm247_vm0 = vcmask 253952   ;;  %v688_v0 = vmov 0.0  }
  0x2b   : > { %248 = vst.msk [vmem:[#allocation2] sm:$0x1] %vm247_vm0, %v688_v0 }
  0x2c   : > { %249 = vst.msk [vmem:[#allocation3] sm:$0x1] %vm247_vm0, %v688_v0 }
  0x2d PF: > { %v250_v1 = vld [vmem:[%s794_s11] sm:$0xff]  ;;  %v251_v2 = vld [vmem:[%s794_s11 + $0x8] sm:$0xff]  ;;  %v252_v3 = vld [vmem:[%s794_s11 + $0x10] sm:$0xff]  ;;  %vm266_vm1 = vcmask 261120   ;;  %vm308_vm2 = vcmask 253952   ;;  %p508_p2 = scmp.ne.s32.totalorder %s668_s18, 1 }
  0x2e   : > { %v253_v4 = vld [vmem:[%s794_s11 + $0x18] sm:$0xff]  ;;  %v254_v5 = vld [vmem:[%s794_s11 + $0x20] sm:$0xff]  ;;  %v255_v6 = vld [vmem:[%s794_s11 + $0x28] sm:$0xff]  ;;  %v267_v7 = vsel %vm266_vm1, %v250_v1, 0.0  ;;  %v268_v8 = vsel %vm266_vm1, %v252_v3, 0.0  ;;  %v282_v9 = vsel %vm266_vm1, %v251_v2, 0.0  ;;  %v310_v28 = vmul.f32 %v250_v1, %v250_v1 }
  0x2f   : > { %v256_v10 = vld [vmem:[%s794_s11 + $0x30] sm:$0xff]  ;;  %v269_v11 = vadd.f32 %v268_v8, %v267_v7  ;;  %v270_v12 = vsel %vm266_vm1, %v254_v5, 0.0  ;;  %v283_v13 = vsel %vm266_vm1, %v253_v4, 0.0  ;;  %v285_v14 = vsel %vm266_vm1, %v255_v6, 0.0  ;;  %v257_v15 = vld [vmem:[%s794_s11 + $0x38] sm:$0xff]  ;;  %v258_v18 = vld [vmem:[%s794_s11 + $0x40] sm:$0xff] }
  0x30   : > { %v272_v16 = vsel %vm266_vm1, %v256_v10, 0.0  ;;  %v284_v17 = vadd.f32 %v283_v13, %v282_v9  ;;  %v287_v20 = vsel %vm266_vm1, %v257_v15, 0.0  ;;  %v259_v21 = vld [vmem:[%s794_s11 + $0x48] sm:$0xff]  ;;  %v274_v22 = vsel %vm266_vm1, %v258_v18, 0.0  ;;  %v260_v24 = vld [vmem:[%s794_s11 + $0x50] sm:$0xff]  ;;  %v261_v25 = vld [vmem:[%s794_s11 + $0x58] sm:$0xff] }
  0x31   : > { %v271_v19 = vadd.f32 %v270_v12, %v269_v11  ;;  %v289_v27 = vsel %vm266_vm1, %v259_v21, 0.0  ;;  %v262_v29 = vld [vmem:[%s794_s11 + $0x60] sm:$0xff]  ;;  %v264_v30 = vld [vmem:[%s794_s11 + $0x70] sm:$0xff]  ;;  %v276_v31 = vsel %vm266_vm1, %v260_v24, 0.0  ;;  %v291_v33 = vsel %vm266_vm1, %v261_v25, 0.0  ;;  %v263_v35 = vld [vmem:[%s794_s11 + $0x68] sm:$0xff] }
  0x32   : > { %v286_v23 = vadd.f32 %v285_v14, %v284_v17  ;;  %v312_v34 = vmul.f32 %v252_v3, %v252_v3  ;;  %v265_v36 = vld [vmem:[%s794_s11 + $0x78] sm:$0xff]  ;;  %v278_v38 = vsel %vm266_vm1, %v262_v29, 0.0  ;;  %v280_v39 = vsel %vm266_vm1, %v264_v30, 0.0 }
  0x33   : > { %v273_v26 = vadd.f32 %v272_v16, %v271_v19  ;;  %v314_v40 = vmul.f32 %v254_v5, %v254_v5  ;;  %v293_v42 = vsel %vm266_vm1, %v263_v35, 0.0  ;;  %v295_v43 = vsel %vm266_vm1, %v265_v36, 0.0 }
  0x34   : > { %v288_v32 = vadd.f32 %v287_v20, %v286_v23  ;;  %v316_v44 = vmul.f32 %v256_v10, %v256_v10  ;;  %v311_v46 = vmul.f32 %v251_v2, %v251_v2  ;;  %v313_v47 = vmul.f32 %v253_v4, %v253_v4 }
  0x35   : > { %v275_v37 = vadd.f32 %v274_v22, %v273_v26  ;;  %v315_v48 = vmul.f32 %v255_v6, %v255_v6  ;;  %v318_v50 = vmul.f32 %v258_v18, %v258_v18  ;;  %v326_v51 = vsel %vm266_vm1, %v310_v28, 0.0 }
  0x36   : > { %v290_v41 = vadd.f32 %v289_v27, %v288_v32  ;;  %v327_v52 = vsel %vm266_vm1, %v312_v34, 0.0  ;;  %v317_v54 = vmul.f32 %v257_v15, %v257_v15  ;;  %v329_v56 = vsel %vm266_vm1, %v314_v40, 0.0 }
  0x37   : > { %v277_v45 = vadd.f32 %v276_v31, %v275_v37  ;;  %v328_v55 = vadd.f32 %v327_v52, %v326_v51  ;;  %v319_v58 = vmul.f32 %v259_v21, %v259_v21  ;;  %v320_v59 = vmul.f32 %v260_v24, %v260_v24 }
  0x38   : > { %v292_v49 = vadd.f32 %v291_v33, %v290_v41  ;;  %v331_v60 = vsel %vm266_vm1, %v316_v44, 0.0  ;;  %v322_v62 = vmul.f32 %v262_v29, %v262_v29  ;;  %v341_v0 = vsel %vm266_vm1, %v311_v46, 0.0 }
  0x39   : > { %v279_v53 = vadd.f32 %v278_v38, %v277_v45  ;;  %v330_v63 = vadd.f32 %v329_v56, %v328_v55  ;;  %v333_v2 = vsel %vm266_vm1, %v318_v50, 0.0  ;;  %v342_v3 = vsel %vm266_vm1, %v313_v47, 0.0  ;;  %v297_v38 = vld [vmem:[#allocation2] sm:$0x1] }
  0x3a   : > { %v294_v57 = vadd.f32 %v293_v42, %v292_v49  ;;  %v344_v4 = vsel %vm266_vm1, %v315_v48, 0.0  ;;  %v321_v6 = vmul.f32 %v261_v25, %v261_v25  ;;  %v343_v8 = vadd.f32 %v342_v3, %v341_v0  ;;  %v356_v48 = vld [vmem:[#allocation3] sm:$0x1] }
  0x3b   : > { %v281_v61 = vadd.f32 %v280_v39, %v279_v53  ;;  %v332_v7 = vadd.f32 %v331_v60, %v330_v63  ;;  %v324_v10 = vmul.f32 %v264_v30, %v264_v30  ;;  %v335_v11 = vsel %vm266_vm1, %v320_v59, 0.0 }
  0x3c   : > { %v296_v1 = vadd.f32 %v295_v43, %v294_v57  ;;  %v346_v12 = vsel %vm266_vm1, %v317_v54, 0.0  ;;  %v345_v15 = vadd.f32 %v344_v4, %v343_v8  ;;  %v323_v16 = vmul.f32 %v263_v35, %v263_v35 }
  0x3d   : > { %v298_v5 = vsel %vm266_vm1, %v281_v61, 0.0  ;;  %v334_v14 = vadd.f32 %v333_v2, %v332_v7  ;;  %v337_v17 = vsel %vm266_vm1, %v322_v62, 0.0  ;;  %v348_v18 = vsel %vm266_vm1, %v319_v58, 0.0 }
  0x3e   : > { %v299_v9 = vsel %vm266_vm1, %v296_v1, 0.0  ;;  %v347_v21 = vadd.f32 %v346_v12, %v345_v15  ;;  %v325_v22 = vmul.f32 %v265_v36, %v265_v36  ;;  %v339_v23 = vsel %vm266_vm1, %v324_v10, 0.0 }
  0x3f   : > { %v300_v13 = vadd.f32 %v299_v9, %v298_v5  ;;  %v336_v20 = vadd.f32 %v335_v11, %v334_v14  ;;  %v350_v24 = vsel %vm266_vm1, %v321_v6, 0.0  ;;  %v352_v28 = vsel %vm266_vm1, %v323_v16, 0.0 }
  0x40   : > { %v349_v27 = vadd.f32 %v348_v18, %v347_v21  ;;  %v354_v32 = vsel %vm266_vm1, %v325_v22, 0.0 }
  0x41   : > { %v301_v19 = vrot.slane %v300_v13, 4  ;;  %v338_v26 = vadd.f32 %v337_v17, %v336_v20 }
  0x42   : > { %v351_v31 = vadd.f32 %v350_v24, %v349_v27 }
  0x43   : > { %v302_v25 = vadd.f32 %v301_v19, %v300_v13  ;;  %v340_v30 = vadd.f32 %v339_v23, %v338_v26 }
  0x44   : > { %v353_v34 = vadd.f32 %v352_v28, %v351_v31 }
  0x45   : > { %v303_v29 = vrot.slane %v302_v25, 2  ;;  %v357_v36 = vsel %vm266_vm1, %v340_v30, 0.0 }
  0x46   : > { %v355_v37 = vadd.f32 %v354_v32, %v353_v34 }
  0x47   : > { %v304_v33 = vadd.f32 %v303_v29, %v302_v25 }
  0x48   : > { %v358_v40 = vsel %vm266_vm1, %v355_v37, 0.0 }
  0x49   : > { %v305_v35 = vrot.slane %v304_v33, 1  ;;  %v359_v41 = vadd.f32 %v358_v40, %v357_v36 }
  0x4b   : > { %v306_v39 = vadd.f32 %v305_v35, %v304_v33  ;;  %v360_v43 = vrot.slane %v359_v41, 4 }
  0x4d   : > { %v307_v42 = vadd.f32 %v306_v39, %v297_v38  ;;  %v361_v44 = vadd.f32 %v360_v43, %v359_v41 }
  0x4f   : > { %309 = vst.msk [vmem:[#allocation2] sm:$0x1] %vm308_vm2, %v307_v42  ;;  %v362_v45 = vrot.slane %v361_v44, 2 }
  0x51   : > { %v363_v46 = vadd.f32 %v362_v45, %v361_v44 }
  0x53   : > { %v364_v47 = vrot.slane %v363_v46, 1 }
  0x55   : > { %v365_v49 = vadd.f32 %v364_v47, %v363_v46  ;;  %371 = sbr.rel (%p508_p2) target bundleno = 128 (0x80), region = 44 }
  0x57   : > { %v366_v50 = vadd.f32 %v365_v49, %v356_v48 }
  0x59   : > { %367 = vst.msk [vmem:[#allocation3] sm:$0x1] %vm308_vm2, %v366_v50 }
  0x5a   : > { %v372_v51 = vld [vmem:[#allocation2] sm:$0x1] }
  0x5b   : > { %v373_v53 = vmul.f32 0.00390625, %v372_v51  ;;  %v390_v63 = vld [vmem:[%s911_s1] sm:$0x1] }
  0x5c   : > { %v393_v4 = vld [vmem:[%s912_s2] sm:$0x1] }
  0x5d   : > { %v376_v55 = vmul.f32 %v373_v53, %v373_v53  ;;  %v394_v1 = vmul.f32 %v390_v63, %v373_v53 }
  0x60   : > { %v374_v52 = vld [vmem:[#allocation3] sm:$0x1] }
  0x61   : > { %v375_v54 = vmul.f32 0.00390625, %v374_v52 }
  0x63   : > { %v377_v56 = vsub.f32 %v375_v54, %v376_v55 }
  0x65   : > { %v378_v57 = vmax.f32 %v377_v56, 0.0 }
  0x67   : > { %v379_v58 = vadd.f32 1e-05, %v378_v57 }
  0x69   : > { %586 = vrsqrt.f32 %v379_v58  ;;  %vm386_vm3 = vweird.f32 %v379_v58 }
  0x6f   : > { %v587_v59 = vpop.eup %586 }
  0x70   : > { %v381_v60 = vmul.f32 %v587_v59, %v379_v58  ;;  %vm387_vm4 = vweird.f32 %v587_v59 }
  0x71   : > { %vm388_vm5 = vmor %vm386_vm3, %vm387_vm4 }
  0x72   : > { %v382_v61 = vmul.f32 %v587_v59, %v381_v60 }
  0x74   : > { %v383_v62 = vmul.f32 0.5, %v382_v61 }
  0x76   : > { %v384_v0 = vsub.f32 1.5, %v383_v62 }
  0x78   : > { %v385_v2 = vmul.f32 %v587_v59, %v384_v0 }
  0x7a   : > { %v389_v3 = vsel %vm388_vm5, %v587_v59, %v385_v2 }
  0x7b   : > { %v391_v5 = vmul.f32 %v390_v63, %v389_v3  ;;  %v395_v6 = vmul.f32 %v394_v1, %v389_v3 }
  0x7d   : > { %392 = vst.msk [vmem:[%s239_s6] sm:$0x1] %vm308_vm2, %v391_v5  ;;  %v396_v7 = vsub.f32 %v393_v4, %v395_v6 }
  0x7f   : > { %397 = vst.msk [vmem:[%s242_s14] sm:$0x1] %vm308_vm2, %v396_v7 }
  0x80 PF: > { %s18_s22 = sadd.s32 1, %s684_s22   ;;  %s919_s7 = sld [smem:[#allocation7_spill]] }
  0x81   : > { %p15_p3 = scmp.ge.s32.totalorder %s18_s22, 6   ;;  %s920_s15 = smov %s660_s16 }
  0x82   : > { %s921_s16 = smov %s664_s17  ;;  %s922_s17 = smov %s781_s9 }
  0x83   : > { %s923_s18 = smov %s676_s20  ;;  %s924_s19 = smov %s680_s21 }
  0x84   : > { %s925_s20 = smov %s928_s24  ;;  %17 = sbr.rel (!%p15_p3) target bundleno = 5 (0x5), region = 92 }
  0x86   : > { %s926_s21 = smov %s919_s7 }
  0x89   :  { %427 = vsyncpa [#allocation5], 1 }
  0x8a   :  { %429 = vsyncpa [#allocation5 + $0x1], 1 }

// kernel: res_block_2d_forward.6
= control target key start
LH: loop header
LB: loop body
LE: loop exit
PB: predicated region body
PF: predicated region fallthrough
CT: control target
= control target key end

     0   :  { %s658_s15 = smov 0   ;;  %s660_s16 = smov 0   ;;  %s778_s0 = inlined_call_operand.vmem [shape: bf16[2,16,16,32], index: 0, kind: input, shape index: {}]   ;;  %s779_s1 = inlined_call_operand.vmem [shape: f32[1,1,32], index: 1, kind: input, shape index: {}]   ;;  %s780_s2 = inlined_call_operand.vmem [shape: f32[1,1,32], index: 2, kind: input, shape index: {}]   ;;  %s781_s3 = inlined_call_operand.vmem [shape: f32[2,1,32], index: 3, kind: output, shape index: {0}]   ;;  %s782_s4 = inlined_call_operand.vmem [shape: f32[2,1,32], index: 4, kind: output, shape index: {1}]  }
   0x1   :  { %s662_s17 = smov 0   ;;  %s664_s18 = smov 0  }
   0x2   :  { %s666_s19 = smov 0  }
   0x3 LB: > { %s24_s20 = sadd.s32 1, %s622_s17  ;;  %s27_s21 = sadd.s32 1, %s626_s18  ;;  %s630_s19 = sphi %s666_s19, %s15_s19   ;;  %s626_s18 = sphi %s664_s18, %s786_s18   ;;  %s622_s17 = sphi %s662_s17, %s785_s17   ;;  %s618_s16 = sphi %s660_s16, %s784_s16   ;;  %s614_s15 = sphi %s658_s15, %s783_s15  }
   0x4   : > { %p25_p0 = scmp.ge.s32.totalorder %s24_s20, 2  ;;  %p501_p1 = scmp.ge.s32.totalorder %s630_s19, 1 }
   0x5   : > { %p185_p2 = scmp.lt.s32.totalorder %s630_s19, 5 }
   0x6   : > { %s788_s20 = smov (%p25_p0, %s24_s20), 0  ;;  %s790_s21 = smov (!%p25_p0, %s27_s21), %s626_s18 }
   0x7   : > { %p186_p3 = pnand %p501_p1, %p185_p2  ;;  %p29_p4 = scmp.ge.s32.totalorder %s790_s21, 2 }
   0x8   : > { %s502_s22 = sshll.u32 (!%p186_p3), %s614_s15, 3  ;;  %p218_p5 = scmp.lt.s32.totalorder (!%p186_p3), %s618_s16, 1 }
   0x9   : > { %s792_s21 = smov (%p29_p4, %s790_s21), 0  ;;  %189 = sbr.rel (%p186_p3) target bundleno = 113 (0x71), region = 32 }
   0xa   : > { %p220_p6 = scmp.lt.s32.totalorder (!%p186_p3), %s502_s22, 15  ;;  %p506_p7 = scmp.ne.s32.totalorder (!%p186_p3), %s614_s15, 0 }
   0xe   : > { %s794_s16 = smov (!%p218_p5, %s618_s16), 1  ;;  %s796_s22 = smov (!%p220_p6, %s502_s22), 15 }
   0xf   : > { %s504_s23 = sshll.u32 %s794_s16, 5  ;;  %s230_s26 = scalar_lea.vmem %s781_s3, %s794_s16 }
  0x10   : > { %s503_s27 = sshll.u32 %s796_s22, 1  ;;  %s233_s30 = scalar_lea.vmem %s782_s4, %s794_s16 }
  0x11   : > { %s224_s5 = sadd.s32 %s504_s23, %s503_s27  ;;  %237 = sbr.rel (%p506_p7) target bundleno = 25 (0x19), region = 36 }
  0x12   : > { %s505_s6 = sshll.u32 %s224_s5, 2 }
  0x13   : > { %s226_s9 = scalar_lea.vmem %s778_s0, %s505_s6 }
  0x16   : > { %vm238_vm0 = vcmask 253952   ;;  %v632_v0 = vmov 0.0  }
  0x17   : > { %239 = vst.msk [vmem:[#allocation2] sm:$0x1] %vm238_vm0, %v632_v0 }
  0x18   : > { %240 = vst.msk [vmem:[#allocation3] sm:$0x1] %vm238_vm0, %v632_v0 }
  0x19 PF: > { %v511_v1 = vld [vmem:[%s226_s9] sm:$0xff]   ;;  %v542_v2 = vld [vmem:[%s226_s9 + $0x8] sm:$0xff]   ;;  %v543_v3 = vld [vmem:[%s226_s9 + $0x10] sm:$0xff]   ;;  %vm273_vm1 = vcmask 261120   ;;  %vm315_vm2 = vcmask 253952   ;;  %p507_p8 = scmp.ne.s32.totalorder %s614_s15, 1 }
  0x1a   : > { %v544_v4 = vld [vmem:[%s226_s9 + $0x18] sm:$0xff]   ;;  %v512_v5 = vunpack.c.l.bf16 %v511_v1  ;;  %v516_v6 = vunpack.c.l.bf16 %v542_v2  ;;  %v520_v7 = vunpack.c.l.bf16 %v543_v3  ;;  %v545_v8 = vld [vmem:[%s226_s9 + $0x20] sm:$0xff]   ;;  %v546_v9 = vld [vmem:[%s226_s9 + $0x28] sm:$0xff]   ;;  %v513_v10 = vunpack.c.h.bf16 %v511_v1 }
  0x1b   : > { %v517_v11 = vunpack.c.h.bf16 %v542_v2  ;;  %v521_v12 = vunpack.c.h.bf16 %v543_v3  ;;  %v524_v13 = vunpack.c.l.bf16 %v544_v4  ;;  %v525_v14 = vunpack.c.h.bf16 %v544_v4  ;;  %v547_v15 = vld [vmem:[%s226_s9 + $0x30] sm:$0xff]   ;;  %v548_v22 = vld [vmem:[%s226_s9 + $0x38] sm:$0xff]  }
  0x1c   : > { %v274_v16 = vsel %vm273_vm1, %v512_v5, 0.0  ;;  %v275_v17 = vsel %vm273_vm1, %v516_v6, 0.0  ;;  %v277_v18 = vsel %vm273_vm1, %v520_v7, 0.0  ;;  %v528_v19 = vunpack.c.l.bf16 %v545_v8 }
  0x1d   : > { %v529_v20 = vunpack.c.h.bf16 %v545_v8  ;;  %v532_v21 = vunpack.c.l.bf16 %v546_v9  ;;  %v276_v23 = vadd.f32 %v275_v17, %v274_v16  ;;  %v279_v24 = vsel %vm273_vm1, %v524_v13, 0.0 }
  0x1e   : > { %v289_v25 = vsel %vm273_vm1, %v513_v10, 0.0  ;;  %v290_v26 = vsel %vm273_vm1, %v517_v11, 0.0  ;;  %v292_v27 = vsel %vm273_vm1, %v521_v12, 0.0  ;;  %v533_v28 = vunpack.c.h.bf16 %v546_v9 }
  0x1f   : > { %v536_v29 = vunpack.c.l.bf16 %v547_v15  ;;  %v278_v30 = vadd.f32 %v277_v18, %v276_v23  ;;  %v291_v31 = vadd.f32 %v290_v26, %v289_v25  ;;  %v537_v32 = vunpack.c.h.bf16 %v547_v15 }
  0x20   : > { %v540_v33 = vunpack.c.l.bf16 %v548_v22  ;;  %v281_v34 = vsel %vm273_vm1, %v528_v19, 0.0  ;;  %v294_v35 = vsel %vm273_vm1, %v525_v14, 0.0  ;;  %v541_v36 = vunpack.c.h.bf16 %v548_v22 }
  0x21   : > { %v280_v37 = vadd.f32 %v279_v24, %v278_v30  ;;  %v283_v38 = vsel %vm273_vm1, %v532_v21, 0.0  ;;  %v293_v39 = vadd.f32 %v292_v27, %v291_v31  ;;  %v285_v40 = vsel %vm273_vm1, %v536_v29, 0.0 }
  0x22   : > { %v296_v41 = vsel %vm273_vm1, %v529_v20, 0.0  ;;  %v317_v42 = vmul.f32 %v512_v5, %v512_v5  ;;  %v319_v43 = vmul.f32 %v516_v6, %v516_v6  ;;  %v287_v45 = vsel %vm273_vm1, %v540_v33, 0.0 }
  0x23   : > { %v282_v44 = vadd.f32 %v281_v34, %v280_v37  ;;  %v295_v46 = vadd.f32 %v294_v35, %v293_v39  ;;  %v321_v47 = vmul.f32 %v520_v7, %v520_v7  ;;  %v298_v48 = vsel %vm273_vm1, %v533_v28, 0.0 }
  0x24   : > { %v300_v49 = vsel %vm273_vm1, %v537_v32, 0.0  ;;  %v302_v50 = vsel %vm273_vm1, %v541_v36, 0.0  ;;  %v323_v51 = vmul.f32 %v524_v13, %v524_v13  ;;  %v318_v54 = vmul.f32 %v513_v10, %v513_v10 }
  0x25   : > { %v284_v52 = vadd.f32 %v283_v38, %v282_v44  ;;  %v297_v53 = vadd.f32 %v296_v41, %v295_v46  ;;  %v320_v55 = vmul.f32 %v517_v11, %v517_v11  ;;  %v322_v56 = vmul.f32 %v521_v12, %v521_v12  ;;  %v304_v46 = vld [vmem:[#allocation2] sm:$0x1] }
  0x26   : > { %v325_v57 = vmul.f32 %v528_v19, %v528_v19  ;;  %v333_v58 = vsel %vm273_vm1, %v317_v42, 0.0  ;;  %v334_v59 = vsel %vm273_vm1, %v319_v43, 0.0  ;;  %v336_v63 = vsel %vm273_vm1, %v321_v47, 0.0 }
  0x27   : > { %v286_v60 = vadd.f32 %v285_v40, %v284_v52  ;;  %v299_v61 = vadd.f32 %v298_v48, %v297_v53  ;;  %v335_v62 = vadd.f32 %v334_v59, %v333_v58  ;;  %v324_v0 = vmul.f32 %v525_v14, %v525_v14 }
  0x28   : > { %v326_v1 = vmul.f32 %v529_v20, %v529_v20  ;;  %v327_v2 = vmul.f32 %v532_v21, %v532_v21  ;;  %v338_v3 = vsel %vm273_vm1, %v323_v51, 0.0  ;;  %v329_v6 = vmul.f32 %v536_v29, %v536_v29 }
  0x29   : > { %v288_v4 = vadd.f32 %v287_v45, %v286_v60  ;;  %v301_v5 = vadd.f32 %v300_v49, %v299_v61  ;;  %v337_v7 = vadd.f32 %v336_v63, %v335_v62  ;;  %v340_v8 = vsel %vm273_vm1, %v325_v57, 0.0 }
  0x2a   : > { %v348_v9 = vsel %vm273_vm1, %v318_v54, 0.0  ;;  %v349_v10 = vsel %vm273_vm1, %v320_v55, 0.0  ;;  %v351_v11 = vsel %vm273_vm1, %v322_v56, 0.0  ;;  %v328_v16 = vmul.f32 %v533_v28, %v533_v28  ;;  %v363_v56 = vld [vmem:[#allocation3] sm:$0x1] }
  0x2b   : > { %v303_v12 = vadd.f32 %v302_v50, %v301_v5  ;;  %v305_v13 = vsel %vm273_vm1, %v288_v4, 0.0  ;;  %v339_v14 = vadd.f32 %v338_v3, %v337_v7  ;;  %v350_v15 = vadd.f32 %v349_v10, %v348_v9 }
  0x2c   : > { %v331_v17 = vmul.f32 %v540_v33, %v540_v33  ;;  %v342_v18 = vsel %vm273_vm1, %v327_v2, 0.0  ;;  %v353_v19 = vsel %vm273_vm1, %v324_v0, 0.0  ;;  %v330_v24 = vmul.f32 %v537_v32, %v537_v32 }
  0x2d   : > { %v306_v20 = vsel %vm273_vm1, %v303_v12, 0.0  ;;  %v341_v21 = vadd.f32 %v340_v8, %v339_v14  ;;  %v352_v22 = vadd.f32 %v351_v11, %v350_v15  ;;  %v344_v25 = vsel %vm273_vm1, %v329_v6, 0.0 }
  0x2e   : > { %v307_v23 = vadd.f32 %v306_v20, %v305_v13  ;;  %v355_v26 = vsel %vm273_vm1, %v326_v1, 0.0  ;;  %v332_v31 = vmul.f32 %v541_v36, %v541_v36  ;;  %v346_v28 = vsel %vm273_vm1, %v331_v17, 0.0 }
  0x2f   : > { %v343_v27 = vadd.f32 %v342_v18, %v341_v21  ;;  %v354_v29 = vadd.f32 %v353_v19, %v352_v22  ;;  %v357_v33 = vsel %vm273_vm1, %v328_v16, 0.0  ;;  %v359_v38 = vsel %vm273_vm1, %v330_v24, 0.0 }
  0x30   : > { %v308_v30 = vrot.slane %v307_v23, 4  ;;  %v361_v41 = vsel %vm273_vm1, %v332_v31, 0.0 }
  0x31   : > { %v345_v34 = vadd.f32 %v344_v25, %v343_v27  ;;  %v356_v35 = vadd.f32 %v355_v26, %v354_v29 }
  0x32   : > { %v309_v37 = vadd.f32 %v308_v30, %v307_v23 }
  0x33   : > { %v347_v39 = vadd.f32 %v346_v28, %v345_v34  ;;  %v358_v40 = vadd.f32 %v357_v33, %v356_v35 }
  0x34   : > { %v310_v32 = vrot.slane %v309_v37, 2 }
  0x35   : > { %v360_v42 = vadd.f32 %v359_v38, %v358_v40  ;;  %v364_v45 = vsel %vm273_vm1, %v347_v39, 0.0 }
  0x36   : > { %v311_v43 = vadd.f32 %v310_v32, %v309_v37 }
  0x37   : > { %v362_v44 = vadd.f32 %v361_v41, %v360_v42 }
  0x38   : > { %v312_v36 = vrot.slane %v311_v43, 1 }
  0x39   : > { %v365_v47 = vsel %vm273_vm1, %v362_v44, 0.0 }
  0x3a   : > { %v313_v48 = vadd.f32 %v312_v36, %v311_v43  ;;  %v366_v49 = vadd.f32 %v365_v47, %v364_v45 }
  0x3c   : > { %v314_v50 = vadd.f32 %v313_v48, %v304_v46  ;;  %v367_v51 = vrot.slane %v366_v49, 4 }
  0x3e   : > { %316 = vst.msk [vmem:[#allocation2] sm:$0x1] %vm315_vm2, %v314_v50  ;;  %v368_v52 = vadd.f32 %v367_v51, %v366_v49 }
  0x40   : > { %v369_v53 = vrot.slane %v368_v52, 2 }
  0x42   : > { %v370_v54 = vadd.f32 %v369_v53, %v368_v52 }
  0x44   : > { %v371_v55 = vrot.slane %v370_v54, 1 }
  0x46   : > { %v372_v57 = vadd.f32 %v371_v55, %v370_v54  ;;  %378 = sbr.rel (%p507_p8) target bundleno = 113 (0x71), region = 40 }
  0x48   : > { %v373_v58 = vadd.f32 %v372_v57, %v363_v56 }
  0x4a   : > { %374 = vst.msk [vmem:[#allocation3] sm:$0x1] %vm315_vm2, %v373_v58 }
  0x4b   : > { %v379_v59 = vld [vmem:[#allocation2] sm:$0x1] }
  0x4c   : > { %v380_v61 = vmul.f32 0.00390625, %v379_v59  ;;  %v397_v7 = vld [vmem:[%s779_s1] sm:$0x1] }
  0x4d   : > { %v400_v12 = vld [vmem:[%s780_s2] sm:$0x1] }
  0x4e   : > { %v383_v63 = vmul.f32 %v380_v61, %v380_v61  ;;  %v401_v9 = vmul.f32 %v397_v7, %v380_v61 }
  0x51   : > { %v381_v60 = vld [vmem:[#allocation3] sm:$0x1] }
  0x52   : > { %v382_v62 = vmul.f32 0.00390625, %v381_v60 }
  0x54   : > { %v384_v0 = vsub.f32 %v382_v62, %v383_v63 }
  0x56   : > { %v385_v1 = vmax.f32 %v384_v0, 0.0 }
  0x58   : > { %v386_v2 = vadd.f32 1e-05, %v385_v1 }
  0x5a   : > { %590 = vrsqrt.f32 %v386_v2  ;;  %vm393_vm3 = vweird.f32 %v386_v2 }
  0x60   : > { %v591_v3 = vpop.eup %590 }
  0x61   : > { %v388_v4 = vmul.f32 %v591_v3, %v386_v2  ;;  %vm394_vm4 = vweird.f32 %v591_v3 }
  0x62   : > { %vm395_vm5 = vmor %vm393_vm3, %vm394_vm4 }
  0x63   : > { %v389_v5 = vmul.f32 %v591_v3, %v388_v4 }
  0x65   : > { %v390_v6 = vmul.f32 0.5, %v389_v5 }
  0x67   : > { %v391_v8 = vsub.f32 1.5, %v390_v6 }
  0x69   : > { %v392_v10 = vmul.f32 %v591_v3, %v391_v8 }
  0x6b   : > { %v396_v11 = vsel %vm395_vm5, %v591_v3, %v392_v10 }
  0x6c   : > { %v398_v13 = vmul.f32 %v397_v7, %v396_v11  ;;  %v402_v14 = vmul.f32 %v401_v9, %v396_v11 }
  0x6e   : > { %399 = vst.msk [vmem:[%s230_s26] sm:$0x1] %vm315_vm2, %v398_v13  ;;  %v403_v15 = vsub.f32 %v400_v12, %v402_v14 }
  0x70   : > { %404 = vst.msk [vmem:[%s233_s30] sm:$0x1] %vm315_vm2, %v403_v15 }
  0x71 PF: > { %s15_s19 = sadd.s32 1, %s630_s19   ;;  %s783_s15 = smov %s622_s17 }
  0x72   : > { %p12_p9 = scmp.ge.s32.totalorder %s15_s19, 6   ;;  %s784_s16 = smov %s626_s18 }
  0x73   : > { %s785_s17 = smov %s788_s20  ;;  %s786_s18 = smov %s792_s21 }
  0x74   :  { %14 = sbr.rel (!%p12_p9) target bundleno = 3 (0x3), region = 82 }

// kernel: res_block_2d_forward.5
= control target key start
LH: loop header
LB: loop body
LE: loop exit
PB: predicated region body
PF: predicated region fallthrough
CT: control target
= control target key end

     0   :  { %s2448_s18 = smov 0   ;;  %s2450_s19 = smov 0   ;;  %s3428_s0 = inlined_call_operand.vmem [shape: bf16[2,18,18,32], index: 0, kind: input, shape index: {}]   ;;  %s3429_s1 = inlined_call_operand.vmem [shape: f32[2,1,32], index: 1, kind: input, shape index: {}]   ;;  %s3430_s2 = inlined_call_operand.vmem [shape: f32[2,1,32], index: 2, kind: input, shape index: {}]   ;;  %s3431_s3 = inlined_call_operand.vmem [shape: bf16[9,32,32], index: 3, kind: input, shape index: {}]   ;;  %s3432_s4 = inlined_call_operand.vmem [shape: f32[1,1,32], index: 4, kind: input, shape index: {}]   ;;  %s3433_s5 = inlined_call_operand.vmem [shape: bf16[2,16,16,32], index: 5, kind: output, shape index: {}]  }
   0x1   :  { %s2452_s20 = smov 0   ;;  %s2454_s21 = smov 0  }
   0x2   :  { %s2456_s22 = smov 0  }
   0x3 LB: > { %s24_s23 = sadd.s32 1, %s2408_s20  ;;  %s27_s24 = sadd.s32 1, %s2412_s21  ;;  %s2416_s22 = sphi %s2456_s22, %s15_s22   ;;  %s2412_s21 = sphi %s2454_s21, %s3476_s21   ;;  %s2408_s20 = sphi %s2452_s20, %s3475_s20   ;;  %s2404_s19 = sphi %s2450_s19, %s3474_s19   ;;  %s2400_s18 = sphi %s2448_s18, %s3473_s18  }
   0x4   : > { %p25_p0 = scmp.ge.s32.totalorder %s24_s23, 2  ;;  %p2086_p1 = scmp.ge.s32.totalorder %s2416_s22, 1 }
   0x5   : > { %p217_p2 = scmp.lt.s32.totalorder %s2416_s22, 5 }
   0x6   : > { %s3478_s23 = smov (%p25_p0, %s24_s23), 0  ;;  %s3480_s24 = smov (!%p25_p0, %s27_s24), %s2412_s21 }
   0x7   : > { %p218_p3 = pnand %p2086_p1, %p217_p2  ;;  %p29_p4 = scmp.ge.s32.totalorder %s3480_s24, 2 }
   0x8   : > { %p256_p5 = scmp.lt.s32.totalorder (!%p218_p3), %s2404_s19, 1  ;;  %s2484_s27 = sshll.u32 (!%p218_p3), %s2400_s18, 3 }
   0x9   : > { %s3482_s24 = smov (%p29_p4, %s3480_s24), 0  ;;  %221 = sbr.rel (%p218_p3) target bundleno = 457 (0x1c9), region = 40 }
   0xa   : > { %s2283_s30 = smul.u32 (!%p218_p3), 96, %s2400_s18  ;;  %p270_p6 = scmp.lt.s32.totalorder (!%p218_p3), %s2484_s27, 15 }
   0xe   : > { %v2285_v0 = vld [vmem:[%s3431_s3 + $0x8] sm:$0xff]  ;;  %v451_v1 = vlaneseq  ;;  %v2487_v2 = vstv %s2484_s27  ;;  %v2284_v3 = vld [vmem:[%s3431_s3] sm:$0xff]  ;;  %s3484_s19 = smov (!%p256_p5, %s2404_s19), 1  ;;  %v2291_v9 = vld [vmem:[%s3431_s3 + $0x38] sm:$0xff]  ;;  %vm731_vm14 = vcmask 261120   ;;  %s3486_s27 = smov (!%p270_p6, %s2484_s27), 15 }
   0xf   : > { %2326 = vmatpush.bf16.msra.mxu1 %v2285_v0  ;;  %2327 = vmatpush.bf16.msra.mxu2 %v2285_v0  ;;  %v443_v4 = vadd.s32 2, %v2487_v2  ;;  %v445_v6 = vadd.s32 4, %v2487_v2  ;;  %s2332_s6 = smul.u32 216, %s3484_s19  ;;  %s2504_s9 = scalar_lea.vmem %s3429_s1, %s3484_s19  ;;  %v447_v7 = vadd.s32 6, %v2487_v2  ;;  %v2289_v8 = vld [vmem:[%s3431_s3 + $0x28] sm:$0xff]  ;;  %vm455_vm0 = vcmp.ge.s32.totalorder %v2487_v2, 1 }
  0x10   : > { %2328 = vmatpush.bf16.msra.mxu3 %v2285_v0  ;;  %762 = vmatpush.bf16.msra.mxu0 %v2285_v0  ;;  %v2496_v5 = vshrl.u32 %v451_v1, 7  ;;  %s2517_s16 = scalar_lea.vmem %s3430_s2, %s3484_s19  ;;  %vm465_vm1 = vcmp.lt.s32.totalorder %v2487_v2, 17  ;;  %v2287_v10 = vld [vmem:[%s3431_s3 + $0x18] sm:$0xff]  ;;  %v2293_v11 = vld [vmem:[%s3431_s3 + $0x48] sm:$0xff]  ;;  %v2531_v12 = vadd.s32 3, %v2487_v2  ;;  %v2534_v13 = vadd.s32 5, %v2487_v2 }
  0x11   : > { %s260_s7 = scalar_lea.vmem %s3428_s0, %s2332_s6  ;;  %vm457_vm2 = vcmp.ge.s32.totalorder %v443_v4, 1  ;;  %v2539_v14 = vld [vmem:[%s2504_s9] ss:$0 sm:$0xff]  ;;  %vm467_vm3 = vcmp.lt.s32.totalorder %v443_v4, 17  ;;  %vm459_vm5 = vcmp.ge.s32.totalorder %v445_v6, 1  ;;  %vm469_vm6 = vcmp.lt.s32.totalorder %v445_v6, 17  ;;  %vm2548_vm9 = vmand %vm455_vm0, %vm465_vm1 }
  0x12   : > { %s2536_s8 = scalar_lea.vmem %s260_s7, %s2283_s30  ;;  %vm3434_vm4 = vcmp.ge.s32.totalorder %v2496_v5, 1  ;;  %vm461_vm7 = vcmp.ge.s32.totalorder %v447_v7, 1  ;;  %vm471_vm8 = vcmp.lt.s32.totalorder %v447_v7, 17  ;;  %v2553_v18 = vadd.s32 7, %v2487_v2  ;;  %v2559_v22 = vld [vmem:[%s2517_s16] ss:$0 sm:$0xff]  ;;  %vm2565_vm10 = vmand %vm457_vm2, %vm467_vm3 }
  0x13   : > { %2329 = vmatpush.bf16.msra.mxu1 %v2284_v3  ;;  %2330 = vmatpush.bf16.msra.mxu2 %v2284_v3  ;;  %v2322_v15 = vld [vmem:[%s2536_s8 + $0x18] sm:$0xff]   ;;  %v2323_v16 = vld [vmem:[%s2536_s8 + $0x30] sm:$0xff]   ;;  %v2556_v19 = vadd.s32 1, %v2487_v2  ;;  %v2324_v25 = vld [vmem:[%s2536_s8 + $0x48] sm:$0xff]   ;;  %vm458_vm15 = vcmp.ge.s32.totalorder %v2531_v12, 1  ;;  %vm468_vm0 = vcmp.lt.s32.totalorder %v2531_v12, 17 }
  0x14   : > { %2331 = vmatpush.bf16.msra.mxu3 %v2284_v3  ;;  %763 = vmatpush.bf16.msra.mxu0 %v2284_v3  ;;  %v2308_v20 = vunpack.c.l.bf16 %v2322_v15  ;;  %v2309_v21 = vunpack.c.h.bf16 %v2322_v15  ;;  %v2312_v23 = vunpack.c.l.bf16 %v2323_v16  ;;  %v2313_v24 = vunpack.c.h.bf16 %v2323_v16  ;;  %v2303_v26 = vld [vmem:[%s2536_s8] sm:$0xff]   ;;  %vm2575_vm11 = vmand %vm459_vm5, %vm469_vm6  ;;  %v2290_v58 = vld [vmem:[%s3431_s3 + $0x30] sm:$0xff] }
  0x15   : > { %v2316_v28 = vunpack.c.l.bf16 %v2324_v25  ;;  %v2317_v29 = vunpack.c.h.bf16 %v2324_v25  ;;  %v2304_v30 = vunpack.c.l.bf16 %v2303_v26  ;;  %v2305_v31 = vunpack.c.h.bf16 %v2303_v26  ;;  %v2288_v37 = vld [vmem:[%s3431_s3 + $0x20] sm:$0xff]  ;;  %vm2586_vm12 = vmand %vm461_vm7, %vm471_vm8  ;;  %v2286_v59 = vld [vmem:[%s3431_s3 + $0x10] sm:$0xff] }
  0x16   : > { %v353_v32 = vmul.f32 %v2539_v14, %v2308_v20  ;;  %v354_v33 = vmul.f32 %v2539_v14, %v2309_v21  ;;  %v359_v34 = vmul.f32 %v2539_v14, %v2312_v23  ;;  %v360_v35 = vmul.f32 %v2539_v14, %v2313_v24  ;;  %vm2598_vm13 = vmand %vm2565_vm10, %vm3434_vm4  ;;  %v2292_v0 = vld [vmem:[%s3431_s3 + $0x40] sm:$0xff]  ;;  %v286_v57 = vld [vmem:[%s2536_s8 + $0xc] sm:$0xff]  }
  0x17   : > { %1284 = vmatpush.bf16.msrb.mxu2 %v2289_v8  ;;  %1087 = vmatpush.bf16.msrb.mxu1 %v2287_v10  ;;  %v365_v38 = vmul.f32 %v2539_v14, %v2316_v28  ;;  %v366_v39 = vmul.f32 %v2539_v14, %v2317_v29  ;;  %v347_v41 = vmul.f32 %v2539_v14, %v2304_v30  ;;  %vm2610_vm1 = vmand %vm2575_vm11, %vm3434_vm4  ;;  %vm460_vm3 = vcmp.ge.s32.totalorder %v2534_v13, 1  ;;  %v292_v21 = vld [vmem:[%s2536_s8 + $0x24] sm:$0xff]  }
  0x18   : > { %1374 = vmatpush.bf16.msrb.mxu3 %v2291_v9  ;;  %1486 = vmatpush.bf16.msrb.mxu0 %v2293_v11  ;;  %v348_v42 = vmul.f32 %v2539_v14, %v2305_v31  ;;  %v387_v43 = vadd.f32 %v2559_v22, %v353_v32  ;;  %v388_v44 = vadd.f32 %v2559_v22, %v354_v33  ;;  %vm2622_vm2 = vmand %vm2586_vm12, %vm3434_vm4  ;;  %vm470_vm5 = vcmp.lt.s32.totalorder %v2534_v13, 17  ;;  %v298_v32 = vld [vmem:[%s2536_s8 + $0x3c] sm:$0xff]  }
  0x19   : > { %v393_v46 = vadd.f32 %v2559_v22, %v359_v34  ;;  %v394_v47 = vadd.f32 %v2559_v22, %v360_v35  ;;  %v399_v49 = vadd.f32 %v2559_v22, %v365_v38  ;;  %v400_v50 = vadd.f32 %v2559_v22, %v366_v39  ;;  %vm488_vm6 = vmand %vm2548_vm9, %vm3434_vm4  ;;  %v304_v38 = vld [vmem:[%s2536_s8 + $0x54] sm:$0xff]  }
  0x1a   : > { %v381_v51 = vadd.f32 %v2559_v22, %v347_v41  ;;  %v382_v52 = vadd.f32 %v2559_v22, %v348_v42  ;;  %v417_v53 = vmax.f32 %v387_v43, 0.0  ;;  %v418_v54 = vmax.f32 %v388_v44, 0.0  ;;  %vm2696_vm7 = vmand %vm458_vm15, %vm468_vm0 }
  0x1b   : > { %1285 = vmatpush.bf16.msrb.mxu2 %v2288_v37  ;;  %v423_v55 = vmax.f32 %v393_v46, 0.0  ;;  %v424_v56 = vmax.f32 %v394_v47, 0.0  ;;  %v429_v60 = vmax.f32 %v399_v49, 0.0  ;;  %v430_v61 = vmax.f32 %v400_v50, 0.0  ;;  %1088 = vmatpush.bf16.msrb.mxu1 %v2286_v59  ;;  %vm2710_vm8 = vmand %vm460_vm3, %vm470_vm5 }
  0x1c   : > { %v411_v62 = vmax.f32 %v381_v51, 0.0  ;;  %v412_v63 = vmax.f32 %v382_v52, 0.0  ;;  %v617_v1 = vsel %vm2598_vm13, %v417_v53, 0.0  ;;  %v618_v3 = vsel %vm2565_vm10, %v418_v54, 0.0  ;;  %1375 = vmatpush.bf16.msrb.mxu3 %v2290_v58  ;;  %1487 = vmatpush.bf16.msrb.mxu0 %v2292_v0  ;;  %vm2722_vm13 = vmand %vm2696_vm7, %vm3434_vm4 }
  0x1d   : > { %v623_v4 = vsel %vm2610_vm1, %v423_v55, 0.0  ;;  %v624_v6 = vsel %vm2575_vm11, %v424_v56, 0.0  ;;  %v2649_v7 = vpack.c.bf16 %v617_v1, %v617_v1  ;;  %v2651_v8 = vpack.c.bf16 %v618_v3, %v618_v3 }
  0x1e   : > { %v2653_v9 = vpack.c.bf16 %v623_v4, %v623_v4  ;;  %v2655_v10 = vpack.c.bf16 %v624_v6, %v624_v6  ;;  %v629_v11 = vsel %vm2622_vm2, %v429_v60, 0.0  ;;  %v630_v15 = vsel %vm2586_vm12, %v430_v61, 0.0  ;;  %v2297_v60 = vld [vmem:[%s3431_s3 + $0x68] sm:$0xff]  ;;  %vm2743_vm2 = vmand %vm2710_vm8, %vm3434_vm4 }
  0x1f   : > { %v611_v16 = vsel %vm488_vm6, %v411_v62, 0.0  ;;  %v612_v20 = vsel %vm2548_vm9, %v412_v63, 0.0  ;;  %v699_v23 = vunpack.c.l.b16 %v2649_v7  ;;  %v700_v24 = vunpack.c.l.b16 %v2651_v8 }
  0x20   : > { %v703_v25 = vunpack.c.l.b16 %v2653_v9  ;;  %v704_v26 = vunpack.c.l.b16 %v2655_v10  ;;  %v2668_v28 = vpack.c.bf16 %v629_v11, %v629_v11  ;;  %v2670_v29 = vpack.c.bf16 %v630_v15, %v630_v15 }
  0x21   : > { %v2672_v30 = vpack.c.bf16 %v611_v16, %v611_v16  ;;  %v2674_v31 = vpack.c.bf16 %v612_v20, %v612_v20  ;;  %v2677_v33 = vpack.c.b16 %v700_v24, %v699_v23  ;;  %v322_v35 = vunpack.c.l.bf16 %v292_v21 }
  0x22   : > { %v2679_v34 = vpack.c.b16 %v704_v26, %v703_v25  ;;  %v323_v37 = vunpack.c.h.bf16 %v292_v21  ;;  %v707_v39 = vunpack.c.l.b16 %v2668_v28  ;;  %v708_v41 = vunpack.c.l.b16 %v2670_v29 }
  0x23   : > { %v695_v42 = vunpack.c.l.b16 %v2672_v30  ;;  %v696_v43 = vunpack.c.l.b16 %v2674_v31  ;;  %2105 = vmatmul.msk.bf16.vlgmr.msra.gmra.mxu1 %vm731_vm14, %v2677_v33  ;;  %v356_v44 = vmul.f32 %v2539_v14, %v322_v35  ;;  %v328_v47 = vunpack.c.l.bf16 %v298_v32 }
  0x24   : > { %2107 = vmatmul.msk.bf16.vlgmr.msra.gmra.mxu2 %vm731_vm14, %v2679_v34  ;;  %v357_v45 = vmul.f32 %v2539_v14, %v323_v37  ;;  %v329_v48 = vunpack.c.h.bf16 %v298_v32  ;;  %v2700_v49 = vpack.c.b16 %v708_v41, %v707_v39  ;;  %v334_v51 = vunpack.c.l.bf16 %v304_v38 }
  0x25   : > { %v711_v50 = vpack.c.b16 %v696_v43, %v695_v42  ;;  %v335_v52 = vunpack.c.h.bf16 %v304_v38  ;;  %v390_v53 = vadd.f32 %v2559_v22, %v356_v44  ;;  %v362_v55 = vmul.f32 %v2539_v14, %v328_v47  ;;  %1672 = vmatpush.bf16.msra.mxu2 %v2297_v60  ;;  %v2299_v44 = vld [vmem:[%s3431_s3 + $0x78] sm:$0xff]  ;;  %v2301_v47 = vld [vmem:[%s3431_s3 + $0x88] sm:$0xff] }
  0x26   : > { %v391_v54 = vadd.f32 %v2559_v22, %v357_v45  ;;  %v363_v56 = vmul.f32 %v2539_v14, %v329_v48  ;;  %2109 = vmatmul.msk.bf16.vlgmr.msra.gmra.mxu3 %vm731_vm14, %v2700_v49  ;;  %v368_v13 = vmul.f32 %v2539_v14, %v334_v51  ;;  %vm462_vm15 = vcmp.ge.s32.totalorder %v2553_v18, 1  ;;  %v2295_v45 = vld [vmem:[%s3431_s3 + $0x58] sm:$0xff] }
  0x27   : > { %2103 = vmatmul.msk.bf16.vlgmr.msra.gmra.mxu0 %vm731_vm14, %v711_v50  ;;  %v369_v59 = vmul.f32 %v2539_v14, %v335_v52  ;;  %vm472_vm0 = vcmp.lt.s32.totalorder %v2553_v18, 17  ;;  %v420_v61 = vmax.f32 %v390_v53, 0.0  ;;  %v396_v63 = vadd.f32 %v2559_v22, %v362_v55  ;;  %v285_v53 = vld [vmem:[%s2536_s8 + $0x8] sm:$0x1]  ;;  %1784 = vmatpush.bf16.msra.mxu3 %v2299_v44 }
  0x28   : > { %v421_v62 = vmax.f32 %v391_v54, 0.0  ;;  %v397_v0 = vadd.f32 %v2559_v22, %v363_v56  ;;  %vm2735_vm1 = vmand %vm462_vm15, %vm472_vm0  ;;  %v402_v3 = vadd.f32 %v2559_v22, %v368_v13  ;;  %v316_v6 = vunpack.c.l.bf16 %v286_v57  ;;  %1582 = vmatpush.bf16.msra.mxu1 %v2295_v45  ;;  %1880 = vmatpush.bf16.msra.mxu0 %v2301_v47 }
  0x29   : > { %v403_v4 = vadd.f32 %v2559_v22, %v369_v59  ;;  %v317_v11 = vunpack.c.h.bf16 %v286_v57  ;;  %v620_v15 = vsel %vm2722_vm13, %v420_v61, 0.0  ;;  %v426_v20 = vmax.f32 %v396_v63, 0.0  ;;  %vm509_vm3 = vmand %vm2735_vm1, %vm3434_vm4 }
  0x2a   : > { %v621_v16 = vsel %vm2696_vm7, %v421_v62, 0.0  ;;  %v427_v21 = vmax.f32 %v397_v0, 0.0  ;;  %v2753_v23 = vpack.c.bf16 %v620_v15, %v620_v15  ;;  %v432_v25 = vmax.f32 %v402_v3, 0.0 }
  0x2b   : > { %v2755_v24 = vpack.c.bf16 %v621_v16, %v621_v16  ;;  %v433_v26 = vmax.f32 %v403_v4, 0.0  ;;  %v626_v32 = vsel %vm2743_vm2, %v426_v20, 0.0  ;;  %v350_v37 = vmul.f32 %v2539_v14, %v316_v6 }
  0x2c   : > { %v627_v35 = vsel %vm2710_vm8, %v427_v21, 0.0  ;;  %v351_v38 = vmul.f32 %v2539_v14, %v317_v11  ;;  %v701_v39 = vunpack.c.l.b16 %v2753_v23  ;;  %v2769_v42 = vpack.c.bf16 %v626_v32, %v626_v32 }
  0x2d   : > { %v702_v41 = vunpack.c.l.b16 %v2755_v24  ;;  %v2771_v43 = vpack.c.bf16 %v627_v35, %v627_v35  ;;  %v632_v48 = vsel %vm509_vm3, %v432_v25, 0.0  ;;  %v633_v50 = vsel %vm2735_vm1, %v433_v26, 0.0  ;;  %v291_v35 = vld [vmem:[%s2536_s8 + $0x20] sm:$0x1] }
  0x2e   : > { %v384_v51 = vadd.f32 %v2559_v22, %v350_v37  ;;  %v385_v52 = vadd.f32 %v2559_v22, %v351_v38  ;;  %v705_v55 = vunpack.c.l.b16 %v2769_v42  ;;  %v2791_v57 = vpack.c.bf16 %v632_v48, %v632_v48 }
  0x2f   : > { %v2787_v54 = vpack.c.b16 %v702_v41, %v701_v39  ;;  %v706_v56 = vunpack.c.l.b16 %v2771_v43  ;;  %v2793_v58 = vpack.c.bf16 %v633_v50, %v633_v50  ;;  %vm456_vm5 = vcmp.ge.s32.totalorder %v2556_v19, 1  ;;  %v288_v39 = vld [vmem:[%s2536_s8 + $0x14] sm:$0x1] }
  0x30   : > { %v414_v13 = vmax.f32 %v384_v51, 0.0  ;;  %v415_v59 = vmax.f32 %v385_v52, 0.0  ;;  %v709_v61 = vunpack.c.l.b16 %v2791_v57  ;;  %vm466_vm6 = vcmp.lt.s32.totalorder %v2556_v19, 17 }
  0x31   : > { %v2796_v60 = vpack.c.b16 %v706_v56, %v705_v55  ;;  %v315_v62 = vunpack.c.l.bf16 %v285_v53  ;;  %v710_v63 = vunpack.c.l.b16 %v2793_v58  ;;  %vm2801_vm13 = vmand %vm456_vm5, %vm466_vm6  ;;  %v2806_v18 = vadd.s32 16, %v2496_v5 }
  0x32   : > { %vm821_vm15 = vsmask.f32 3328  ;;  %vm822_vm0 = vsmask.f32 7440  ;;  %vm491_vm2 = vmand %vm2801_vm13, %vm3434_vm4  ;;  %v615_v19 = vsel %vm2801_vm13, %v415_v59, 0.0  ;;  %v825_v4 = vshrl.u32 %v2672_v30, 16 }
  0x33   : > { %v349_v3 = vmul.f32 %v2539_v14, %v315_v62  ;;  %v828_v6 = vshll.u32 %v2672_v30, 16  ;;  %2106 = vmatmul.msk.bf16.gmra.mxu1 %vm731_vm14, %v2787_v54  ;;  %v2821_v11 = vpack.c.b16 %v710_v63, %v709_v61  ;;  %v614_v15 = vsel %vm491_vm2, %v414_v13, 0.0  ;;  %vm2846_vm2 = vmor %vm821_vm15, %vm822_vm0 }
  0x34   : > { %2108 = vmatmul.msk.bf16.gmra.mxu2 %vm731_vm14, %v2796_v60  ;;  %v2823_v16 = vpack.c.bf16 %v615_v19, %v615_v19  ;;  %vm520_vm3 = vcmp.lt.s32.totalorder %v2806_v18, 17  ;;  %v2826_v20 = vpack.c.bf16 %v614_v15, %v614_v15  ;;  %v827_v25 = vrot.slane %v825_v4, 4 }
  0x35   : > { %v383_v21 = vadd.f32 %v2559_v22, %v349_v3  ;;  %v830_v26 = vrot.slane %v828_v6, 5  ;;  %vm2834_vm5 = vmand %vm2548_vm9, %vm520_vm3  ;;  %v834_v37 = vshll.u32 %v2674_v31, 16  ;;  %v838_v38 = vshrl.u32 %v2674_v31, 16 }
  0x36   : > { %v698_v32 = vunpack.c.l.b16 %v2823_v16  ;;  %vm1154_vm6 = vcmask 1042432   ;;  %2110 = vmatmul.msk.bf16.gmra.mxu3 %vm731_vm14, %v2821_v11  ;;  %v697_v41 = vunpack.c.l.b16 %v2826_v20  ;;  %vm1155_vm9 = vcmask 1046532   ;;  %vm526_vm15 = vmand %vm2801_vm13, %vm520_vm3 }
  0x37   : > { %v413_v44 = vmax.f32 %v383_v21, 0.0  ;;  %v831_v45 = vor.u32 %v830_v26, %v827_v25  ;;  %v836_v47 = vrot.slane %v834_v37, 5  ;;  %v840_v48 = vrot.slane %v838_v38, 4  ;;  %vm2850_vm4 = vmor %vm1154_vm6, %vm1155_vm9 }
  0x38   : > { %v2131_v51 = vrot.slane %v2672_v30, 9  ;;  %v1159_v52 = vrot.slane %v2674_v31, 5  ;;  %v712_v53 = vpack.c.b16 %v698_v32, %v697_v41  ;;  %v318_v13 = vunpack.c.l.bf16 %v288_v39  ;;  %vm529_vm13 = vmand %vm2565_vm10, %vm520_vm3 }
  0x39   : > { %v613_v55 = vsel %vm2834_vm5, %v413_v44, 0.0  ;;  %v832_v56 = vrot.slane %v831_v45, 4  ;;  %v841_v61 = vor.u32 %v840_v48, %v836_v47  ;;  %v849_v19 = vshrl.u32 %v2826_v20, 16  ;;  %vm532_vm10 = vmand %vm2696_vm7, %vm520_vm3 }
  0x3a   : > { %v643_v59 = vpack.c.bf16 %v613_v55, %v613_v55  ;;  %v1160_v62 = vsel %vm2850_vm4, %v2131_v51, %v1159_v52  ;;  %v1161_v63 = vrot.slane %v1159_v52, 4  ;;  %2104 = vmatmul.msk.bf16.gmra.mxu0 %vm731_vm14, %v712_v53  ;;  %v352_v31 = vmul.f32 %v2539_v14, %v318_v13  ;;  %vm535_vm7 = vmand %vm2575_vm11, %vm520_vm3 }
  0x3b   : > { %v837_v30 = vsel %vm2846_vm2, %v832_v56, %v836_v47  ;;  %v842_v3 = vrot.slane %v841_v61, 4  ;;  %v1218_v15 = vunpack.c.l.b16 %v1160_v62  ;;  %v851_v25 = vrot.slane %v849_v19, 4  ;;  %vm538_vm11 = vmand %vm2710_vm8, %vm520_vm3 }
  0x3c   : > { %v844_v4 = vshll.u32 %v643_v59, 16  ;;  %v1162_v6 = vrot.slane %v643_v59, 5  ;;  %v386_v21 = vadd.f32 %v2559_v22, %v352_v31  ;;  %v852_v26 = vshll.u32 %v2826_v20, 16  ;;  %vm541_vm8 = vmand %vm2586_vm12, %vm520_vm3 }
  0x3d   : > { %v858_v32 = vshll.u32 %v2823_v16, 16  ;;  %v1021_v38 = vunpack.c.l.b16 %v837_v30  ;;  %v862_v41 = vshrl.u32 %v2823_v16, 16  ;;  %v1166_v55 = vrot.slane %v2823_v16, 5  ;;  %vm544_vm12 = vmand %vm2735_vm1, %vm520_vm3 }
  0x3e   : > { %v846_v37 = vrot.slane %v844_v4, 5  ;;  %v1163_v39 = vsel %vm2850_vm4, %v1161_v63, %v1162_v6  ;;  %v416_v45 = vmax.f32 %v386_v21, 0.0  ;;  %v854_v47 = vrot.slane %v852_v26, 5 }
  0x3f   : > { %v1219_v44 = vunpack.c.l.b16 %v1163_v39  ;;  %v860_v48 = vrot.slane %v858_v32, 5  ;;  %v864_v52 = vrot.slane %v862_v41, 4  ;;  %v321_v56 = vunpack.c.l.bf16 %v291_v35 }
  0x40   : > { %v847_v51 = vsel %vm2846_vm2, %v842_v3, %v846_v37  ;;  %v616_v61 = vsel %vm526_vm15, %v416_v45, 0.0  ;;  %v855_v62 = vor.u32 %v854_v47, %v851_v25  ;;  %v2132_v30 = vrot.slane %v2826_v20, 9 }
  0x41   : > { %v1022_v13 = vunpack.c.l.b16 %v847_v51  ;;  %v1234_v59 = vpack.c.b16 %v1219_v44, %v1218_v15  ;;  %v646_v63 = vpack.c.bf16 %v616_v61, %v616_v61  ;;  %v865_v0 = vor.u32 %v864_v52, %v860_v48  ;;  %v294_v51 = vld [vmem:[%s2536_s8 + $0x2c] sm:$0x1] }
  0x42   : > { %v856_v19 = vrot.slane %v855_v62, 4  ;;  %v1168_v4 = vrot.slane %v1166_v55, 4  ;;  %v355_v6 = vmul.f32 %v2539_v14, %v321_v56  ;;  %v873_v16 = vshrl.u32 %v2649_v7, 16 }
  0x43   : > { %v1037_v31 = vpack.c.b16 %v1022_v13, %v1021_v38  ;;  %v866_v3 = vrot.slane %v865_v0, 4  ;;  %v868_v21 = vshll.u32 %v646_v63, 16  ;;  %v1169_v26 = vrot.slane %v646_v63, 5 }
  0x44   : > { %2151 = vmatmul.msk.bf16.vlgmr.msrb.gmra.mxu2 %vm731_vm14, %v1234_v59  ;;  %v861_v15 = vsel %vm2846_vm2, %v856_v19, %v860_v48  ;;  %v389_v20 = vadd.f32 %v2559_v22, %v355_v6  ;;  %v876_v25 = vshll.u32 %v2649_v7, 16  ;;  %v882_v32 = vshll.u32 %v2651_v8, 16 }
  0x45   : > { %2123 = vmatmul.msk.bf16.vlgmr.msrb.gmra.mxu1 %vm731_vm14, %v1037_v31  ;;  %v870_v35 = vrot.slane %v868_v21, 5  ;;  %v875_v37 = vrot.slane %v873_v16, 4  ;;  %v1023_v38 = vunpack.c.l.b16 %v861_v15  ;;  %v1167_v45 = vsel %vm2850_vm4, %v2132_v30, %v1166_v55  ;;  %v297_v21 = vld [vmem:[%s2536_s8 + $0x38] sm:$0x1] }
  0x46   : > { %2171 = vmatmul.msk.bf16.vlgmr.msrb.gmra.mxu3 %vm731_vm14, %v712_v53  ;;  %v419_v39 = vmax.f32 %v389_v20, 0.0  ;;  %v878_v41 = vrot.slane %v876_v25, 5  ;;  %v884_v47 = vrot.slane %v882_v32, 5  ;;  %v886_v48 = vshrl.u32 %v2651_v8, 16 }
  0x47   : > { %v871_v44 = vsel %vm2846_vm2, %v866_v3, %v870_v35  ;;  %v1170_v27 = vsel %vm2850_vm4, %v1168_v4, %v1169_v26  ;;  %v324_v62 = vunpack.c.l.bf16 %v294_v51  ;;  %v1220_v63 = vunpack.c.l.b16 %v1167_v45 }
  0x48   : > { %v1024_v52 = vunpack.c.l.b16 %v871_v44  ;;  %v619_v56 = vsel %vm529_vm13, %v419_v39, 0.0  ;;  %v879_v53 = vor.u32 %v878_v41, %v875_v37  ;;  %v888_v59 = vrot.slane %v886_v48, 4 }
  0x49   : > { %v649_v13 = vpack.c.bf16 %v619_v56, %v619_v56  ;;  %v1221_v0 = vunpack.c.l.b16 %v1170_v27  ;;  %v358_v30 = vmul.f32 %v2539_v14, %v324_v62  ;;  %v1173_v16 = vrot.slane %v2651_v8, 5 }
  0x4a   : > { %v1038_v61 = vpack.c.b16 %v1024_v52, %v1023_v38  ;;  %v889_v31 = vor.u32 %v888_v59, %v884_v47  ;;  %v880_v55 = vrot.slane %v879_v53, 4  ;;  %v897_v25 = vshrl.u32 %v2753_v23, 16 }
  0x4b   : > { %v892_v19 = vshll.u32 %v649_v13, 16  ;;  %v392_v4 = vadd.f32 %v2559_v22, %v358_v30  ;;  %v2906_v26 = vpack.c.b16 %v1221_v0, %v1220_v63  ;;  %v327_v32 = vunpack.c.l.bf16 %v297_v21  ;;  %v300_v21 = vld [vmem:[%s2536_s8 + $0x44] sm:$0x1] }
  0x4c   : > { %2191 = vmatmul.msk.bf16.vlgmr.msrb.gmra.mxu0 %vm731_vm14, %v1038_v61  ;;  %v890_v6 = vrot.slane %v889_v31, 4  ;;  %v885_v15 = vsel %vm2846_vm2, %v880_v55, %v884_v47  ;;  %v900_v37 = vshll.u32 %v2753_v23, 16  ;;  %v906_v38 = vshll.u32 %v2755_v24, 16 }
  0x4d   : > { %v894_v3 = vrot.slane %v892_v19, 5  ;;  %v422_v20 = vmax.f32 %v392_v4, 0.0  ;;  %v910_v8 = vshrl.u32 %v2755_v24, 16  ;;  %v2133_v46 = vrot.slane %v2649_v7, 9 }
  0x4e   : > { %v1175_v41 = vrot.slane %v1173_v16, 4  ;;  %v1176_v44 = vrot.slane %v649_v13, 5  ;;  %v1025_v45 = vunpack.c.l.b16 %v885_v15  ;;  %v899_v48 = vrot.slane %v897_v25, 4 }
  0x4f   : > { %v895_v35 = vsel %vm2846_vm2, %v890_v6, %v894_v3  ;;  %v622_v39 = vsel %vm532_vm10, %v422_v20, 0.0  ;;  %v361_v51 = vmul.f32 %v2539_v14, %v327_v32  ;;  %v902_v27 = vrot.slane %v900_v37, 5 }
  0x50   : > { %v1026_v47 = vunpack.c.l.b16 %v895_v35  ;;  %v652_v52 = vpack.c.bf16 %v622_v39, %v622_v39  ;;  %v908_v56 = vrot.slane %v906_v38, 5  ;;  %v912_v53 = vrot.slane %v910_v8, 4 }
  0x51   : > { %v1174_v7 = vsel %vm2850_vm4, %v2133_v46, %v1173_v16  ;;  %v1177_v13 = vsel %vm2850_vm4, %v1175_v41, %v1176_v44  ;;  %v903_v62 = vor.u32 %v902_v27, %v899_v48  ;;  %v1180_v4 = vrot.slane %v2755_v24, 5 }
  0x52   : > { %v2928_v59 = vpack.c.b16 %v1026_v47, %v1025_v45  ;;  %v913_v63 = vor.u32 %v912_v53, %v908_v56  ;;  %v916_v0 = vshll.u32 %v652_v52, 16  ;;  %v1222_v31 = vunpack.c.l.b16 %v1174_v7 }
  0x53   : > { %v1223_v19 = vunpack.c.l.b16 %v1177_v13  ;;  %v904_v30 = vrot.slane %v903_v62, 4  ;;  %v921_v16 = vshrl.u32 %v2653_v9, 16  ;;  %v924_v15 = vshll.u32 %v2653_v9, 16 }
  0x54   : > { %2152 = vmatmul.msk.bf16.gmra.mxu2 %vm731_vm14, %v2906_v26  ;;  %v914_v6 = vrot.slane %v913_v63, 4  ;;  %v918_v3 = vrot.slane %v916_v0, 5  ;;  %v930_v25 = vshll.u32 %v2655_v10, 16  ;;  %v934_v32 = vshrl.u32 %v2655_v10, 16 }
  0x55   : > { %2124 = vmatmul.msk.bf16.gmra.mxu1 %vm731_vm14, %v1038_v61  ;;  %v395_v61 = vadd.f32 %v2559_v22, %v361_v51  ;;  %v2945_v20 = vpack.c.b16 %v1223_v19, %v1222_v31  ;;  %v330_v37 = vunpack.c.l.bf16 %v300_v21  ;;  %v909_v38 = vsel %vm2846_vm2, %v904_v30, %v908_v56  ;;  %v2296_v56 = vld [vmem:[%s3431_s3 + $0x60] sm:$0xff]  ;;  %v303_v30 = vld [vmem:[%s2536_s8 + $0x50] sm:$0x1] }
  0x56   : > { %2172 = vmatmul.msk.bf16.gmra.mxu3 %vm731_vm14, %v2677_v33  ;;  %v919_v36 = vsel %vm2846_vm2, %v914_v6, %v918_v3  ;;  %v2134_v24 = vrot.slane %v2753_v23, 9  ;;  %v1182_v8 = vrot.slane %v1180_v4, 4  ;;  %v923_v39 = vrot.slane %v921_v16, 4  ;;  %1673 = vmatpush.bf16.msra.mxu2 %v2296_v56  ;;  %v2298_v3 = vld [vmem:[%s3431_s3 + $0x70] sm:$0xff] }
  0x57   : > { %v425_v55 = vmax.f32 %v395_v61, 0.0  ;;  %v926_v46 = vrot.slane %v924_v15, 5  ;;  %v1183_v41 = vrot.slane %v652_v52, 5  ;;  %v932_v45 = vrot.slane %v930_v25, 5  ;;  %v2294_v21 = vld [vmem:[%s3431_s3 + $0x50] sm:$0xff]  ;;  %1785 = vmatpush.bf16.msra.mxu3 %v2298_v3 }
  0x58   : > { %v936_v47 = vrot.slane %v934_v32, 4  ;;  %v1027_v48 = vunpack.c.l.b16 %v909_v38  ;;  %v1028_v51 = vunpack.c.l.b16 %v919_v36  ;;  %v364_v27 = vmul.f32 %v2539_v14, %v330_v37  ;;  %1583 = vmatpush.bf16.msra.mxu1 %v2294_v21 }
  0x59   : > { %v625_v35 = vsel %vm535_vm7, %v425_v55, 0.0  ;;  %v927_v23 = vor.u32 %v926_v46, %v923_v39  ;;  %v1181_v52 = vsel %vm2850_vm4, %v2134_v24, %v1180_v4  ;;  %v1184_v53 = vsel %vm2850_vm4, %v1182_v8, %v1183_v41  ;;  %v2300_v4 = vld [vmem:[%s3431_s3 + $0x80] sm:$0xff] }
  0x5a   : > { %v655_v44 = vpack.c.bf16 %v625_v35, %v625_v35  ;;  %v937_v7 = vor.u32 %v936_v47, %v932_v45  ;;  %v2968_v61 = vpack.c.b16 %v1028_v51, %v1027_v48  ;;  %v398_v62 = vadd.f32 %v2559_v22, %v364_v27  ;;  %1881 = vmatpush.bf16.msra.mxu0 %v2300_v4 }
  0x5b   : > { %v1224_v63 = vunpack.c.l.b16 %v1181_v52  ;;  %v1225_v0 = vunpack.c.l.b16 %v1184_v53  ;;  %v928_v31 = vrot.slane %v927_v23, 4  ;;  %v333_v25 = vunpack.c.l.bf16 %v303_v30  ;;  %v306_v30 = vld [vmem:[%s2536_s8 + $0x5c] sm:$0x1] }
  0x5c   : > { %2192 = vmatmul.msk.bf16.gmra.mxu0 %vm731_vm14, %v2928_v59  ;;  %v940_v13 = vshll.u32 %v655_v44, 16  ;;  %v938_v19 = vrot.slane %v937_v7, 4  ;;  %v428_v6 = vmax.f32 %v398_v62, 0.0  ;;  %v945_v35 = vshrl.u32 %v2769_v42, 16 }
  0x5d   : > { %v2987_v16 = vpack.c.b16 %v1225_v0, %v1224_v63  ;;  %v933_v15 = vsel %vm2846_vm2, %v928_v31, %v932_v45  ;;  %v948_v37 = vshll.u32 %v2769_v42, 16  ;;  %v954_v38 = vshll.u32 %v2771_v43, 16 }
  0x5e   : > { %v942_v55 = vrot.slane %v940_v13, 5  ;;  %v1187_v12 = vrot.slane %v2655_v10, 5  ;;  %v628_v36 = vsel %vm538_vm11, %v428_v6, 0.0  ;;  %v958_v24 = vshrl.u32 %v2771_v43, 16 }
  0x5f   : > { %v1029_v8 = vunpack.c.l.b16 %v933_v15  ;;  %v367_v46 = vmul.f32 %v2539_v14, %v333_v25  ;;  %v658_v41 = vpack.c.bf16 %v628_v36, %v628_v36  ;;  %v947_v45 = vrot.slane %v945_v35, 4 }
  0x60   : > { %v943_v32 = vsel %vm2846_vm2, %v938_v19, %v942_v55  ;;  %v950_v47 = vrot.slane %v948_v37, 5  ;;  %v956_v48 = vrot.slane %v954_v38, 5  ;;  %v2135_v51 = vrot.slane %v2653_v9, 9 }
  0x61   : > { %v1030_v39 = vunpack.c.l.b16 %v943_v32  ;;  %v1189_v10 = vrot.slane %v1187_v12, 4  ;;  %v1190_v27 = vrot.slane %v655_v44, 5  ;;  %v960_v23 = vrot.slane %v958_v24, 4 }
  0x62   : > { %v401_v56 = vadd.f32 %v2559_v22, %v367_v46  ;;  %v951_v53 = vor.u32 %v950_v47, %v947_v45  ;;  %v1188_v7 = vsel %vm2850_vm4, %v2135_v51, %v1187_v12  ;;  %v964_v9 = vshll.u32 %v658_v41, 16 }
  0x63   : > { %v3007_v52 = vpack.c.b16 %v1030_v39, %v1029_v8  ;;  %v1191_v13 = vsel %vm2850_vm4, %v1189_v10, %v1190_v27  ;;  %v961_v62 = vor.u32 %v960_v23, %v956_v48  ;;  %v1226_v44 = vunpack.c.l.b16 %v1188_v7 }
  0x64   : > { %2153 = vmatmul.msk.bf16.gmra.mxu2 %vm731_vm14, %v2945_v20  ;;  %v431_v63 = vmax.f32 %v401_v56, 0.0  ;;  %v1227_v0 = vunpack.c.l.b16 %v1191_v13  ;;  %v952_v31 = vrot.slane %v951_v53, 4  ;;  %v966_v55 = vrot.slane %v964_v9, 5  ;;  %v2325_v56 = vld [vmem:[%s2536_s8 + $0x60] sm:$0xff]  }
  0x65   : > { %2125 = vmatmul.msk.bf16.gmra.mxu1 %vm731_vm14, %v2928_v59  ;;  %v962_v19 = vrot.slane %v961_v62, 4  ;;  %v969_v6 = vshrl.u32 %v2668_v28, 16  ;;  %v972_v3 = vshll.u32 %v2668_v28, 16  ;;  %v978_v21 = vshll.u32 %v2670_v29, 16 }
  0x66   : > { %2173 = vmatmul.msk.bf16.gmra.mxu3 %vm731_vm14, %v2787_v54  ;;  %v1194_v4 = vrot.slane %v2771_v43, 5  ;;  %v631_v15 = vsel %vm541_vm8, %v431_v63, 0.0  ;;  %v982_v25 = vshrl.u32 %v2670_v29, 16  ;;  %v3025_v40 = vpack.c.b16 %v1227_v0, %v1226_v44 }
  0x67   : > { %v336_v32 = vunpack.c.l.bf16 %v306_v30  ;;  %v957_v35 = vsel %vm2846_vm2, %v952_v31, %v956_v48  ;;  %v967_v37 = vsel %vm2846_vm2, %v962_v19, %v966_v55  ;;  %v3031_v38 = vpack.c.bf16 %v631_v15, %v631_v15 }
  0x68   : > { %v971_v12 = vrot.slane %v969_v6, 4  ;;  %v974_v36 = vrot.slane %v972_v3, 5  ;;  %v980_v24 = vrot.slane %v978_v21, 5  ;;  %v2136_v8 = vrot.slane %v2769_v42, 9  ;;  %v309_v6 = vld [vmem:[%s2536_s8 + $0x68] sm:$0x1] }
  0x69   : > { %v1196_v43 = vrot.slane %v1194_v4, 4  ;;  %v1197_v39 = vrot.slane %v658_v41, 5  ;;  %v984_v46 = vrot.slane %v982_v25, 4  ;;  %v370_v45 = vmul.f32 %v2539_v14, %v336_v32 }
  0x6a   : > { %v1031_v47 = vunpack.c.l.b16 %v957_v35  ;;  %v1032_v48 = vunpack.c.l.b16 %v967_v37  ;;  %v975_v51 = vor.u32 %v974_v36, %v971_v12  ;;  %v1195_v42 = vsel %vm2850_vm4, %v2136_v8, %v1194_v4 }
  0x6b   : > { %v1198_v41 = vsel %vm2850_vm4, %v1196_v43, %v1197_v39  ;;  %v985_v10 = vor.u32 %v984_v46, %v980_v24  ;;  %v988_v27 = vshll.u32 %v3031_v38, 16  ;;  %v404_v23 = vadd.f32 %v2559_v22, %v370_v45 }
  0x6c   : > { %2193 = vmatmul.msk.bf16.gmra.mxu0 %vm731_vm14, %v2968_v61  ;;  %v3048_v53 = vpack.c.b16 %v1032_v48, %v1031_v47  ;;  %v1228_v7 = vunpack.c.l.b16 %v1195_v42  ;;  %v1229_v13 = vunpack.c.l.b16 %v1198_v41  ;;  %v976_v62 = vrot.slane %v975_v51, 4 }
  0x6d   : > { %v986_v9 = vrot.slane %v985_v10, 4  ;;  %v990_v63 = vrot.slane %v988_v27, 5  ;;  %v2320_v44 = vunpack.c.l.bf16 %v2325_v56  ;;  %v2321_v0 = vunpack.c.h.bf16 %v2325_v56 }
  0x6e   : > { %v434_v31 = vmax.f32 %v404_v23, 0.0  ;;  %v3056_v19 = vpack.c.b16 %v1229_v13, %v1228_v7  ;;  %v981_v55 = vsel %vm2846_vm2, %v976_v62, %v980_v24  ;;  %v449_v30 = vadd.s32 8, %v2487_v2 }
  0x6f   : > { %v991_v3 = vsel %vm2846_vm2, %v986_v9, %v990_v63  ;;  %v993_v21 = vshrl.u32 %v2791_v57, 16  ;;  %v371_v4 = vmul.f32 %v2539_v14, %v2320_v44  ;;  %v372_v15 = vmul.f32 %v2539_v14, %v2321_v0 }
  0x70   : > { %v634_v25 = vsel %vm544_vm12, %v434_v31, 0.0  ;;  %v996_v1 = vshll.u32 %v2791_v57, 16  ;;  %v1002_v32 = vshll.u32 %v2793_v58, 16  ;;  %v1006_v35 = vshrl.u32 %v2793_v58, 16 }
  0x71   : > { %v1201_v37 = vrot.slane %v2670_v29, 5  ;;  %v339_v12 = vunpack.c.l.bf16 %v309_v6  ;;  %v1033_v36 = vunpack.c.l.b16 %v981_v55  ;;  %vm463_vm1 = vcmp.ge.s32.totalorder %v449_v30, 1 }
  0x72   : > { %vm473_vm0 = vcmp.lt.s32.totalorder %v449_v30, 17  ;;  %v1034_v24 = vunpack.c.l.b16 %v991_v3  ;;  %v3071_v8 = vpack.c.bf16 %v634_v25, %v634_v25  ;;  %v405_v43 = vadd.f32 %v2559_v22, %v371_v4 }
  0x73   : > { %v406_v39 = vadd.f32 %v2559_v22, %v372_v15  ;;  %v995_v46 = vrot.slane %v993_v21, 4  ;;  %v998_v45 = vrot.slane %v996_v1, 5  ;;  %v1004_v47 = vrot.slane %v1002_v32, 5  ;;  %vm3082_vm5 = vmand %vm463_vm1, %vm473_vm0 }
  0x74   : > { %2154 = vmatmul.msk.bf16.gmra.mxu2 %vm731_vm14, %v2987_v16  ;;  %v1008_v48 = vrot.slane %v1006_v35, 4  ;;  %v2137_v29 = vrot.slane %v2668_v28, 9  ;;  %v1203_v51 = vrot.slane %v1201_v37, 4  ;;  %v1204_v42 = vrot.slane %v3031_v38, 5  ;;  %vm547_vm15 = vmand %vm3082_vm5, %vm520_vm3 }
  0x75   : > { %2126 = vmatmul.msk.bf16.gmra.mxu1 %vm731_vm14, %v2968_v61  ;;  %v373_v10 = vmul.f32 %v2539_v14, %v339_v12  ;;  %v435_v27 = vmax.f32 %v405_v43, 0.0  ;;  %v436_v23 = vmax.f32 %v406_v39, 0.0  ;;  %v3089_v56 = vpack.c.b16 %v1034_v24, %v1033_v36 }
  0x76   : > { %2174 = vmatmul.msk.bf16.gmra.mxu3 %vm731_vm14, %v2679_v34  ;;  %v999_v7 = vor.u32 %v998_v45, %v995_v46  ;;  %v1009_v13 = vor.u32 %v1008_v48, %v1004_v47  ;;  %vm3469_vm6 = vcmp.ge.s32.totalorder %v2496_v5, 1  ;;  %v1202_v28 = vsel %vm2850_vm4, %v2137_v29, %v1201_v37  ;;  %v3137_v48 = vld [vmem:[%s3432_s4] ss:$0 sm:$0xff] }
  0x77   : > { %vm512_vm9 = vmand %vm3082_vm5, %vm3469_vm6  ;;  %v1205_v14 = vsel %vm2850_vm4, %v1203_v51, %v1204_v42  ;;  %v1012_v38 = vshll.u32 %v3071_v8, 16  ;;  %v407_v62 = vadd.f32 %v2559_v22, %v373_v10  ;;  %v636_v63 = vsel %vm3082_vm5, %v436_v23, 0.0 }
  0x78   : > { %v635_v9 = vsel %vm512_vm9, %v435_v27, 0.0  ;;  %v1230_v44 = vunpack.c.l.b16 %v1202_v28  ;;  %v1231_v0 = vunpack.c.l.b16 %v1205_v14  ;;  %v1000_v31 = vrot.slane %v999_v7, 4  ;;  %vm3472_vm11 = vmmov %vm3469_vm6 }
  0x79   : > { %v1010_v55 = vrot.slane %v1009_v13, 4  ;;  %v1014_v30 = vrot.slane %v1012_v38, 5  ;;  %v437_v6 = vmax.f32 %v407_v62, 0.0  ;;  %v3105_v3 = vpack.c.bf16 %v635_v9, %v635_v9 }
  0x7a   : > { %v3107_v21 = vpack.c.bf16 %v636_v63, %v636_v63  ;;  %v3113_v22 = vpack.c.b16 %v1231_v0, %v1230_v44  ;;  %v1005_v15 = vsel %vm2846_vm2, %v1000_v31, %v1004_v47  ;;  %v1208_v1 = vrot.slane %v2793_v58, 5 }
  0x7b   : > { %v1015_v25 = vsel %vm2846_vm2, %v1010_v55, %v1014_v30  ;;  %v637_v32 = vsel %vm547_vm15, %v437_v6, 0.0  ;;  %v1434_v35 = vshrl.u32 %v3105_v3, 16  ;;  %v1437_v37 = vshll.u32 %v3105_v3, 16 }
  0x7c   : > { %2194 = vmatmul.msk.bf16.gmra.mxu0 %vm731_vm14, %v3007_v52  ;;  %v1443_v12 = vshll.u32 %v3107_v21, 16  ;;  %v1447_v36 = vshrl.u32 %v3107_v21, 16  ;;  %v1035_v43 = vunpack.c.l.b16 %v1005_v15  ;;  %v1036_v39 = vunpack.c.l.b16 %v1015_v25 }
  0x7d   : > { %v2138_v58 = vrot.slane %v2791_v57, 9  ;;  %v1210_v46 = vrot.slane %v1208_v1, 4  ;;  %v1211_v45 = vrot.slane %v3071_v8, 5  ;;  %v3132_v47 = vpack.c.bf16 %v637_v32, %v637_v32 }
  0x7e   : > { %v1436_v29 = vrot.slane %v1434_v35, 4  ;;  %v1439_v51 = vrot.slane %v1437_v37, 5  ;;  %v1445_v42 = vrot.slane %v1443_v12, 5  ;;  %v1449_v41 = vrot.slane %v1447_v36, 4 }
  0x7f   : > { %v3144_v27 = vpack.c.b16 %v1036_v39, %v1035_v43  ;;  %v1209_v23 = vsel %vm2850_vm4, %v2138_v58, %v1208_v1  ;;  %v1212_v7 = vsel %vm2850_vm4, %v1210_v46, %v1211_v45  ;;  %v1453_v38 = vshll.u32 %v3132_v47, 16 }
  0x80   : > { %v1440_v28 = vor.u32 %v1439_v51, %v1436_v29  ;;  %v1450_v14 = vor.u32 %v1449_v41, %v1445_v42  ;;  %v1232_v9 = vunpack.c.l.b16 %v1209_v23  ;;  %v1233_v63 = vunpack.c.l.b16 %v1212_v7 }
  0x81   : > { %v1455_v55 = vrot.slane %v1453_v38, 5  ;;  %v1350_v6 = vunpack.c.l.b16 %v3105_v3  ;;  %v1351_v15 = vunpack.c.l.b16 %v3107_v21 }
  0x82   : > { %v1441_v0 = vrot.slane %v1440_v28, 4  ;;  %v1451_v31 = vrot.slane %v1450_v14, 4  ;;  %v3163_v1 = vpack.c.b16 %v1233_v63, %v1232_v9 }
  0x83   : > { %v3174_v43 = vpack.c.b16 %v1351_v15, %v1350_v6 }
  0x84   : > { %2155 = vmatmul.msk.bf16.gmra.mxu2 %vm731_vm14, %v3025_v40  ;;  %v1446_v37 = vsel %vm2846_vm2, %v1441_v0, %v1445_v42  ;;  %v1456_v12 = vsel %vm2846_vm2, %v1451_v31, %v1455_v55 }
  0x85   : > { %2127 = vmatmul.msk.bf16.gmra.mxu1 %vm731_vm14, %v3007_v52  ;;  %v1462_v39 = vunpack.c.l.b16 %v1446_v37  ;;  %v1463_v58 = vunpack.c.l.b16 %v1456_v12 }
  0x86   : > { %2175 = vmatmul.msk.bf16.gmra.mxu3 %vm731_vm14, %v2796_v60 }
  0x87   : > { %v3185_v51 = vpack.c.b16 %v1463_v58, %v1462_v39 }
  0x8c   : > { %2195 = vmatmul.msk.bf16.gmra.mxu0 %vm731_vm14, %v3048_v53 }
  0x94   : > { %2156 = vmatmul.msk.bf16.gmra.mxu2 %vm731_vm14, %v3056_v19 }
  0x95   : > { %2128 = vmatmul.msk.bf16.gmra.mxu1 %vm731_vm14, %v3048_v53 }
  0x96   : > { %2176 = vmatmul.msk.bf16.gmra.mxu3 %vm731_vm14, %v2700_v49 }
  0x9c   : > { %2196 = vmatmul.msk.bf16.gmra.mxu0 %vm731_vm14, %v3089_v56 }
  0xa0   : > { %v3115_v4 = vpop.f32.mrf.mxu1 }
  0xa4   : > { %v765_v24 = vpop.f32.mrf.mxu0  ;;  %2157 = vmatmul.msk.bf16.gmra.mxu2 %vm731_vm14, %v3113_v22 }
  0xa5   : > { %2129 = vmatmul.msk.bf16.gmra.mxu1 %vm731_vm14, %v3089_v56  ;;  %v805_v28 = vadd.f32 %v3137_v48, %v765_v24 }
  0xa6   : > { %2177 = vmatmul.msk.bf16.gmra.mxu3 %vm731_vm14, %v2821_v11 }
  0xa7   : > { %v785_v10 = vpop.f32.mrf.mxu2 }
  0xa8   : > { %v3142_v57 = vadd.f32 %v3137_v48, %v785_v10  ;;  %v3146_v8 = vpop.f32.mrf.mxu1 }
  0xa9   : > { %v795_v13 = vpop.f32.mrf.mxu3 }
  0xaa   : > { %v3154_v62 = vadd.f32 %v3137_v48, %v795_v13 }
  0xac   : > { %2197 = vmatmul.msk.bf16.gmra.mxu0 %vm731_vm14, %v3144_v27  ;;  %v767_v44 = vpop.f32.mrf.mxu0 }
  0xad   : > { %v806_v55 = vadd.f32 %v3137_v48, %v767_v44 }
  0xaf   : > { %v787_v30 = vpop.f32.mrf.mxu2 }
  0xb0   : > { %v3161_v25 = vadd.f32 %v3137_v48, %v787_v30  ;;  %v3165_v32 = vpop.f32.mrf.mxu1 }
  0xb1   : > { %v797_v35 = vpop.f32.mrf.mxu3 }
  0xb2   : > { %v3172_v36 = vadd.f32 %v3137_v48, %v797_v35 }
  0xb4   : > { %2158 = vmatmul.msk.bf16.gmra.mxu2 %vm731_vm14, %v3163_v1 }
  0xb5   : > { %2130 = vmatmul.msk.bf16.gmra.mxu1 %vm731_vm14, %v3144_v27 }
  0xb6   : > { %2178 = vmatmul.msk.bf16.gmra.mxu3 %vm731_vm14, %v3174_v43 }
  0xb7   : > { %v790_v46 = vpop.f32.mrf.mxu2  ;;  %v770_v45 = vpop.f32.mrf.mxu0 }
  0xb8   : > { %v3183_v29 = vadd.f32 %v3137_v48, %v790_v46  ;;  %v3187_v42 = vpop.f32.mrf.mxu1 }
  0xb9   : > { %v800_v41 = vpop.f32.mrf.mxu3 }
  0xba   : > { %v3190_v10 = vadd.f32 %v3137_v48, %v800_v41 }
  0xbc   : > { %2198 = vmatmul.msk.bf16.gmra.mxu0 %vm731_vm14, %v3185_v51 }
  0xbf   : > { %v792_v23 = vpop.f32.mrf.mxu2  ;;  %v772_v7 = vpop.f32.mrf.mxu0 }
  0xc0   : > { %v3195_v13 = vadd.f32 %v3137_v48, %v792_v23 }
  0xc1   : > { %v802_v14 = vpop.f32.mrf.mxu3 }
  0xc2   : > { %v1090_v38 = vpop.f32.mrf.mxu1  ;;  %v3199_v9 = vadd.f32 %v3137_v48, %v802_v14 }
  0xc3   : > { %v1130_v63 = vadd.f32 %v1090_v38, %v805_v28 }
  0xc4   : > { %2232 = vmatmul.msk.bf16.vlgmr.msra.gmra.mxu2 %vm731_vm14, %v2677_v33 }
  0xc5   : > { %2212 = vmatmul.msk.bf16.vlgmr.msra.gmra.mxu1 %vm731_vm14, %v2906_v26  ;;  %v807_v26 = vadd.f32 %v3137_v48, %v770_v45  ;;  %v808_v45 = vadd.f32 %v3137_v48, %v772_v7 }
  0xc6   : > { %2252 = vmatmul.msk.bf16.vlgmr.msra.gmra.mxu3 %vm731_vm14, %v2928_v59 }
  0xc7   : > { %v1287_v0 = vpop.f32.mrf.mxu2 }
  0xc8   : > { %v1327_v31 = vadd.f32 %v1287_v0, %v1130_v63 }
  0xc9   : > { %v1489_v24 = vpop.f32.mrf.mxu0  ;;  %v1377_v30 = vpop.f32.mrf.mxu3 }
  0xca   : > { %v1417_v6 = vadd.f32 %v1377_v30, %v1327_v31  ;;  %v1092_v15 = vpop.f32.mrf.mxu1 }
  0xcb   : > { %v1131_v35 = vadd.f32 %v1092_v15, %v806_v55 }
  0xcc   : > { %2273 = vmatmul.msk.bf16.vlgmr.msra.gmra.mxu0 %vm731_vm14, %v2945_v20  ;;  %v3210_v37 = vadd.f32 %v1489_v24, %v1417_v6  ;;  %v809_v24 = vadd.f32 %v3137_v48, %v3115_v4  ;;  %v810_v4 = vadd.f32 %v3137_v48, %v3146_v8 }
  0xcf   : > { %v1289_v33 = vpop.f32.mrf.mxu2 }
  0xd0   : > { %v1328_v12 = vadd.f32 %v1289_v33, %v1131_v35 }
  0xd1   : > { %v1491_v39 = vpop.f32.mrf.mxu0  ;;  %v1379_v59 = vpop.f32.mrf.mxu3 }
  0xd2   : > { %v1418_v58 = vadd.f32 %v1379_v59, %v1328_v12  ;;  %v1095_v46 = vpop.f32.mrf.mxu1 }
  0xd3   : > { %v1132_v41 = vadd.f32 %v1095_v46, %v807_v26 }
  0xd4   : > { %2233 = vmatmul.msk.bf16.gmra.mxu2 %vm731_vm14, %v2787_v54  ;;  %v3217_v44 = vadd.f32 %v1491_v39, %v1418_v58 }
  0xd5   : > { %2213 = vmatmul.msk.bf16.gmra.mxu1 %vm731_vm14, %v2945_v20 }
  0xd6   : > { %2253 = vmatmul.msk.bf16.gmra.mxu3 %vm731_vm14, %v2968_v61 }
  0xd7   : > { %v1292_v23 = vpop.f32.mrf.mxu2 }
  0xd8   : > { %v1329_v28 = vadd.f32 %v1292_v23, %v1132_v41 }
  0xd9   : > { %v1494_v14 = vpop.f32.mrf.mxu0  ;;  %v1382_v38 = vpop.f32.mrf.mxu3 }
  0xda   : > { %v1419_v63 = vadd.f32 %v1382_v38, %v1329_v28  ;;  %v1097_v0 = vpop.f32.mrf.mxu1 }
  0xdb   : > { %v1133_v31 = vadd.f32 %v1097_v0, %v808_v45 }
  0xdc   : > { %2274 = vmatmul.msk.bf16.gmra.mxu0 %vm731_vm14, %v2987_v16  ;;  %v3224_v54 = vadd.f32 %v1494_v14, %v1419_v63 }
  0xdf   : > { %v1294_v20 = vpop.f32.mrf.mxu2 }
  0xe0   : > { %v1330_v55 = vadd.f32 %v1294_v20, %v1133_v31 }
  0xe1   : > { %v1496_v61 = vpop.f32.mrf.mxu0  ;;  %v1384_v30 = vpop.f32.mrf.mxu3 }
  0xe2   : > { %v1420_v6 = vadd.f32 %v1384_v30, %v1330_v55  ;;  %v1100_v15 = vpop.f32.mrf.mxu1 }
  0xe3   : > { %v1134_v7 = vadd.f32 %v1100_v15, %v809_v24  ;;  %v310_v15 = vld [vmem:[%s2536_s8 + $0x6c] sm:$0xff]  }
  0xe4   : > { %2234 = vmatmul.msk.bf16.gmra.mxu2 %vm731_vm14, %v2679_v34  ;;  %v3232_v35 = vadd.f32 %v1496_v61, %v1420_v6 }
  0xe5   : > { %2214 = vmatmul.msk.bf16.gmra.mxu1 %vm731_vm14, %v2987_v16 }
  0xe6   : > { %2254 = vmatmul.msk.bf16.gmra.mxu3 %vm731_vm14, %v3007_v52  ;;  %v811_v52 = vadd.f32 %v3137_v48, %v3165_v32  ;;  %v812_v32 = vadd.f32 %v3137_v48, %v3187_v42  ;;  %v341_v48 = vunpack.c.h.bf16 %v310_v15 }
  0xe7   : > { %v1297_v33 = vpop.f32.mrf.mxu2 }
  0xe8   : > { %v1331_v12 = vadd.f32 %v1297_v33, %v1134_v7 }
  0xe9   : > { %v1499_v26 = vpop.f32.mrf.mxu0  ;;  %v1387_v39 = vpop.f32.mrf.mxu3 }
  0xea   : > { %v1421_v59 = vadd.f32 %v1387_v39, %v1331_v12  ;;  %v1102_v58 = vpop.f32.mrf.mxu1  ;;  %v340_v12 = vunpack.c.l.bf16 %v310_v15  ;;  %v2376_v39 = vld [vmem:[%s2504_s9] ss:$0 sm:$0xff]  ;;  %s2089_s9 = sshll.u32 %s3486_s27, 1 }
  0xeb   : > { %v1135_v46 = vadd.f32 %v1102_v58, %v810_v4 }
  0xec   : > { %2275 = vmatmul.msk.bf16.gmra.mxu0 %vm731_vm14, %v3025_v40  ;;  %v3240_v34 = vadd.f32 %v1499_v26, %v1421_v59  ;;  %v375_v59 = vmul.f32 %v2376_v39, %v341_v48 }
  0xef   : > { %v1299_v16 = vpop.f32.mrf.mxu2 }
  0xf0   : > { %v1332_v41 = vadd.f32 %v1299_v16, %v1135_v46  ;;  %v450_v46 = vadd.s32 9, %v2487_v2  ;;  %v312_v16 = vld [vmem:[%s2536_s8 + $0x74] sm:$0x1] }
  0xf1   : > { %v1501_v23 = vpop.f32.mrf.mxu0  ;;  %v1389_v28 = vpop.f32.mrf.mxu3 }
  0xf2   : > { %v1422_v45 = vadd.f32 %v1389_v28, %v1332_v41  ;;  %v1105_v14 = vpop.f32.mrf.mxu1  ;;  %v2377_v28 = vld [vmem:[%s2517_s16] ss:$0 sm:$0xff]  ;;  %vm464_vm13 = vcmp.ge.s32.totalorder %v450_v46, 1  ;;  %vm474_vm10 = vcmp.lt.s32.totalorder %v450_v46, 17  ;;  %s2090_s16 = sshll.u32 %s3484_s19, 5 }
  0xf3   : > { %v1136_v8 = vadd.f32 %v1105_v14, %v811_v52  ;;  %v342_v14 = vunpack.c.l.bf16 %v312_v16  ;;  %vm3277_vm7 = vmand %vm464_vm13, %vm474_vm10  ;;  %s274_s8 = sadd.s32 %s2090_s16, %s2089_s9 }
  0xf4   : > { %2235 = vmatmul.msk.bf16.gmra.mxu2 %vm731_vm14, %v2796_v60  ;;  %v3248_v38 = vadd.f32 %v1501_v23, %v1422_v45  ;;  %vm515_vm8 = vmand %vm3277_vm7, %vm3472_vm11  ;;  %s2091_s26 = sshll.u32 %s274_s8, 2 }
  0xf5   : > { %2215 = vmatmul.msk.bf16.gmra.mxu1 %vm731_vm14, %v3025_v40  ;;  %vm550_vm12 = vmand %vm3277_vm7, %vm520_vm3  ;;  %s3364_s7 = scalar_lea.vmem %s3433_s5, %s2091_s26 }
  0xf6   : > { %2255 = vmatmul.msk.bf16.gmra.mxu3 %vm731_vm14, %v3048_v53 }
  0xf7   : > { %v1302_v63 = vpop.f32.mrf.mxu2 }
  0xf8   : > { %v1333_v0 = vadd.f32 %v1302_v63, %v1136_v8 }
  0xf9   : > { %v1504_v31 = vpop.f32.mrf.mxu0  ;;  %v1392_v20 = vpop.f32.mrf.mxu3 }
  0xfa   : > { %v1423_v55 = vadd.f32 %v1392_v20, %v1333_v0  ;;  %v1107_v24 = vpop.f32.mrf.mxu1 }
  0xfb   : > { %v1137_v61 = vadd.f32 %v1107_v24, %v812_v32 }
  0xfc   : > { %2276 = vmatmul.msk.bf16.gmra.mxu0 %vm731_vm14, %v3056_v19  ;;  %v3256_v60 = vadd.f32 %v1504_v31, %v1423_v55  ;;  %v376_v31 = vmul.f32 %v2376_v39, %v342_v14 }
  0xff   : > { %v1304_v40 = vpop.f32.mrf.mxu2 }
 0x100   : > { %v1334_v30 = vadd.f32 %v1304_v40, %v1137_v61 }
 0x101   : > { %v1506_v6 = vpop.f32.mrf.mxu0  ;;  %v1394_v53 = vpop.f32.mrf.mxu3 }
 0x102   : > { %v1424_v7 = vadd.f32 %v1394_v53, %v1334_v30  ;;  %v1110_v33 = vpop.f32.mrf.mxu1 }
 0x103   : > { %v1138_v42 = vadd.f32 %v1110_v33, %v3142_v57  ;;  %v374_v57 = vmul.f32 %v2376_v39, %v340_v12 }
 0x104   : > { %2236 = vmatmul.msk.bf16.gmra.mxu2 %vm731_vm14, %v2700_v49  ;;  %v3264_v4 = vadd.f32 %v1506_v6, %v1424_v7  ;;  %v410_v6 = vadd.f32 %v2377_v28, %v376_v31 }
 0x105   : > { %2216 = vmatmul.msk.bf16.gmra.mxu1 %vm731_vm14, %v3056_v19  ;;  %v409_v19 = vadd.f32 %v2377_v28, %v375_v59 }
 0x106   : > { %2256 = vmatmul.msk.bf16.gmra.mxu3 %vm731_vm14, %v3089_v56  ;;  %v408_v56 = vadd.f32 %v2377_v28, %v374_v57 }
 0x107   : > { %v1307_v26 = vpop.f32.mrf.mxu2  ;;  %v439_v32 = vmax.f32 %v409_v19, 0.0 }
 0x108   : > { %v1335_v58 = vadd.f32 %v1307_v26, %v1138_v42  ;;  %v438_v20 = vmax.f32 %v408_v56, 0.0  ;;  %v1548_v42 = vrot.slane %v3107_v21, 5  ;;  %v2199_v21 = vrot.slane %v3105_v3, 9 }
 0x109   : > { %v1509_v41 = vpop.f32.mrf.mxu0  ;;  %v1397_v49 = vpop.f32.mrf.mxu3  ;;  %v639_v30 = vsel %vm3277_vm7, %v439_v32, 0.0 }
 0x10a   : > { %v1425_v52 = vadd.f32 %v1397_v49, %v1335_v58  ;;  %v1112_v23 = vpop.f32.mrf.mxu1  ;;  %v638_v53 = vsel %vm515_vm8, %v438_v20, 0.0  ;;  %v3296_v7 = vpack.c.bf16 %v639_v30, %v639_v30  ;;  %v1550_v16 = vrot.slane %v1548_v42, 4 }
 0x10b   : > { %v1139_v45 = vadd.f32 %v1112_v23, %v3161_v25  ;;  %v3298_v33 = vpack.c.bf16 %v638_v53, %v638_v53 }
 0x10c   : > { %2277 = vmatmul.msk.bf16.gmra.mxu0 %vm731_vm14, %v3113_v22  ;;  %v3275_v8 = vadd.f32 %v1509_v41, %v1425_v52  ;;  %v1745_v39 = vshrl.u32 %v3296_v7, 16  ;;  %v1551_v41 = vrot.slane %v3132_v47, 5 }
 0x10d   : > { %v1732_v46 = vshrl.u32 %v3298_v33, 16  ;;  %v1735_v18 = vshll.u32 %v3298_v33, 16 }
 0x10e   : > { %v1552_v63 = vsel %vm2850_vm4, %v1550_v16, %v1551_v41 }
 0x10f   : > { %v1309_v2 = vpop.f32.mrf.mxu2  ;;  %v1737_v19 = vrot.slane %v1735_v18, 5 }
 0x110   : > { %v1336_v0 = vadd.f32 %v1309_v2, %v1139_v45  ;;  %v1747_v45 = vrot.slane %v1745_v39, 4  ;;  %v1549_v2 = vsel %vm2850_vm4, %v2199_v21, %v1548_v42  ;;  %v1649_v42 = vunpack.c.l.b16 %v3296_v7 }
 0x111   : > { %v1511_v55 = vpop.f32.mrf.mxu0  ;;  %v1399_v25 = vpop.f32.mrf.mxu3 }
 0x112   : > { %v1426_v24 = vadd.f32 %v1399_v25, %v1336_v0  ;;  %v1115_v61 = vpop.f32.mrf.mxu1  ;;  %v1559_v25 = vunpack.c.l.b16 %v1552_v63 }
 0x113   : > { %v1140_v40 = vadd.f32 %v1115_v61, %v3183_v29 }
 0x114   : > { %2237 = vmatmul.msk.bf16.gmra.mxu2 %vm731_vm14, %v2821_v11  ;;  %v3292_v15 = vadd.f32 %v1511_v55, %v1426_v24  ;;  %v440_v11 = vmax.f32 %v410_v6, 0.0  ;;  %v1558_v55 = vunpack.c.l.b16 %v1549_v2 }
 0x115   : > { %2217 = vmatmul.msk.bf16.gmra.mxu1 %vm731_vm14, %v3113_v22 }
 0x116   : > { %2257 = vmatmul.msk.bf16.gmra.mxu3 %vm731_vm14, %v3144_v27  ;;  %v1741_v27 = vshll.u32 %v3296_v7, 16  ;;  %v640_v58 = vsel %vm550_vm12, %v440_v11, 0.0  ;;  %v1560_v53 = vpack.c.b16 %v1559_v25, %v1558_v55 }
 0x117   : > { %v1312_v5 = vpop.f32.mrf.mxu2  ;;  %v670_v52 = vpack.c.bf16 %v640_v58, %v640_v58 }
 0x118   : > { %v1337_v29 = vadd.f32 %v1312_v5, %v1140_v40  ;;  %v1743_v23 = vrot.slane %v1741_v27, 5  ;;  %v2260_v27 = vrot.slane %v3298_v33, 9 }
 0x119   : > { %v1514_v48 = vpop.f32.mrf.mxu0  ;;  %v1402_v22 = vpop.f32.mrf.mxu3  ;;  %v1751_v20 = vshll.u32 %v670_v52, 16 }
 0x11a   : > { %v1427_v12 = vadd.f32 %v1402_v22, %v1337_v29  ;;  %v1117_v26 = vpop.f32.mrf.mxu1  ;;  %v1748_v31 = vor.u32 %v1747_v45, %v1743_v23  ;;  %v1846_v29 = vrot.slane %v3296_v7, 5 }
 0x11b   : > { %v1141_v59 = vadd.f32 %v1117_v26, %v3195_v13  ;;  %v1734_v13 = vrot.slane %v1732_v46, 4  ;;  %v1753_v6 = vrot.slane %v1751_v20, 5 }
 0x11c   : > { %2278 = vmatmul.msk.bf16.gmra.mxu0 %vm731_vm14, %v3163_v1  ;;  %v3312_v57 = vadd.f32 %v1514_v48, %v1427_v12  ;;  %v1848_v39 = vrot.slane %v1846_v29, 4  ;;  %v1847_v41 = vsel %vm2850_vm4, %v2260_v27, %v1846_v29 }
 0x11d   : > { %v1738_v47 = vor.u32 %v1737_v19, %v1734_v13 }
 0x11f   : > { %v1314_v49 = vpop.f32.mrf.mxu2  ;;  %v1739_v30 = vrot.slane %v1738_v47, 4 }
 0x120   : > { %v1338_v28 = vadd.f32 %v1314_v49, %v1141_v59  ;;  %v1849_v59 = vrot.slane %v670_v52, 5  ;;  %v1856_v52 = vunpack.c.l.b16 %v1847_v41 }
 0x121   : > { %v1516_v14 = vpop.f32.mrf.mxu0  ;;  %v1404_v56 = vpop.f32.mrf.mxu3 }
 0x122   : > { %v1428_v0 = vadd.f32 %v1404_v56, %v1338_v28  ;;  %v1120_v3 = vpop.f32.mrf.mxu1  ;;  %v1850_v17 = vsel %vm2850_vm4, %v1848_v39, %v1849_v59  ;;  %vm1955_vm4 = vcmask 257024  }
 0x123   : > { %v1142_v32 = vadd.f32 %v1120_v3, %v3154_v62  ;;  %v1749_v62 = vrot.slane %v1748_v31, 4  ;;  %v1857_v13 = vunpack.c.l.b16 %v1850_v17 }
 0x124   : > { %2238 = vmatmul.msk.bf16.gmra.mxu2 %vm731_vm14, %v3174_v43  ;;  %v3325_v24 = vadd.f32 %v1516_v14, %v1428_v0 }
 0x125   : > { %2218 = vmatmul.msk.bf16.gmra.mxu1 %vm731_vm14, %v3163_v1  ;;  %v1648_v1 = vunpack.c.l.b16 %v3298_v33  ;;  %v1754_v12 = vsel %vm2846_vm2, %v1749_v62, %v1753_v6  ;;  %v1858_v14 = vpack.c.b16 %v1857_v13, %v1856_v52 }
 0x126   : > { %2258 = vmatmul.msk.bf16.gmra.mxu3 %vm731_vm14, %v3185_v51  ;;  %v1744_v51 = vsel %vm2846_vm2, %v1739_v30, %v1743_v23  ;;  %v1761_v18 = vunpack.c.l.b16 %v1754_v12 }
 0x127   : > { %v1317_v61 = vpop.f32.mrf.mxu2  ;;  %v1760_v46 = vunpack.c.l.b16 %v1744_v51  ;;  %v1650_v21 = vpack.c.b16 %v1649_v42, %v1648_v1 }
 0x128   : > { %v1339_v40 = vadd.f32 %v1317_v61, %v1142_v32 }
 0x129   : > { %v1519_v43 = vpop.f32.mrf.mxu0  ;;  %v1407_v5 = vpop.f32.mrf.mxu3  ;;  %v1762_v28 = vpack.c.b16 %v1761_v18, %v1760_v46 }
 0x12a   : > { %v1429_v11 = vadd.f32 %v1407_v5, %v1339_v40  ;;  %v1122_v48 = vpop.f32.mrf.mxu1 }
 0x12b   : > { %v1143_v22 = vadd.f32 %v1122_v48, %v3172_v36 }
 0x12c   : > { %2279 = vmatmul.msk.bf16.gmra.mxu0 %vm731_vm14, %v1560_v53  ;;  %v3338_v26 = vadd.f32 %v1519_v43, %v1429_v11 }
 0x12f   : > { %v1319_v58 = vpop.f32.mrf.mxu2 }
 0x130   : > { %v1340_v36 = vadd.f32 %v1319_v58, %v1143_v22 }
 0x131   : > { %v1521_v7 = vpop.f32.mrf.mxu0  ;;  %v1409_v16 = vpop.f32.mrf.mxu3 }
 0x132   : > { %v1430_v49 = vadd.f32 %v1409_v16, %v1340_v36  ;;  %v1125_v23 = vpop.f32.mrf.mxu1 }
 0x133   : > { %v1144_v33 = vadd.f32 %v1125_v23, %v3190_v10 }
 0x134   : > { %2239 = vmatmul.msk.bf16.gmra.mxu2 %vm731_vm14, %v1650_v21  ;;  %v3348_v19 = vadd.f32 %v1521_v7, %v1430_v49 }
 0x135   : > { %2219 = vmatmul.msk.bf16.gmra.mxu1 %vm731_vm14, %v1560_v53 }
 0x136   : > { %2259 = vmatmul.msk.bf16.gmra.mxu3 %vm731_vm14, %v1762_v28 }
 0x137   : > { %v1322_v45 = vpop.f32.mrf.mxu2 }
 0x138   : > { %v1341_v50 = vadd.f32 %v1322_v45, %v1144_v33 }
 0x139   : > { %v1524_v56 = vpop.f32.mrf.mxu0  ;;  %v1412_v2 = vpop.f32.mrf.mxu3 }
 0x13a   : > { %v1431_v63 = vadd.f32 %v1412_v2, %v1341_v50  ;;  %v1127_v10 = vpop.f32.mrf.mxu1 }
 0x13b   : > { %v1145_v0 = vadd.f32 %v1127_v10, %v3199_v9 }
 0x13c   : > { %2280 = vmatmul.msk.bf16.gmra.mxu0 %vm731_vm14, %v1858_v14  ;;  %v3354_v3 = vadd.f32 %v1524_v56, %v1431_v63 }
 0x13f   : > { %v1324_v32 = vpop.f32.mrf.mxu2 }
 0x140   : > { %v1342_v47 = vadd.f32 %v1324_v32, %v1145_v0 }
 0x141   : > { %v1526_v31 = vpop.f32.mrf.mxu0  ;;  %v1414_v20 = vpop.f32.mrf.mxu3 }
 0x142   : > { %v1432_v55 = vadd.f32 %v1414_v20, %v1342_v47  ;;  %v1585_v25 = vpop.f32.mrf.mxu1 }
 0x143   : > { %v1625_v40 = vadd.f32 %v1585_v25, %v3210_v37 }
 0x144   : > { %v3358_v61 = vadd.f32 %v1526_v31, %v1432_v55 }
 0x147   : > { %v1675_v30 = vpop.f32.mrf.mxu2 }
 0x148   : > { %v1715_v9 = vadd.f32 %v1675_v30, %v1625_v40 }
 0x149   : > { %v1883_v62 = vpop.f32.mrf.mxu0  ;;  %v1787_v6 = vpop.f32.mrf.mxu3 }
 0x14a   : > { %v1827_v53 = vadd.f32 %v1787_v6, %v1715_v9  ;;  %v1587_v43 = vpop.f32.mrf.mxu1 }
 0x14b   : > { %v1626_v29 = vadd.f32 %v1587_v43, %v3217_v44 }
 0x14c   : > { %v1923_v5 = vadd.f32 %v1883_v62, %v1827_v53 }
 0x14e   : > { %v1939_v37 = vpack.c.bf16 %v1923_v5, %v1923_v5 }
 0x14f   : > { %v1677_v11 = vpop.f32.mrf.mxu2 }
 0x150   : > { %v1716_v48 = vadd.f32 %v1677_v11, %v1626_v29  ;;  %1956 = vst.msk [vmem:[%s3364_s7] sm:$0xf] %vm1955_vm4, %v1939_v37 }
 0x151   : > { %v1885_v1 = vpop.f32.mrf.mxu0  ;;  %v1789_v22 = vpop.f32.mrf.mxu3 }
 0x152   : > { %v1828_v42 = vadd.f32 %v1789_v22, %v1716_v48  ;;  %v1590_v51 = vpop.f32.mrf.mxu1 }
 0x153   : > { %v1627_v27 = vadd.f32 %v1590_v51, %v3224_v54 }
 0x154   : > { %v1924_v12 = vadd.f32 %v1885_v1, %v1828_v42 }
 0x156   : > { %v1940_v39 = vpack.c.bf16 %v1924_v12, %v1924_v12 }
 0x157   : > { %v1680_v59 = vpop.f32.mrf.mxu2 }
 0x158   : > { %v1717_v58 = vadd.f32 %v1680_v59, %v1627_v27  ;;  %1957 = vst.msk [vmem:[%s3364_s7 + $0x4] sm:$0xf] %vm1955_vm4, %v1940_v39 }
 0x159   : > { %v1888_v46 = vpop.f32.mrf.mxu0  ;;  %v1792_v44 = vpop.f32.mrf.mxu3 }
 0x15a   : > { %v1829_v18 = vadd.f32 %v1792_v44, %v1717_v58  ;;  %v1592_v36 = vpop.f32.mrf.mxu1 }
 0x15b   : > { %v1628_v7 = vadd.f32 %v1592_v36, %v3232_v35 }
 0x15c   : > { %v1925_v21 = vadd.f32 %v1888_v46, %v1829_v18 }
 0x15e   : > { %v1941_v16 = vpack.c.bf16 %v1925_v21, %v1925_v21 }
 0x15f   : > { %v1682_v41 = vpop.f32.mrf.mxu2 }
 0x160   : > { %v1718_v17 = vadd.f32 %v1682_v41, %v1628_v7  ;;  %1958 = vst.msk [vmem:[%s3364_s7 + $0x8] sm:$0xf] %vm1955_vm4, %v1941_v16 }
 0x161   : > { %v1890_v49 = vpop.f32.mrf.mxu0  ;;  %v1794_v54 = vpop.f32.mrf.mxu3 }
 0x162   : > { %v1830_v23 = vadd.f32 %v1794_v54, %v1718_v17  ;;  %v1595_v28 = vpop.f32.mrf.mxu1 }
 0x163   : > { %v1629_v52 = vadd.f32 %v1595_v28, %v3240_v34 }
 0x164   : > { %v1926_v33 = vadd.f32 %v1890_v49, %v1830_v23 }
 0x166   : > { %v1942_v13 = vpack.c.bf16 %v1926_v33, %v1926_v33 }
 0x167   : > { %v1685_v45 = vpop.f32.mrf.mxu2 }
 0x168   : > { %v1719_v50 = vadd.f32 %v1685_v45, %v1629_v52  ;;  %1959 = vst.msk [vmem:[%s3364_s7 + $0xc] sm:$0xf] %vm1955_vm4, %v1942_v13 }
 0x169   : > { %v1893_v14 = vpop.f32.mrf.mxu0  ;;  %v1797_v35 = vpop.f32.mrf.mxu3 }
 0x16a   : > { %v1831_v56 = vadd.f32 %v1797_v35, %v1719_v50  ;;  %v1597_v2 = vpop.f32.mrf.mxu1 }
 0x16b   : > { %v1630_v10 = vadd.f32 %v1597_v2, %v3248_v38 }
 0x16c   : > { %v1927_v63 = vadd.f32 %v1893_v14, %v1831_v56 }
 0x16e   : > { %v1943_v0 = vpack.c.bf16 %v1927_v63, %v1927_v63 }
 0x16f   : > { %v1687_v32 = vpop.f32.mrf.mxu2 }
 0x170   : > { %v1720_v47 = vadd.f32 %v1687_v32, %v1630_v10  ;;  %1960 = vst.msk [vmem:[%s3364_s7 + $0x10] sm:$0xf] %vm1955_vm4, %v1943_v0 }
 0x171   : > { %v1895_v31 = vpop.f32.mrf.mxu0  ;;  %v1799_v34 = vpop.f32.mrf.mxu3 }
 0x172   : > { %v1832_v20 = vadd.f32 %v1799_v34, %v1720_v47  ;;  %v1600_v55 = vpop.f32.mrf.mxu1 }
 0x173   : > { %v1631_v40 = vadd.f32 %v1600_v55, %v3256_v60 }
 0x174   : > { %v1928_v25 = vadd.f32 %v1895_v31, %v1832_v20 }
 0x176   : > { %v1944_v30 = vpack.c.bf16 %v1928_v25, %v1928_v25 }
 0x177   : > { %v1690_v9 = vpop.f32.mrf.mxu2 }
 0x178   : > { %v1721_v62 = vadd.f32 %v1690_v9, %v1631_v40  ;;  %1961 = vst.msk [vmem:[%s3364_s7 + $0x14] sm:$0xf] %vm1955_vm4, %v1944_v30 }
 0x179   : > { %v1898_v6 = vpop.f32.mrf.mxu0  ;;  %v1802_v38 = vpop.f32.mrf.mxu3 }
 0x17a   : > { %v1833_v53 = vadd.f32 %v1802_v38, %v1721_v62  ;;  %v1602_v43 = vpop.f32.mrf.mxu1 }
 0x17b   : > { %v1632_v29 = vadd.f32 %v1602_v43, %v3264_v4 }
 0x17c   : > { %v1929_v5 = vadd.f32 %v1898_v6, %v1833_v53 }
 0x17e   : > { %v1945_v37 = vpack.c.bf16 %v1929_v5, %v1929_v5 }
 0x17f   : > { %v1692_v11 = vpop.f32.mrf.mxu2 }
 0x180   : > { %v1722_v48 = vadd.f32 %v1692_v11, %v1632_v29  ;;  %1962 = vst.msk [vmem:[%s3364_s7 + $0x18] sm:$0xf] %vm1955_vm4, %v1945_v37 }
 0x181   : > { %v1900_v1 = vpop.f32.mrf.mxu0  ;;  %v1804_v60 = vpop.f32.mrf.mxu3 }
 0x182   : > { %v1834_v22 = vadd.f32 %v1804_v60, %v1722_v48  ;;  %v1605_v42 = vpop.f32.mrf.mxu1 }
 0x183   : > { %v1633_v12 = vadd.f32 %v1605_v42, %v3275_v8 }
 0x184   : > { %v1930_v51 = vadd.f32 %v1900_v1, %v1834_v22 }
 0x186   : > { %v1946_v27 = vpack.c.bf16 %v1930_v51, %v1930_v51 }
 0x187   : > { %v1695_v39 = vpop.f32.mrf.mxu2 }
 0x188   : > { %v1723_v59 = vadd.f32 %v1695_v39, %v1633_v12  ;;  %1963 = vst.msk [vmem:[%s3364_s7 + $0x1c] sm:$0xf] %vm1955_vm4, %v1946_v27 }
 0x189   : > { %v1903_v58 = vpop.f32.mrf.mxu0  ;;  %v1807_v4 = vpop.f32.mrf.mxu3 }
 0x18a   : > { %v1835_v46 = vadd.f32 %v1807_v4, %v1723_v59  ;;  %v1607_v44 = vpop.f32.mrf.mxu1 }
 0x18b   : > { %v1634_v36 = vadd.f32 %v1607_v44, %v3292_v15 }
 0x18c   : > { %v1931_v18 = vadd.f32 %v1903_v58, %v1835_v46 }
 0x18e   : > { %v1947_v21 = vpack.c.bf16 %v1931_v18, %v1931_v18 }
 0x18f   : > { %v1697_v7 = vpop.f32.mrf.mxu2 }
 0x190   : > { %v1724_v16 = vadd.f32 %v1697_v7, %v1634_v36  ;;  %1964 = vst.msk [vmem:[%s3364_s7 + $0x20] sm:$0xf] %vm1955_vm4, %v1947_v21 }
 0x191   : > { %v1905_v41 = vpop.f32.mrf.mxu0  ;;  %v1809_v8 = vpop.f32.mrf.mxu3 }
 0x192   : > { %v1836_v17 = vadd.f32 %v1809_v8, %v1724_v16  ;;  %v1610_v49 = vpop.f32.mrf.mxu1 }
 0x193   : > { %v1635_v23 = vadd.f32 %v1610_v49, %v3312_v57 }
 0x194   : > { %v1932_v54 = vadd.f32 %v1905_v41, %v1836_v17 }
 0x196   : > { %v1948_v28 = vpack.c.bf16 %v1932_v54, %v1932_v54 }
 0x197   : > { %v1700_v33 = vpop.f32.mrf.mxu2 }
 0x198   : > { %v1725_v52 = vadd.f32 %v1700_v33, %v1635_v23  ;;  %1965 = vst.msk [vmem:[%s3364_s7 + $0x24] sm:$0xf] %vm1955_vm4, %v1948_v28 }
 0x199   : > { %v1908_v13 = vpop.f32.mrf.mxu0  ;;  %v1812_v15 = vpop.f32.mrf.mxu3 }
 0x19a   : > { %v1837_v45 = vadd.f32 %v1812_v15, %v1725_v52  ;;  %v1612_v50 = vpop.f32.mrf.mxu1 }
 0x19b   : > { %v1636_v35 = vadd.f32 %v1612_v50, %v3325_v24 }
 0x19c   : > { %v1933_v14 = vadd.f32 %v1908_v13, %v1837_v45 }
 0x19e   : > { %v1949_v56 = vpack.c.bf16 %v1933_v14, %v1933_v14 }
 0x19f   : > { %v1702_v2 = vpop.f32.mrf.mxu2 }
 0x1a0   : > { %v1726_v63 = vadd.f32 %v1702_v2, %v1636_v35  ;;  %1966 = vst.msk [vmem:[%s3364_s7 + $0x28] sm:$0xf] %vm1955_vm4, %v1949_v56 }
 0x1a1   : > { %v1910_v10 = vpop.f32.mrf.mxu0  ;;  %v1814_v57 = vpop.f32.mrf.mxu3 }
 0x1a2   : > { %v1838_v0 = vadd.f32 %v1814_v57, %v1726_v63  ;;  %v1615_v32 = vpop.f32.mrf.mxu1 }
 0x1a3   : > { %v1637_v31 = vadd.f32 %v1615_v32, %v3338_v26 }
 0x1a4   : > { %v1934_v47 = vadd.f32 %v1910_v10, %v1838_v0 }
 0x1a6   : > { %v1950_v34 = vpack.c.bf16 %v1934_v47, %v1934_v47 }
 0x1a7   : > { %v1705_v20 = vpop.f32.mrf.mxu2 }
 0x1a8   : > { %v1727_v55 = vadd.f32 %v1705_v20, %v1637_v31  ;;  %1967 = vst.msk [vmem:[%s3364_s7 + $0x2c] sm:$0xf] %vm1955_vm4, %v1950_v34 }
 0x1a9   : > { %v1913_v25 = vpop.f32.mrf.mxu0  ;;  %v1817_v24 = vpop.f32.mrf.mxu3 }
 0x1aa   : > { %v1839_v40 = vadd.f32 %v1817_v24, %v1727_v55  ;;  %v1617_v30 = vpop.f32.mrf.mxu1 }
 0x1ab   : > { %v1638_v62 = vadd.f32 %v1617_v30, %v3348_v19 }
 0x1ac   : > { %v1935_v9 = vadd.f32 %v1913_v25, %v1839_v40 }
 0x1ae   : > { %v1951_v6 = vpack.c.bf16 %v1935_v9, %v1935_v9 }
 0x1af   : > { %v1707_v38 = vpop.f32.mrf.mxu2 }
 0x1b0   : > { %v1728_v53 = vadd.f32 %v1707_v38, %v1638_v62  ;;  %1968 = vst.msk [vmem:[%s3364_s7 + $0x30] sm:$0xf] %vm1955_vm4, %v1951_v6 }
 0x1b1   : > { %v1915_v43 = vpop.f32.mrf.mxu0  ;;  %v1819_v26 = vpop.f32.mrf.mxu3 }
 0x1b2   : > { %v1840_v5 = vadd.f32 %v1819_v26, %v1728_v53  ;;  %v1620_v29 = vpop.f32.mrf.mxu1 }
 0x1b3   : > { %v1639_v11 = vadd.f32 %v1620_v29, %v3354_v3 }
 0x1b4   : > { %v1936_v37 = vadd.f32 %v1915_v43, %v1840_v5 }
 0x1b6   : > { %v1952_v48 = vpack.c.bf16 %v1936_v37, %v1936_v37 }
 0x1b7   : > { %v1710_v1 = vpop.f32.mrf.mxu2 }
 0x1b8   : > { %v1729_v60 = vadd.f32 %v1710_v1, %v1639_v11  ;;  %1969 = vst.msk [vmem:[%s3364_s7 + $0x34] sm:$0xf] %vm1955_vm4, %v1952_v48 }
 0x1b9   : > { %v1918_v19 = vpop.f32.mrf.mxu0  ;;  %v1822_v22 = vpop.f32.mrf.mxu3 }
 0x1ba   : > { %v1841_v42 = vadd.f32 %v1822_v22, %v1729_v60  ;;  %v1622_v51 = vpop.f32.mrf.mxu1 }
 0x1bb   : > { %v1640_v27 = vadd.f32 %v1622_v51, %v3358_v61 }
 0x1bc   : > { %v1937_v12 = vadd.f32 %v1918_v19, %v1841_v42 }
 0x1be   : > { %v1953_v39 = vpack.c.bf16 %v1937_v12, %v1937_v12 }
 0x1bf   : > { %v1712_v59 = vpop.f32.mrf.mxu2 }
 0x1c0   : > { %v1730_v58 = vadd.f32 %v1712_v59, %v1640_v27  ;;  %1970 = vst.msk [vmem:[%s3364_s7 + $0x38] sm:$0xf] %vm1955_vm4, %v1953_v39 }
 0x1c1   : > { %v1824_v4 = vpop.f32.mrf.mxu3  ;;  %v1920_v46 = vpop.f32.mrf.mxu0 }
 0x1c2   : > { %v1842_v3 = vadd.f32 %v1824_v4, %v1730_v58 }
 0x1c4   : > { %v1938_v44 = vadd.f32 %v1920_v46, %v1842_v3 }
 0x1c6   : > { %v1954_v18 = vpack.c.bf16 %v1938_v44, %v1938_v44 }
 0x1c8   : > { %1971 = vst.msk [vmem:[%s3364_s7 + $0x3c] sm:$0xf] %vm1955_vm4, %v1954_v18 }
 0x1c9 PF: > { %s15_s22 = sadd.s32 1, %s2416_s22   ;;  %s3473_s18 = smov %s2408_s20 }
 0x1ca   : > { %p12_p7 = scmp.ge.s32.totalorder %s15_s22, 6   ;;  %s3474_s19 = smov %s2412_s21 }
 0x1cb   : > { %s3475_s20 = smov %s3478_s23  ;;  %s3476_s21 = smov %s3482_s24 }
 0x1cc   :  { %14 = sbr.rel (!%p12_p7) target bundleno = 3 (0x3), region = 85 }

// kernel: res_block_2d_forward.7
= control target key start
LH: loop header
LB: loop body
LE: loop exit
PB: predicated region body
PF: predicated region fallthrough
CT: control target
= control target key end

     0   :  { %11 = vsyncpa [#allocation3], 0  ;;  %s3719_s0 = inlined_call_operand.vmem [shape: bf16[2,18,18,32], index: 0, kind: input, shape index: {}]   ;;  %s3720_s1 = inlined_call_operand.vmem [shape: f32[2,1,32], index: 1, kind: input, shape index: {}]   ;;  %s3721_s2 = inlined_call_operand.vmem [shape: f32[2,1,32], index: 2, kind: input, shape index: {}]   ;;  %s3722_s3 = inlined_call_operand.vmem [shape: bf16[9,32,32], index: 3, kind: input, shape index: {}]   ;;  %s3723_s4 = inlined_call_operand.vmem [shape: f32[1,1,32], index: 4, kind: input, shape index: {}]   ;;  %s3724_s5 = inlined_call_operand.vmem [shape: f32[2,16,16,32], index: 5, kind: input, shape index: {}]   ;;  %s3725_s6 = inlined_call_operand.hbm [shape: f32[2,16,16,32], index: 6, kind: output, shape index: {}]  }
   0x1   :  { %13 = vsyncpa [#allocation3 + $0x1], 0  ;;  %s2646_s21 = smov 0   ;;  %s2648_s22 = smov 0  }
   0x2   :  { %s2650_s23 = smov 0   ;;  %s2652_s24 = smov 0  }
   0x3   :  { %s2654_s25 = smov 0   ;;  %s2656_s26 = smov 0  }
   0x4   :  { %s2658_s27 = smov 0   ;;  %s2660_s28 = smov 0  }
   0x5 LB: > { %3730 = sst [smem:[#allocation5_spill]] %s2603_s27  ;;  %s2177_s29 = sadd.s32 4294967295, %s2607_s28   ;;  %s2607_s28 = sphi %s2660_s28, %s19_s28   ;;  %s2603_s27 = sphi %s2658_s27, %s3775_s27   ;;  %s2599_s26 = sphi %s2656_s26, %s3780_s26   ;;  %s2595_s25 = sphi %s2654_s25, %s3773_s25   ;;  %s2591_s24 = sphi %s2652_s24, %s3779_s24   ;;  %s2587_s23 = sphi %s2650_s23, %s3778_s23   ;;  %s2583_s22 = sphi %s2648_s22, %s3777_s22   ;;  %s2579_s21 = sphi %s2646_s21, %s3776_s21  }
   0x6   : > { %s2178_s30 = sadd.s32 4294967294, %s2607_s28   ;;  %s28_s7 = sadd.s32 1, %s2599_s26 }
   0x7   : > { %p29_p0 = scmp.ge.s32.totalorder %s28_s7, 2  ;;  %s31_s8 = sadd.s32 1, %s2603_s27 }
   0x8   : > { %p198_p1 = scmp.ne.s32.totalorder %s2587_s23, %s2583_s22  ;;  %p199_p2 = scmp.eq.s32.totalorder %s2177_s29, 3 }
   0x9   : > { %s3782_s7 = smov (%p29_p0, %s28_s7), 0  ;;  %s3784_s8 = smov (!%p29_p0, %s31_s8), %s2603_s27 }
   0xa   : > { %3731 = sst [smem:[#allocation6_spill]] %s3782_s7  ;;  %s184_s9 = ssub.s32 %s2599_s26, %s3782_s7 }
   0xb   : > { %p2697_p3 = por %p199_p2, %p198_p1  ;;  %p33_p4 = scmp.ge.s32.totalorder %s3784_s8, 2 }
   0xc   : > { %p204_p5 = scmp.ne.s32.totalorder %s2583_s22, %s2579_s21  ;;  %p205_p6 = scmp.eq.s32.totalorder %s2178_s30, 3 }
   0xd   : > { %p2181_p7 = scmp.ge.s32.totalorder %s2607_s28, 1  ;;  %s3786_s8 = smov (%p33_p4, %s3784_s8), 0 }
   0xe   : > { %3733 = sst [smem:[#allocation7_spill]] %s3786_s8  ;;  %p2706_p8 = por %p205_p6, %p204_p5 }
   0xf   : > { %p263_p9 = scmp.lt.s32.totalorder %s2607_s28, 5  ;;  %s183_s12 = ssub.s32 %s2603_s27, %s3786_s8 }
  0x10   : > { %s188_s13 = sadd.s32 1, %s2587_s23  ;;  %s185_s14 = sor.u32 %s184_s9, %s183_s12 }
  0x11   : > { %p264_p10 = pnand %p2181_p7, %p263_p9  ;;  %p186_p11 = scmp.eq.s32.totalorder %s185_s14, 0 }
  0x12   : > { %p309_p12 = scmp.lt.s32.totalorder (!%p264_p10), %s2595_s25, 1  ;;  %s2722_s18 = sshll.u32 (!%p264_p10), %s2591_s24, 3 }
  0x13   : > { %s2715_s15 = scalar_select %p186_p11, %s2587_s23, %s188_s13  }
  0x14   : > { %267 = sbr.rel (%p264_p10) target bundleno = 472 (0x1d8), region = 44  ;;  %p323_p13 = scmp.lt.s32.totalorder (!%p264_p10), %s2722_s18, 15 }
  0x15   : > { %s2384_s30 = smul.u32 (!%p264_p10), 96, %s2591_s24  ;;  %s2403_s16 = sshll.u32 (!%p264_p10), %s2591_s24, 4 }
  0x16   : > { %s2380_s17 = sshll.u32 (!%p264_p10), %s2595_s25, 5 }
  0x17   : > { %s2054_s19 = sadd.s32 (!%p264_p10), %s2403_s16, %s2380_s17 }
  0x18   : > { %s2381_s20 = sshll.u32 (!%p264_p10), %s2054_s19, 3 }
  0x19   : > { %v2386_v0 = vld [vmem:[%s3722_s3 + $0x8] sm:$0xff]  ;;  %v505_v1 = vlaneseq  ;;  %v2725_v2 = vstv %s2722_s18  ;;  %v2385_v3 = vld [vmem:[%s3722_s3] sm:$0xff]  ;;  %s2731_s29 = scalar_select %p309_p12, %s2595_s25, 1  ;;  %v2392_v9 = vld [vmem:[%s3722_s3 + $0x38] sm:$0xff]  ;;  %vm785_vm14 = vcmask 261120  }
  0x1a   : > { %2428 = vmatpush.bf16.msra.mxu1 %v2386_v0  ;;  %2429 = vmatpush.bf16.msra.mxu2 %v2386_v0  ;;  %v497_v4 = vadd.s32 2, %v2725_v2  ;;  %v499_v6 = vadd.s32 4, %v2725_v2  ;;  %v501_v7 = vadd.s32 6, %v2725_v2  ;;  %v2390_v8 = vld [vmem:[%s3722_s3 + $0x28] sm:$0xff]  ;;  %vm509_vm0 = vcmp.ge.s32.totalorder %v2725_v2, 1  ;;  %v2388_v10 = vld [vmem:[%s3722_s3 + $0x18] sm:$0xff] }
  0x1b   : > { %2430 = vmatpush.bf16.msra.mxu3 %v2386_v0  ;;  %816 = vmatpush.bf16.msra.mxu0 %v2386_v0  ;;  %v2735_v5 = vshrl.u32 %v505_v1, 7  ;;  %s2434_s9 = smul.u32 216, %s2731_s29  ;;  %s2743_s14 = scalar_lea.vmem %s3720_s1, %s2731_s29  ;;  %vm519_vm1 = vcmp.lt.s32.totalorder %v2725_v2, 17  ;;  %v2394_v11 = vld [vmem:[%s3722_s3 + $0x48] sm:$0xff]  ;;  %v2770_v12 = vadd.s32 3, %v2725_v2  ;;  %v2773_v13 = vadd.s32 5, %v2725_v2 }
  0x1c   : > { %s2756_s27 = scalar_lea.vmem %s3721_s2, %s2731_s29  ;;  %vm511_vm2 = vcmp.ge.s32.totalorder %v497_v4, 1  ;;  %v2778_v14 = vld [vmem:[%s2743_s14] ss:$0 sm:$0xff]  ;;  %vm521_vm3 = vcmp.lt.s32.totalorder %v497_v4, 17  ;;  %vm513_vm5 = vcmp.ge.s32.totalorder %v499_v6, 1  ;;  %vm523_vm6 = vcmp.lt.s32.totalorder %v499_v6, 17  ;;  %vm2787_vm9 = vmand %vm509_vm0, %vm519_vm1 }
  0x1d   : > { %s313_s7 = scalar_lea.vmem %s3719_s0, %s2434_s9  ;;  %vm3729_vm4 = vcmp.ge.s32.totalorder %v2735_v5, 1  ;;  %vm515_vm7 = vcmp.ge.s32.totalorder %v501_v7, 1  ;;  %vm525_vm8 = vcmp.lt.s32.totalorder %v501_v7, 17  ;;  %v2792_v18 = vadd.s32 7, %v2725_v2  ;;  %v2798_v22 = vld [vmem:[%s2756_s27] ss:$0 sm:$0xff]  ;;  %vm2804_vm10 = vmand %vm511_vm2, %vm521_vm3 }
  0x1e   : > { %2431 = vmatpush.bf16.msra.mxu1 %v2385_v3  ;;  %2432 = vmatpush.bf16.msra.mxu2 %v2385_v3  ;;  %s2775_s8 = scalar_lea.vmem %s313_s7, %s2384_s30  ;;  %v2795_v19 = vadd.s32 1, %v2725_v2  ;;  %vm2814_vm11 = vmand %vm513_vm5, %vm523_vm6  ;;  %v2389_v37 = vld [vmem:[%s3722_s3 + $0x20] sm:$0xff]  ;;  %vm512_vm15 = vcmp.ge.s32.totalorder %v2770_v12, 1  ;;  %vm522_vm0 = vcmp.lt.s32.totalorder %v2770_v12, 17  ;;  %vm514_vm3 = vcmp.ge.s32.totalorder %v2773_v13, 1  ;;  %v2391_v58 = vld [vmem:[%s3722_s3 + $0x30] sm:$0xff] }
  0x1f   : > { %2433 = vmatpush.bf16.msra.mxu3 %v2385_v3  ;;  %817 = vmatpush.bf16.msra.mxu0 %v2385_v3  ;;  %v2424_v15 = vld [vmem:[%s2775_s8 + $0x18] sm:$0xff]   ;;  %v2425_v16 = vld [vmem:[%s2775_s8 + $0x30] sm:$0xff]   ;;  %v2426_v25 = vld [vmem:[%s2775_s8 + $0x48] sm:$0xff]   ;;  %vm524_vm5 = vcmp.lt.s32.totalorder %v2773_v13, 17  ;;  %s3788_s18 = smov (!%p323_p13, %s2722_s18), 15  ;;  %s306_s30 = sand.u32 1, %s2583_s22  }
  0x20   : > { %v2410_v20 = vunpack.c.l.bf16 %v2424_v15  ;;  %v2411_v21 = vunpack.c.h.bf16 %v2424_v15  ;;  %v2414_v23 = vunpack.c.l.bf16 %v2425_v16  ;;  %v2415_v24 = vunpack.c.h.bf16 %v2425_v16  ;;  %v2405_v26 = vld [vmem:[%s2775_s8] sm:$0xff]   ;;  %vm2825_vm12 = vmand %vm515_vm7, %vm525_vm8  ;;  %v2387_v59 = vld [vmem:[%s3722_s3 + $0x10] sm:$0xff] }
  0x21   : > { %v2418_v28 = vunpack.c.l.bf16 %v2426_v25  ;;  %v2419_v29 = vunpack.c.h.bf16 %v2426_v25  ;;  %v2406_v30 = vunpack.c.l.bf16 %v2405_v26  ;;  %v2407_v31 = vunpack.c.h.bf16 %v2405_v26  ;;  %vm2837_vm13 = vmand %vm2804_vm10, %vm3729_vm4  ;;  %v2393_v0 = vld [vmem:[%s3722_s3 + $0x40] sm:$0xff]  ;;  %v340_v57 = vld [vmem:[%s2775_s8 + $0xc] sm:$0xff]  }
  0x22   : > { %1338 = vmatpush.bf16.msrb.mxu2 %v2390_v8  ;;  %1141 = vmatpush.bf16.msrb.mxu1 %v2388_v10  ;;  %v407_v32 = vmul.f32 %v2778_v14, %v2410_v20  ;;  %v408_v33 = vmul.f32 %v2778_v14, %v2411_v21  ;;  %v413_v34 = vmul.f32 %v2778_v14, %v2414_v23  ;;  %vm2849_vm1 = vmand %vm2814_vm11, %vm3729_vm4  ;;  %v346_v21 = vld [vmem:[%s2775_s8 + $0x24] sm:$0xff]  }
  0x23   : > { %1428 = vmatpush.bf16.msrb.mxu3 %v2392_v9  ;;  %1540 = vmatpush.bf16.msrb.mxu0 %v2394_v11  ;;  %v414_v35 = vmul.f32 %v2778_v14, %v2415_v24  ;;  %v419_v38 = vmul.f32 %v2778_v14, %v2418_v28  ;;  %v420_v39 = vmul.f32 %v2778_v14, %v2419_v29  ;;  %vm2861_vm2 = vmand %vm2825_vm12, %vm3729_vm4 }
  0x24   : > { %v401_v41 = vmul.f32 %v2778_v14, %v2406_v30  ;;  %v402_v42 = vmul.f32 %v2778_v14, %v2407_v31  ;;  %v441_v43 = vadd.f32 %v2798_v22, %v407_v32  ;;  %v442_v44 = vadd.f32 %v2798_v22, %v408_v33  ;;  %vm542_vm6 = vmand %vm2787_vm9, %vm3729_vm4  ;;  %v352_v32 = vld [vmem:[%s2775_s8 + $0x3c] sm:$0xff]  }
  0x25   : > { %v447_v46 = vadd.f32 %v2798_v22, %v413_v34  ;;  %v448_v47 = vadd.f32 %v2798_v22, %v414_v35  ;;  %v453_v49 = vadd.f32 %v2798_v22, %v419_v38  ;;  %v454_v50 = vadd.f32 %v2798_v22, %v420_v39  ;;  %v358_v38 = vld [vmem:[%s2775_s8 + $0x54] sm:$0xff]   ;;  %vm2935_vm7 = vmand %vm512_vm15, %vm522_vm0 }
  0x26   : > { %1339 = vmatpush.bf16.msrb.mxu2 %v2389_v37  ;;  %v435_v51 = vadd.f32 %v2798_v22, %v401_v41  ;;  %v436_v52 = vadd.f32 %v2798_v22, %v402_v42  ;;  %v471_v53 = vmax.f32 %v441_v43, 0.0  ;;  %v472_v54 = vmax.f32 %v442_v44, 0.0  ;;  %1142 = vmatpush.bf16.msrb.mxu1 %v2387_v59  ;;  %vm2949_vm8 = vmand %vm514_vm3, %vm524_vm5 }
  0x27   : > { %v477_v55 = vmax.f32 %v447_v46, 0.0  ;;  %v478_v56 = vmax.f32 %v448_v47, 0.0  ;;  %v483_v60 = vmax.f32 %v453_v49, 0.0  ;;  %v484_v61 = vmax.f32 %v454_v50, 0.0  ;;  %1429 = vmatpush.bf16.msrb.mxu3 %v2391_v58  ;;  %1541 = vmatpush.bf16.msrb.mxu0 %v2393_v0 }
  0x28   : > { %v465_v62 = vmax.f32 %v435_v51, 0.0  ;;  %v466_v63 = vmax.f32 %v436_v52, 0.0  ;;  %v671_v1 = vsel %vm2837_vm13, %v471_v53, 0.0  ;;  %v672_v3 = vsel %vm2804_vm10, %v472_v54, 0.0  ;;  %vm2961_vm13 = vmand %vm2935_vm7, %vm3729_vm4 }
  0x29   : > { %v677_v4 = vsel %vm2849_vm1, %v477_v55, 0.0  ;;  %v678_v6 = vsel %vm2814_vm11, %v478_v56, 0.0  ;;  %v2888_v7 = vpack.c.bf16 %v671_v1, %v671_v1  ;;  %v2890_v8 = vpack.c.bf16 %v672_v3, %v672_v3 }
  0x2a   : > { %v2892_v9 = vpack.c.bf16 %v677_v4, %v677_v4  ;;  %v2894_v10 = vpack.c.bf16 %v678_v6, %v678_v6  ;;  %v683_v11 = vsel %vm2861_vm2, %v483_v60, 0.0  ;;  %v684_v15 = vsel %vm2825_vm12, %v484_v61, 0.0  ;;  %v2398_v60 = vld [vmem:[%s3722_s3 + $0x68] sm:$0xff]  ;;  %vm2982_vm2 = vmand %vm2949_vm8, %vm3729_vm4 }
  0x2b   : > { %v665_v16 = vsel %vm542_vm6, %v465_v62, 0.0  ;;  %v666_v20 = vsel %vm2787_vm9, %v466_v63, 0.0  ;;  %v753_v23 = vunpack.c.l.b16 %v2888_v7  ;;  %v754_v24 = vunpack.c.l.b16 %v2890_v8 }
  0x2c   : > { %v757_v25 = vunpack.c.l.b16 %v2892_v9  ;;  %v758_v26 = vunpack.c.l.b16 %v2894_v10  ;;  %v2907_v28 = vpack.c.bf16 %v683_v11, %v683_v11  ;;  %v2909_v29 = vpack.c.bf16 %v684_v15, %v684_v15 }
  0x2d   : > { %v2911_v30 = vpack.c.bf16 %v665_v16, %v665_v16  ;;  %v2913_v31 = vpack.c.bf16 %v666_v20, %v666_v20  ;;  %v2916_v33 = vpack.c.b16 %v754_v24, %v753_v23  ;;  %v376_v35 = vunpack.c.l.bf16 %v346_v21 }
  0x2e   : > { %v2918_v34 = vpack.c.b16 %v758_v26, %v757_v25  ;;  %v377_v37 = vunpack.c.h.bf16 %v346_v21  ;;  %v761_v39 = vunpack.c.l.b16 %v2907_v28  ;;  %v762_v41 = vunpack.c.l.b16 %v2909_v29 }
  0x2f   : > { %v749_v42 = vunpack.c.l.b16 %v2911_v30  ;;  %v750_v43 = vunpack.c.l.b16 %v2913_v31  ;;  %2201 = vmatmul.msk.bf16.vlgmr.msra.gmra.mxu1 %vm785_vm14, %v2916_v33  ;;  %v410_v44 = vmul.f32 %v2778_v14, %v376_v35  ;;  %v382_v47 = vunpack.c.l.bf16 %v352_v32 }
  0x30   : > { %2203 = vmatmul.msk.bf16.vlgmr.msra.gmra.mxu2 %vm785_vm14, %v2918_v34  ;;  %v411_v45 = vmul.f32 %v2778_v14, %v377_v37  ;;  %v383_v48 = vunpack.c.h.bf16 %v352_v32  ;;  %v2939_v49 = vpack.c.b16 %v762_v41, %v761_v39  ;;  %v388_v51 = vunpack.c.l.bf16 %v358_v38 }
  0x31   : > { %v765_v50 = vpack.c.b16 %v750_v43, %v749_v42  ;;  %v389_v52 = vunpack.c.h.bf16 %v358_v38  ;;  %v444_v53 = vadd.f32 %v2798_v22, %v410_v44  ;;  %v416_v55 = vmul.f32 %v2778_v14, %v382_v47  ;;  %1726 = vmatpush.bf16.msra.mxu2 %v2398_v60  ;;  %v2400_v44 = vld [vmem:[%s3722_s3 + $0x78] sm:$0xff]  ;;  %v2402_v47 = vld [vmem:[%s3722_s3 + $0x88] sm:$0xff] }
  0x32   : > { %v445_v54 = vadd.f32 %v2798_v22, %v411_v45  ;;  %v417_v56 = vmul.f32 %v2778_v14, %v383_v48  ;;  %2205 = vmatmul.msk.bf16.vlgmr.msra.gmra.mxu3 %vm785_vm14, %v2939_v49  ;;  %v422_v13 = vmul.f32 %v2778_v14, %v388_v51  ;;  %vm516_vm15 = vcmp.ge.s32.totalorder %v2792_v18, 1  ;;  %v2396_v45 = vld [vmem:[%s3722_s3 + $0x58] sm:$0xff] }
  0x33   : > { %2199 = vmatmul.msk.bf16.vlgmr.msra.gmra.mxu0 %vm785_vm14, %v765_v50  ;;  %v423_v59 = vmul.f32 %v2778_v14, %v389_v52  ;;  %vm526_vm0 = vcmp.lt.s32.totalorder %v2792_v18, 17  ;;  %v474_v61 = vmax.f32 %v444_v53, 0.0  ;;  %v450_v63 = vadd.f32 %v2798_v22, %v416_v55  ;;  %v339_v53 = vld [vmem:[%s2775_s8 + $0x8] sm:$0x1]  ;;  %1838 = vmatpush.bf16.msra.mxu3 %v2400_v44 }
  0x34   : > { %v475_v62 = vmax.f32 %v445_v54, 0.0  ;;  %v451_v0 = vadd.f32 %v2798_v22, %v417_v56  ;;  %vm2974_vm1 = vmand %vm516_vm15, %vm526_vm0  ;;  %v456_v3 = vadd.f32 %v2798_v22, %v422_v13  ;;  %v370_v6 = vunpack.c.l.bf16 %v340_v57  ;;  %1636 = vmatpush.bf16.msra.mxu1 %v2396_v45  ;;  %1934 = vmatpush.bf16.msra.mxu0 %v2402_v47 }
  0x35   : > { %v457_v4 = vadd.f32 %v2798_v22, %v423_v59  ;;  %v371_v11 = vunpack.c.h.bf16 %v340_v57  ;;  %v674_v15 = vsel %vm2961_vm13, %v474_v61, 0.0  ;;  %v480_v20 = vmax.f32 %v450_v63, 0.0  ;;  %vm563_vm3 = vmand %vm2974_vm1, %vm3729_vm4 }
  0x36   : > { %v675_v16 = vsel %vm2935_vm7, %v475_v62, 0.0  ;;  %v481_v21 = vmax.f32 %v451_v0, 0.0  ;;  %v2992_v23 = vpack.c.bf16 %v674_v15, %v674_v15  ;;  %v486_v25 = vmax.f32 %v456_v3, 0.0 }
  0x37   : > { %v2994_v24 = vpack.c.bf16 %v675_v16, %v675_v16  ;;  %v487_v26 = vmax.f32 %v457_v4, 0.0  ;;  %v680_v32 = vsel %vm2982_vm2, %v480_v20, 0.0  ;;  %v404_v37 = vmul.f32 %v2778_v14, %v370_v6 }
  0x38   : > { %v681_v35 = vsel %vm2949_vm8, %v481_v21, 0.0  ;;  %v405_v38 = vmul.f32 %v2778_v14, %v371_v11  ;;  %v755_v39 = vunpack.c.l.b16 %v2992_v23  ;;  %v3008_v42 = vpack.c.bf16 %v680_v32, %v680_v32 }
  0x39   : > { %v756_v41 = vunpack.c.l.b16 %v2994_v24  ;;  %v3010_v43 = vpack.c.bf16 %v681_v35, %v681_v35  ;;  %v686_v48 = vsel %vm563_vm3, %v486_v25, 0.0  ;;  %v687_v50 = vsel %vm2974_vm1, %v487_v26, 0.0  ;;  %v345_v35 = vld [vmem:[%s2775_s8 + $0x20] sm:$0x1] }
  0x3a   : > { %v438_v51 = vadd.f32 %v2798_v22, %v404_v37  ;;  %v439_v52 = vadd.f32 %v2798_v22, %v405_v38  ;;  %v759_v55 = vunpack.c.l.b16 %v3008_v42  ;;  %v3030_v57 = vpack.c.bf16 %v686_v48, %v686_v48 }
  0x3b   : > { %v3026_v54 = vpack.c.b16 %v756_v41, %v755_v39  ;;  %v760_v56 = vunpack.c.l.b16 %v3010_v43  ;;  %v3032_v58 = vpack.c.bf16 %v687_v50, %v687_v50  ;;  %vm510_vm5 = vcmp.ge.s32.totalorder %v2795_v19, 1  ;;  %v342_v39 = vld [vmem:[%s2775_s8 + $0x14] sm:$0x1] }
  0x3c   : > { %v468_v13 = vmax.f32 %v438_v51, 0.0  ;;  %v469_v59 = vmax.f32 %v439_v52, 0.0  ;;  %v763_v61 = vunpack.c.l.b16 %v3030_v57  ;;  %vm520_vm6 = vcmp.lt.s32.totalorder %v2795_v19, 17 }
  0x3d   : > { %v3035_v60 = vpack.c.b16 %v760_v56, %v759_v55  ;;  %v369_v62 = vunpack.c.l.bf16 %v339_v53  ;;  %v764_v63 = vunpack.c.l.b16 %v3032_v58  ;;  %vm3040_vm13 = vmand %vm510_vm5, %vm520_vm6  ;;  %v3045_v18 = vadd.s32 16, %v2735_v5 }
  0x3e   : > { %vm875_vm15 = vsmask.f32 3328  ;;  %vm876_vm0 = vsmask.f32 7440  ;;  %vm545_vm2 = vmand %vm3040_vm13, %vm3729_vm4  ;;  %v669_v19 = vsel %vm3040_vm13, %v469_v59, 0.0  ;;  %v879_v4 = vshrl.u32 %v2911_v30, 16 }
  0x3f   : > { %v403_v3 = vmul.f32 %v2778_v14, %v369_v62  ;;  %v882_v6 = vshll.u32 %v2911_v30, 16  ;;  %2202 = vmatmul.msk.bf16.gmra.mxu1 %vm785_vm14, %v3026_v54  ;;  %v3060_v11 = vpack.c.b16 %v764_v63, %v763_v61  ;;  %v668_v15 = vsel %vm545_vm2, %v468_v13, 0.0  ;;  %vm3085_vm2 = vmor %vm875_vm15, %vm876_vm0 }
  0x40   : > { %2204 = vmatmul.msk.bf16.gmra.mxu2 %vm785_vm14, %v3035_v60  ;;  %v3062_v16 = vpack.c.bf16 %v669_v19, %v669_v19  ;;  %vm574_vm3 = vcmp.lt.s32.totalorder %v3045_v18, 17  ;;  %v3065_v20 = vpack.c.bf16 %v668_v15, %v668_v15  ;;  %v881_v25 = vrot.slane %v879_v4, 4 }
  0x41   : > { %v437_v21 = vadd.f32 %v2798_v22, %v403_v3  ;;  %v884_v26 = vrot.slane %v882_v6, 5  ;;  %vm3073_vm5 = vmand %vm2787_vm9, %vm574_vm3  ;;  %v888_v37 = vshll.u32 %v2913_v31, 16  ;;  %v892_v38 = vshrl.u32 %v2913_v31, 16 }
  0x42   : > { %v752_v32 = vunpack.c.l.b16 %v3062_v16  ;;  %vm1208_vm6 = vcmask 1042432   ;;  %2206 = vmatmul.msk.bf16.gmra.mxu3 %vm785_vm14, %v3060_v11  ;;  %v751_v41 = vunpack.c.l.b16 %v3065_v20  ;;  %vm1209_vm9 = vcmask 1046532   ;;  %vm580_vm15 = vmand %vm3040_vm13, %vm574_vm3 }
  0x43   : > { %v467_v44 = vmax.f32 %v437_v21, 0.0  ;;  %v885_v45 = vor.u32 %v884_v26, %v881_v25  ;;  %v890_v47 = vrot.slane %v888_v37, 5  ;;  %v894_v48 = vrot.slane %v892_v38, 4  ;;  %vm3089_vm4 = vmor %vm1208_vm6, %vm1209_vm9 }
  0x44   : > { %v2227_v51 = vrot.slane %v2911_v30, 9  ;;  %v1213_v52 = vrot.slane %v2913_v31, 5  ;;  %v766_v53 = vpack.c.b16 %v752_v32, %v751_v41  ;;  %v372_v13 = vunpack.c.l.bf16 %v342_v39  ;;  %vm583_vm13 = vmand %vm2804_vm10, %vm574_vm3 }
  0x45   : > { %v667_v55 = vsel %vm3073_vm5, %v467_v44, 0.0  ;;  %v886_v56 = vrot.slane %v885_v45, 4  ;;  %v895_v61 = vor.u32 %v894_v48, %v890_v47  ;;  %v903_v19 = vshrl.u32 %v3065_v20, 16  ;;  %vm586_vm10 = vmand %vm2935_vm7, %vm574_vm3 }
  0x46   : > { %v697_v59 = vpack.c.bf16 %v667_v55, %v667_v55  ;;  %v1214_v62 = vsel %vm3089_vm4, %v2227_v51, %v1213_v52  ;;  %v1215_v63 = vrot.slane %v1213_v52, 4  ;;  %2200 = vmatmul.msk.bf16.gmra.mxu0 %vm785_vm14, %v766_v53  ;;  %v406_v31 = vmul.f32 %v2778_v14, %v372_v13  ;;  %vm589_vm7 = vmand %vm2814_vm11, %vm574_vm3 }
  0x47   : > { %v891_v30 = vsel %vm3085_vm2, %v886_v56, %v890_v47  ;;  %v896_v3 = vrot.slane %v895_v61, 4  ;;  %v1272_v15 = vunpack.c.l.b16 %v1214_v62  ;;  %v905_v25 = vrot.slane %v903_v19, 4  ;;  %vm592_vm11 = vmand %vm2949_vm8, %vm574_vm3 }
  0x48   : > { %v898_v4 = vshll.u32 %v697_v59, 16  ;;  %v1216_v6 = vrot.slane %v697_v59, 5  ;;  %v440_v21 = vadd.f32 %v2798_v22, %v406_v31  ;;  %v906_v26 = vshll.u32 %v3065_v20, 16  ;;  %vm595_vm8 = vmand %vm2825_vm12, %vm574_vm3 }
  0x49   : > { %v912_v32 = vshll.u32 %v3062_v16, 16  ;;  %v1075_v38 = vunpack.c.l.b16 %v891_v30  ;;  %v916_v41 = vshrl.u32 %v3062_v16, 16  ;;  %v1220_v55 = vrot.slane %v3062_v16, 5  ;;  %vm598_vm12 = vmand %vm2974_vm1, %vm574_vm3 }
  0x4a   : > { %v900_v37 = vrot.slane %v898_v4, 5  ;;  %v1217_v39 = vsel %vm3089_vm4, %v1215_v63, %v1216_v6  ;;  %v470_v45 = vmax.f32 %v440_v21, 0.0  ;;  %v908_v47 = vrot.slane %v906_v26, 5 }
  0x4b   : > { %v1273_v44 = vunpack.c.l.b16 %v1217_v39  ;;  %v914_v48 = vrot.slane %v912_v32, 5  ;;  %v918_v52 = vrot.slane %v916_v41, 4  ;;  %v375_v56 = vunpack.c.l.bf16 %v345_v35 }
  0x4c   : > { %v901_v51 = vsel %vm3085_vm2, %v896_v3, %v900_v37  ;;  %v670_v61 = vsel %vm580_vm15, %v470_v45, 0.0  ;;  %v909_v62 = vor.u32 %v908_v47, %v905_v25  ;;  %v2228_v30 = vrot.slane %v3065_v20, 9 }
  0x4d   : > { %v1076_v13 = vunpack.c.l.b16 %v901_v51  ;;  %v1288_v59 = vpack.c.b16 %v1273_v44, %v1272_v15  ;;  %v700_v63 = vpack.c.bf16 %v670_v61, %v670_v61  ;;  %v919_v0 = vor.u32 %v918_v52, %v914_v48  ;;  %v348_v51 = vld [vmem:[%s2775_s8 + $0x2c] sm:$0x1] }
  0x4e   : > { %v910_v19 = vrot.slane %v909_v62, 4  ;;  %v1222_v4 = vrot.slane %v1220_v55, 4  ;;  %v409_v6 = vmul.f32 %v2778_v14, %v375_v56  ;;  %v927_v16 = vshrl.u32 %v2888_v7, 16 }
  0x4f   : > { %v1091_v31 = vpack.c.b16 %v1076_v13, %v1075_v38  ;;  %v920_v3 = vrot.slane %v919_v0, 4  ;;  %v922_v21 = vshll.u32 %v700_v63, 16  ;;  %v1223_v26 = vrot.slane %v700_v63, 5 }
  0x50   : > { %2247 = vmatmul.msk.bf16.vlgmr.msrb.gmra.mxu2 %vm785_vm14, %v1288_v59  ;;  %v915_v15 = vsel %vm3085_vm2, %v910_v19, %v914_v48  ;;  %v443_v20 = vadd.f32 %v2798_v22, %v409_v6  ;;  %v930_v25 = vshll.u32 %v2888_v7, 16  ;;  %v936_v32 = vshll.u32 %v2890_v8, 16 }
  0x51   : > { %2219 = vmatmul.msk.bf16.vlgmr.msrb.gmra.mxu1 %vm785_vm14, %v1091_v31  ;;  %v924_v35 = vrot.slane %v922_v21, 5  ;;  %v929_v37 = vrot.slane %v927_v16, 4  ;;  %v1077_v38 = vunpack.c.l.b16 %v915_v15  ;;  %v1221_v45 = vsel %vm3089_vm4, %v2228_v30, %v1220_v55  ;;  %v351_v21 = vld [vmem:[%s2775_s8 + $0x38] sm:$0x1] }
  0x52   : > { %2267 = vmatmul.msk.bf16.vlgmr.msrb.gmra.mxu3 %vm785_vm14, %v766_v53  ;;  %v473_v39 = vmax.f32 %v443_v20, 0.0  ;;  %v932_v41 = vrot.slane %v930_v25, 5  ;;  %v938_v47 = vrot.slane %v936_v32, 5  ;;  %v940_v48 = vshrl.u32 %v2890_v8, 16 }
  0x53   : > { %v925_v44 = vsel %vm3085_vm2, %v920_v3, %v924_v35  ;;  %v1224_v27 = vsel %vm3089_vm4, %v1222_v4, %v1223_v26  ;;  %v378_v62 = vunpack.c.l.bf16 %v348_v51  ;;  %v1274_v63 = vunpack.c.l.b16 %v1221_v45 }
  0x54   : > { %v1078_v52 = vunpack.c.l.b16 %v925_v44  ;;  %v673_v56 = vsel %vm583_vm13, %v473_v39, 0.0  ;;  %v933_v53 = vor.u32 %v932_v41, %v929_v37  ;;  %v942_v59 = vrot.slane %v940_v48, 4 }
  0x55   : > { %v703_v13 = vpack.c.bf16 %v673_v56, %v673_v56  ;;  %v1275_v0 = vunpack.c.l.b16 %v1224_v27  ;;  %v412_v30 = vmul.f32 %v2778_v14, %v378_v62  ;;  %v1227_v16 = vrot.slane %v2890_v8, 5 }
  0x56   : > { %v1092_v61 = vpack.c.b16 %v1078_v52, %v1077_v38  ;;  %v943_v31 = vor.u32 %v942_v59, %v938_v47  ;;  %v934_v55 = vrot.slane %v933_v53, 4  ;;  %v951_v25 = vshrl.u32 %v2992_v23, 16 }
  0x57   : > { %v946_v19 = vshll.u32 %v703_v13, 16  ;;  %v446_v4 = vadd.f32 %v2798_v22, %v412_v30  ;;  %v3145_v26 = vpack.c.b16 %v1275_v0, %v1274_v63  ;;  %v381_v32 = vunpack.c.l.bf16 %v351_v21  ;;  %v354_v21 = vld [vmem:[%s2775_s8 + $0x44] sm:$0x1] }
  0x58   : > { %2287 = vmatmul.msk.bf16.vlgmr.msrb.gmra.mxu0 %vm785_vm14, %v1092_v61  ;;  %v944_v6 = vrot.slane %v943_v31, 4  ;;  %v939_v15 = vsel %vm3085_vm2, %v934_v55, %v938_v47  ;;  %v954_v37 = vshll.u32 %v2992_v23, 16  ;;  %v960_v38 = vshll.u32 %v2994_v24, 16 }
  0x59   : > { %v948_v3 = vrot.slane %v946_v19, 5  ;;  %v476_v20 = vmax.f32 %v446_v4, 0.0  ;;  %v964_v8 = vshrl.u32 %v2994_v24, 16  ;;  %v2229_v46 = vrot.slane %v2888_v7, 9 }
  0x5a   : > { %v1229_v41 = vrot.slane %v1227_v16, 4  ;;  %v1230_v44 = vrot.slane %v703_v13, 5  ;;  %v1079_v45 = vunpack.c.l.b16 %v939_v15  ;;  %v953_v48 = vrot.slane %v951_v25, 4 }
  0x5b   : > { %v949_v35 = vsel %vm3085_vm2, %v944_v6, %v948_v3  ;;  %v676_v39 = vsel %vm586_vm10, %v476_v20, 0.0  ;;  %v415_v51 = vmul.f32 %v2778_v14, %v381_v32  ;;  %v956_v27 = vrot.slane %v954_v37, 5 }
  0x5c   : > { %v1080_v47 = vunpack.c.l.b16 %v949_v35  ;;  %v706_v52 = vpack.c.bf16 %v676_v39, %v676_v39  ;;  %v962_v56 = vrot.slane %v960_v38, 5  ;;  %v966_v53 = vrot.slane %v964_v8, 4 }
  0x5d   : > { %v1228_v7 = vsel %vm3089_vm4, %v2229_v46, %v1227_v16  ;;  %v1231_v13 = vsel %vm3089_vm4, %v1229_v41, %v1230_v44  ;;  %v957_v62 = vor.u32 %v956_v27, %v953_v48  ;;  %v1234_v4 = vrot.slane %v2994_v24, 5 }
  0x5e   : > { %v3167_v59 = vpack.c.b16 %v1080_v47, %v1079_v45  ;;  %v967_v63 = vor.u32 %v966_v53, %v962_v56  ;;  %v970_v0 = vshll.u32 %v706_v52, 16  ;;  %v1276_v31 = vunpack.c.l.b16 %v1228_v7 }
  0x5f   : > { %v1277_v19 = vunpack.c.l.b16 %v1231_v13  ;;  %v958_v30 = vrot.slane %v957_v62, 4  ;;  %v975_v16 = vshrl.u32 %v2892_v9, 16  ;;  %v978_v15 = vshll.u32 %v2892_v9, 16 }
  0x60   : > { %2248 = vmatmul.msk.bf16.gmra.mxu2 %vm785_vm14, %v3145_v26  ;;  %v968_v6 = vrot.slane %v967_v63, 4  ;;  %v972_v3 = vrot.slane %v970_v0, 5  ;;  %v984_v25 = vshll.u32 %v2894_v10, 16  ;;  %v988_v32 = vshrl.u32 %v2894_v10, 16 }
  0x61   : > { %2220 = vmatmul.msk.bf16.gmra.mxu1 %vm785_vm14, %v1092_v61  ;;  %v449_v61 = vadd.f32 %v2798_v22, %v415_v51  ;;  %v3184_v20 = vpack.c.b16 %v1277_v19, %v1276_v31  ;;  %v384_v37 = vunpack.c.l.bf16 %v354_v21  ;;  %v963_v38 = vsel %vm3085_vm2, %v958_v30, %v962_v56  ;;  %v2397_v56 = vld [vmem:[%s3722_s3 + $0x60] sm:$0xff]  ;;  %v357_v30 = vld [vmem:[%s2775_s8 + $0x50] sm:$0x1] }
  0x62   : > { %2268 = vmatmul.msk.bf16.gmra.mxu3 %vm785_vm14, %v2916_v33  ;;  %v973_v36 = vsel %vm3085_vm2, %v968_v6, %v972_v3  ;;  %v2230_v24 = vrot.slane %v2992_v23, 9  ;;  %v1236_v8 = vrot.slane %v1234_v4, 4  ;;  %v977_v39 = vrot.slane %v975_v16, 4  ;;  %1727 = vmatpush.bf16.msra.mxu2 %v2397_v56  ;;  %v2399_v3 = vld [vmem:[%s3722_s3 + $0x70] sm:$0xff] }
  0x63   : > { %v479_v55 = vmax.f32 %v449_v61, 0.0  ;;  %v980_v46 = vrot.slane %v978_v15, 5  ;;  %v1237_v41 = vrot.slane %v706_v52, 5  ;;  %v986_v45 = vrot.slane %v984_v25, 5  ;;  %v2395_v21 = vld [vmem:[%s3722_s3 + $0x50] sm:$0xff]  ;;  %1839 = vmatpush.bf16.msra.mxu3 %v2399_v3 }
  0x64   : > { %v990_v47 = vrot.slane %v988_v32, 4  ;;  %v1081_v48 = vunpack.c.l.b16 %v963_v38  ;;  %v1082_v51 = vunpack.c.l.b16 %v973_v36  ;;  %v418_v27 = vmul.f32 %v2778_v14, %v384_v37  ;;  %1637 = vmatpush.bf16.msra.mxu1 %v2395_v21 }
  0x65   : > { %v679_v35 = vsel %vm589_vm7, %v479_v55, 0.0  ;;  %v981_v23 = vor.u32 %v980_v46, %v977_v39  ;;  %v1235_v52 = vsel %vm3089_vm4, %v2230_v24, %v1234_v4  ;;  %v1238_v53 = vsel %vm3089_vm4, %v1236_v8, %v1237_v41  ;;  %v2401_v4 = vld [vmem:[%s3722_s3 + $0x80] sm:$0xff] }
  0x66   : > { %v709_v44 = vpack.c.bf16 %v679_v35, %v679_v35  ;;  %v991_v7 = vor.u32 %v990_v47, %v986_v45  ;;  %v3207_v61 = vpack.c.b16 %v1082_v51, %v1081_v48  ;;  %v452_v62 = vadd.f32 %v2798_v22, %v418_v27  ;;  %1935 = vmatpush.bf16.msra.mxu0 %v2401_v4 }
  0x67   : > { %v1278_v63 = vunpack.c.l.b16 %v1235_v52  ;;  %v1279_v0 = vunpack.c.l.b16 %v1238_v53  ;;  %v982_v31 = vrot.slane %v981_v23, 4  ;;  %v387_v25 = vunpack.c.l.bf16 %v357_v30  ;;  %v360_v30 = vld [vmem:[%s2775_s8 + $0x5c] sm:$0x1] }
  0x68   : > { %2288 = vmatmul.msk.bf16.gmra.mxu0 %vm785_vm14, %v3167_v59  ;;  %v994_v13 = vshll.u32 %v709_v44, 16  ;;  %v992_v19 = vrot.slane %v991_v7, 4  ;;  %v482_v6 = vmax.f32 %v452_v62, 0.0  ;;  %v999_v35 = vshrl.u32 %v3008_v42, 16 }
  0x69   : > { %v3226_v16 = vpack.c.b16 %v1279_v0, %v1278_v63  ;;  %v987_v15 = vsel %vm3085_vm2, %v982_v31, %v986_v45  ;;  %v1002_v37 = vshll.u32 %v3008_v42, 16  ;;  %v1008_v38 = vshll.u32 %v3010_v43, 16 }
  0x6a   : > { %v996_v55 = vrot.slane %v994_v13, 5  ;;  %v1241_v12 = vrot.slane %v2894_v10, 5  ;;  %v682_v36 = vsel %vm592_vm11, %v482_v6, 0.0  ;;  %v1012_v24 = vshrl.u32 %v3010_v43, 16 }
  0x6b   : > { %v1083_v8 = vunpack.c.l.b16 %v987_v15  ;;  %v421_v46 = vmul.f32 %v2778_v14, %v387_v25  ;;  %v712_v41 = vpack.c.bf16 %v682_v36, %v682_v36  ;;  %v1001_v45 = vrot.slane %v999_v35, 4 }
  0x6c   : > { %v997_v32 = vsel %vm3085_vm2, %v992_v19, %v996_v55  ;;  %v1004_v47 = vrot.slane %v1002_v37, 5  ;;  %v1010_v48 = vrot.slane %v1008_v38, 5  ;;  %v2231_v51 = vrot.slane %v2892_v9, 9 }
  0x6d   : > { %v1084_v39 = vunpack.c.l.b16 %v997_v32  ;;  %v1243_v10 = vrot.slane %v1241_v12, 4  ;;  %v1244_v27 = vrot.slane %v709_v44, 5  ;;  %v1014_v23 = vrot.slane %v1012_v24, 4 }
  0x6e   : > { %v455_v56 = vadd.f32 %v2798_v22, %v421_v46  ;;  %v1005_v53 = vor.u32 %v1004_v47, %v1001_v45  ;;  %v1242_v7 = vsel %vm3089_vm4, %v2231_v51, %v1241_v12  ;;  %v1018_v9 = vshll.u32 %v712_v41, 16 }
  0x6f   : > { %v3246_v52 = vpack.c.b16 %v1084_v39, %v1083_v8  ;;  %v1245_v13 = vsel %vm3089_vm4, %v1243_v10, %v1244_v27  ;;  %v1015_v62 = vor.u32 %v1014_v23, %v1010_v48  ;;  %v1280_v44 = vunpack.c.l.b16 %v1242_v7 }
  0x70   : > { %2249 = vmatmul.msk.bf16.gmra.mxu2 %vm785_vm14, %v3184_v20  ;;  %v485_v63 = vmax.f32 %v455_v56, 0.0  ;;  %v1281_v0 = vunpack.c.l.b16 %v1245_v13  ;;  %v1006_v31 = vrot.slane %v1005_v53, 4  ;;  %v1020_v55 = vrot.slane %v1018_v9, 5  ;;  %v2427_v56 = vld [vmem:[%s2775_s8 + $0x60] sm:$0xff]  }
  0x71   : > { %2221 = vmatmul.msk.bf16.gmra.mxu1 %vm785_vm14, %v3167_v59  ;;  %v1016_v19 = vrot.slane %v1015_v62, 4  ;;  %v1023_v6 = vshrl.u32 %v2907_v28, 16  ;;  %v1026_v3 = vshll.u32 %v2907_v28, 16  ;;  %v1032_v21 = vshll.u32 %v2909_v29, 16 }
  0x72   : > { %2269 = vmatmul.msk.bf16.gmra.mxu3 %vm785_vm14, %v3026_v54  ;;  %v1248_v4 = vrot.slane %v3010_v43, 5  ;;  %v685_v15 = vsel %vm595_vm8, %v485_v63, 0.0  ;;  %v1036_v25 = vshrl.u32 %v2909_v29, 16  ;;  %v3264_v40 = vpack.c.b16 %v1281_v0, %v1280_v44 }
  0x73   : > { %v390_v32 = vunpack.c.l.bf16 %v360_v30  ;;  %v1011_v35 = vsel %vm3085_vm2, %v1006_v31, %v1010_v48  ;;  %v1021_v37 = vsel %vm3085_vm2, %v1016_v19, %v1020_v55  ;;  %v3270_v38 = vpack.c.bf16 %v685_v15, %v685_v15 }
  0x74   : > { %v1025_v12 = vrot.slane %v1023_v6, 4  ;;  %v1028_v36 = vrot.slane %v1026_v3, 5  ;;  %v1034_v24 = vrot.slane %v1032_v21, 5  ;;  %v2232_v8 = vrot.slane %v3008_v42, 9  ;;  %v363_v6 = vld [vmem:[%s2775_s8 + $0x68] sm:$0x1] }
  0x75   : > { %v1250_v43 = vrot.slane %v1248_v4, 4  ;;  %v1251_v39 = vrot.slane %v712_v41, 5  ;;  %v1038_v46 = vrot.slane %v1036_v25, 4  ;;  %v424_v45 = vmul.f32 %v2778_v14, %v390_v32 }
  0x76   : > { %v1085_v47 = vunpack.c.l.b16 %v1011_v35  ;;  %v1086_v48 = vunpack.c.l.b16 %v1021_v37  ;;  %v1029_v51 = vor.u32 %v1028_v36, %v1025_v12  ;;  %v1249_v42 = vsel %vm3089_vm4, %v2232_v8, %v1248_v4 }
  0x77   : > { %v1252_v41 = vsel %vm3089_vm4, %v1250_v43, %v1251_v39  ;;  %v1039_v10 = vor.u32 %v1038_v46, %v1034_v24  ;;  %v1042_v27 = vshll.u32 %v3270_v38, 16  ;;  %v458_v23 = vadd.f32 %v2798_v22, %v424_v45 }
  0x78   : > { %2289 = vmatmul.msk.bf16.gmra.mxu0 %vm785_vm14, %v3207_v61  ;;  %v3287_v53 = vpack.c.b16 %v1086_v48, %v1085_v47  ;;  %v1282_v7 = vunpack.c.l.b16 %v1249_v42  ;;  %v1283_v13 = vunpack.c.l.b16 %v1252_v41  ;;  %v1030_v62 = vrot.slane %v1029_v51, 4 }
  0x79   : > { %v1040_v9 = vrot.slane %v1039_v10, 4  ;;  %v1044_v63 = vrot.slane %v1042_v27, 5  ;;  %v2422_v44 = vunpack.c.l.bf16 %v2427_v56  ;;  %v2423_v0 = vunpack.c.h.bf16 %v2427_v56 }
  0x7a   : > { %v488_v31 = vmax.f32 %v458_v23, 0.0  ;;  %v3295_v19 = vpack.c.b16 %v1283_v13, %v1282_v7  ;;  %v1035_v55 = vsel %vm3085_vm2, %v1030_v62, %v1034_v24  ;;  %v503_v30 = vadd.s32 8, %v2725_v2 }
  0x7b   : > { %v1045_v3 = vsel %vm3085_vm2, %v1040_v9, %v1044_v63  ;;  %v1047_v21 = vshrl.u32 %v3030_v57, 16  ;;  %v425_v4 = vmul.f32 %v2778_v14, %v2422_v44  ;;  %v426_v15 = vmul.f32 %v2778_v14, %v2423_v0 }
  0x7c   : > { %v688_v25 = vsel %vm598_vm12, %v488_v31, 0.0  ;;  %v1050_v1 = vshll.u32 %v3030_v57, 16  ;;  %v1056_v32 = vshll.u32 %v3032_v58, 16  ;;  %v1060_v35 = vshrl.u32 %v3032_v58, 16 }
  0x7d   : > { %v1255_v37 = vrot.slane %v2909_v29, 5  ;;  %v393_v12 = vunpack.c.l.bf16 %v363_v6  ;;  %v1087_v36 = vunpack.c.l.b16 %v1035_v55  ;;  %vm517_vm1 = vcmp.ge.s32.totalorder %v503_v30, 1 }
  0x7e   : > { %vm527_vm0 = vcmp.lt.s32.totalorder %v503_v30, 17  ;;  %v1088_v24 = vunpack.c.l.b16 %v1045_v3  ;;  %v3310_v8 = vpack.c.bf16 %v688_v25, %v688_v25  ;;  %v459_v43 = vadd.f32 %v2798_v22, %v425_v4 }
  0x7f   : > { %v460_v39 = vadd.f32 %v2798_v22, %v426_v15  ;;  %v1049_v46 = vrot.slane %v1047_v21, 4  ;;  %v1052_v45 = vrot.slane %v1050_v1, 5  ;;  %v1058_v47 = vrot.slane %v1056_v32, 5  ;;  %vm3321_vm5 = vmand %vm517_vm1, %vm527_vm0 }
  0x80   : > { %2250 = vmatmul.msk.bf16.gmra.mxu2 %vm785_vm14, %v3226_v16  ;;  %v1062_v48 = vrot.slane %v1060_v35, 4  ;;  %v2233_v29 = vrot.slane %v2907_v28, 9  ;;  %v1257_v51 = vrot.slane %v1255_v37, 4  ;;  %v1258_v42 = vrot.slane %v3270_v38, 5  ;;  %vm601_vm15 = vmand %vm3321_vm5, %vm574_vm3 }
  0x81   : > { %2222 = vmatmul.msk.bf16.gmra.mxu1 %vm785_vm14, %v3207_v61  ;;  %v427_v10 = vmul.f32 %v2778_v14, %v393_v12  ;;  %v489_v27 = vmax.f32 %v459_v43, 0.0  ;;  %v490_v23 = vmax.f32 %v460_v39, 0.0  ;;  %v3328_v56 = vpack.c.b16 %v1088_v24, %v1087_v36 }
  0x82   : > { %2270 = vmatmul.msk.bf16.gmra.mxu3 %vm785_vm14, %v2918_v34  ;;  %v1053_v7 = vor.u32 %v1052_v45, %v1049_v46  ;;  %v1063_v13 = vor.u32 %v1062_v48, %v1058_v47  ;;  %vm3769_vm6 = vcmp.ge.s32.totalorder %v2735_v5, 1  ;;  %v1256_v28 = vsel %vm3089_vm4, %v2233_v29, %v1255_v37  ;;  %v3376_v48 = vld [vmem:[%s3723_s4] ss:$0 sm:$0xff] }
  0x83   : > { %vm566_vm9 = vmand %vm3321_vm5, %vm3769_vm6  ;;  %v1259_v14 = vsel %vm3089_vm4, %v1257_v51, %v1258_v42  ;;  %v1066_v38 = vshll.u32 %v3310_v8, 16  ;;  %v461_v62 = vadd.f32 %v2798_v22, %v427_v10  ;;  %v690_v63 = vsel %vm3321_vm5, %v490_v23, 0.0 }
  0x84   : > { %v689_v9 = vsel %vm566_vm9, %v489_v27, 0.0  ;;  %v1284_v44 = vunpack.c.l.b16 %v1256_v28  ;;  %v1285_v0 = vunpack.c.l.b16 %v1259_v14  ;;  %v1054_v31 = vrot.slane %v1053_v7, 4  ;;  %vm3772_vm11 = vmmov %vm3769_vm6 }
  0x85   : > { %v1064_v55 = vrot.slane %v1063_v13, 4  ;;  %v1068_v30 = vrot.slane %v1066_v38, 5  ;;  %v491_v6 = vmax.f32 %v461_v62, 0.0  ;;  %v3344_v3 = vpack.c.bf16 %v689_v9, %v689_v9 }
  0x86   : > { %v3346_v21 = vpack.c.bf16 %v690_v63, %v690_v63  ;;  %v3352_v22 = vpack.c.b16 %v1285_v0, %v1284_v44  ;;  %v1059_v15 = vsel %vm3085_vm2, %v1054_v31, %v1058_v47  ;;  %v1262_v1 = vrot.slane %v3032_v58, 5 }
  0x87   : > { %v1069_v25 = vsel %vm3085_vm2, %v1064_v55, %v1068_v30  ;;  %v691_v32 = vsel %vm601_vm15, %v491_v6, 0.0  ;;  %v1488_v35 = vshrl.u32 %v3344_v3, 16  ;;  %v1491_v37 = vshll.u32 %v3344_v3, 16 }
  0x88   : > { %2290 = vmatmul.msk.bf16.gmra.mxu0 %vm785_vm14, %v3246_v52  ;;  %v1497_v12 = vshll.u32 %v3346_v21, 16  ;;  %v1501_v36 = vshrl.u32 %v3346_v21, 16  ;;  %v1089_v43 = vunpack.c.l.b16 %v1059_v15  ;;  %v1090_v39 = vunpack.c.l.b16 %v1069_v25 }
  0x89   : > { %v2234_v58 = vrot.slane %v3030_v57, 9  ;;  %v1264_v46 = vrot.slane %v1262_v1, 4  ;;  %v1265_v45 = vrot.slane %v3310_v8, 5  ;;  %v3371_v47 = vpack.c.bf16 %v691_v32, %v691_v32 }
  0x8a   : > { %v1490_v29 = vrot.slane %v1488_v35, 4  ;;  %v1493_v51 = vrot.slane %v1491_v37, 5  ;;  %v1499_v42 = vrot.slane %v1497_v12, 5  ;;  %v1503_v41 = vrot.slane %v1501_v36, 4 }
  0x8b   : > { %v3383_v27 = vpack.c.b16 %v1090_v39, %v1089_v43  ;;  %v1263_v23 = vsel %vm3089_vm4, %v2234_v58, %v1262_v1  ;;  %v1266_v7 = vsel %vm3089_vm4, %v1264_v46, %v1265_v45  ;;  %v1507_v38 = vshll.u32 %v3371_v47, 16 }
  0x8c   : > { %v1494_v28 = vor.u32 %v1493_v51, %v1490_v29  ;;  %v1504_v14 = vor.u32 %v1503_v41, %v1499_v42  ;;  %v1286_v9 = vunpack.c.l.b16 %v1263_v23  ;;  %v1287_v63 = vunpack.c.l.b16 %v1266_v7 }
  0x8d   : > { %v1509_v55 = vrot.slane %v1507_v38, 5  ;;  %v1404_v6 = vunpack.c.l.b16 %v3344_v3  ;;  %v1405_v15 = vunpack.c.l.b16 %v3346_v21 }
  0x8e   : > { %v1495_v0 = vrot.slane %v1494_v28, 4  ;;  %v1505_v31 = vrot.slane %v1504_v14, 4  ;;  %v3402_v1 = vpack.c.b16 %v1287_v63, %v1286_v9 }
  0x8f   : > { %v3413_v43 = vpack.c.b16 %v1405_v15, %v1404_v6 }
  0x90   : > { %2251 = vmatmul.msk.bf16.gmra.mxu2 %vm785_vm14, %v3264_v40  ;;  %v1500_v37 = vsel %vm3085_vm2, %v1495_v0, %v1499_v42  ;;  %v1510_v12 = vsel %vm3085_vm2, %v1505_v31, %v1509_v55 }
  0x91   : > { %2223 = vmatmul.msk.bf16.gmra.mxu1 %vm785_vm14, %v3246_v52  ;;  %v1516_v39 = vunpack.c.l.b16 %v1500_v37  ;;  %v1517_v58 = vunpack.c.l.b16 %v1510_v12 }
  0x92   : > { %2271 = vmatmul.msk.bf16.gmra.mxu3 %vm785_vm14, %v3035_v60 }
  0x93   : > { %v3424_v51 = vpack.c.b16 %v1517_v58, %v1516_v39 }
  0x98   : > { %2291 = vmatmul.msk.bf16.gmra.mxu0 %vm785_vm14, %v3287_v53 }
  0xa0   : > { %2252 = vmatmul.msk.bf16.gmra.mxu2 %vm785_vm14, %v3295_v19 }
  0xa1   : > { %2224 = vmatmul.msk.bf16.gmra.mxu1 %vm785_vm14, %v3287_v53 }
  0xa2   : > { %2272 = vmatmul.msk.bf16.gmra.mxu3 %vm785_vm14, %v2939_v49 }
  0xa8   : > { %2292 = vmatmul.msk.bf16.gmra.mxu0 %vm785_vm14, %v3328_v56 }
  0xac   : > { %v3354_v4 = vpop.f32.mrf.mxu1 }
  0xb0   : > { %v819_v24 = vpop.f32.mrf.mxu0  ;;  %2253 = vmatmul.msk.bf16.gmra.mxu2 %vm785_vm14, %v3352_v22 }
  0xb1   : > { %2225 = vmatmul.msk.bf16.gmra.mxu1 %vm785_vm14, %v3328_v56  ;;  %v859_v28 = vadd.f32 %v3376_v48, %v819_v24 }
  0xb2   : > { %2273 = vmatmul.msk.bf16.gmra.mxu3 %vm785_vm14, %v3060_v11 }
  0xb3   : > { %v839_v10 = vpop.f32.mrf.mxu2 }
  0xb4   : > { %v3381_v57 = vadd.f32 %v3376_v48, %v839_v10  ;;  %v3385_v8 = vpop.f32.mrf.mxu1 }
  0xb5   : > { %v849_v13 = vpop.f32.mrf.mxu3 }
  0xb6   : > { %v3393_v62 = vadd.f32 %v3376_v48, %v849_v13 }
  0xb8   : > { %2293 = vmatmul.msk.bf16.gmra.mxu0 %vm785_vm14, %v3383_v27  ;;  %v821_v44 = vpop.f32.mrf.mxu0 }
  0xb9   : > { %v860_v55 = vadd.f32 %v3376_v48, %v821_v44 }
  0xbb   : > { %v841_v30 = vpop.f32.mrf.mxu2 }
  0xbc   : > { %v3400_v25 = vadd.f32 %v3376_v48, %v841_v30  ;;  %v3404_v32 = vpop.f32.mrf.mxu1 }
  0xbd   : > { %v851_v35 = vpop.f32.mrf.mxu3 }
  0xbe   : > { %v3411_v36 = vadd.f32 %v3376_v48, %v851_v35 }
  0xc0   : > { %2254 = vmatmul.msk.bf16.gmra.mxu2 %vm785_vm14, %v3402_v1 }
  0xc1   : > { %2226 = vmatmul.msk.bf16.gmra.mxu1 %vm785_vm14, %v3383_v27 }
  0xc2   : > { %2274 = vmatmul.msk.bf16.gmra.mxu3 %vm785_vm14, %v3413_v43 }
  0xc3   : > { %v844_v46 = vpop.f32.mrf.mxu2  ;;  %v824_v45 = vpop.f32.mrf.mxu0 }
  0xc4   : > { %v3422_v29 = vadd.f32 %v3376_v48, %v844_v46  ;;  %v3426_v42 = vpop.f32.mrf.mxu1 }
  0xc5   : > { %v854_v41 = vpop.f32.mrf.mxu3 }
  0xc6   : > { %v3429_v10 = vadd.f32 %v3376_v48, %v854_v41 }
  0xc8   : > { %2294 = vmatmul.msk.bf16.gmra.mxu0 %vm785_vm14, %v3424_v51 }
  0xcb   : > { %v846_v23 = vpop.f32.mrf.mxu2  ;;  %v826_v7 = vpop.f32.mrf.mxu0 }
  0xcc   : > { %v3434_v13 = vadd.f32 %v3376_v48, %v846_v23 }
  0xcd   : > { %v856_v14 = vpop.f32.mrf.mxu3 }
  0xce   : > { %v1144_v38 = vpop.f32.mrf.mxu1  ;;  %v3438_v9 = vadd.f32 %v3376_v48, %v856_v14 }
  0xcf   : > { %v1184_v63 = vadd.f32 %v1144_v38, %v859_v28 }
  0xd0   : > { %2328 = vmatmul.msk.bf16.vlgmr.msra.gmra.mxu2 %vm785_vm14, %v2916_v33 }
  0xd1   : > { %2308 = vmatmul.msk.bf16.vlgmr.msra.gmra.mxu1 %vm785_vm14, %v3145_v26  ;;  %v861_v26 = vadd.f32 %v3376_v48, %v824_v45  ;;  %v862_v45 = vadd.f32 %v3376_v48, %v826_v7 }
  0xd2   : > { %2348 = vmatmul.msk.bf16.vlgmr.msra.gmra.mxu3 %vm785_vm14, %v3167_v59 }
  0xd3   : > { %v1341_v0 = vpop.f32.mrf.mxu2 }
  0xd4   : > { %v1381_v31 = vadd.f32 %v1341_v0, %v1184_v63 }
  0xd5   : > { %v1543_v24 = vpop.f32.mrf.mxu0  ;;  %v1431_v30 = vpop.f32.mrf.mxu3 }
  0xd6   : > { %v1471_v6 = vadd.f32 %v1431_v30, %v1381_v31  ;;  %v1146_v15 = vpop.f32.mrf.mxu1 }
  0xd7   : > { %v1185_v35 = vadd.f32 %v1146_v15, %v860_v55 }
  0xd8   : > { %2369 = vmatmul.msk.bf16.vlgmr.msra.gmra.mxu0 %vm785_vm14, %v3184_v20  ;;  %v3449_v37 = vadd.f32 %v1543_v24, %v1471_v6  ;;  %v863_v24 = vadd.f32 %v3376_v48, %v3354_v4  ;;  %v864_v4 = vadd.f32 %v3376_v48, %v3385_v8 }
  0xdb   : > { %v1343_v33 = vpop.f32.mrf.mxu2 }
  0xdc   : > { %v1382_v12 = vadd.f32 %v1343_v33, %v1185_v35 }
  0xdd   : > { %v1545_v39 = vpop.f32.mrf.mxu0  ;;  %v1433_v59 = vpop.f32.mrf.mxu3 }
  0xde   : > { %v1472_v58 = vadd.f32 %v1433_v59, %v1382_v12  ;;  %v1149_v46 = vpop.f32.mrf.mxu1 }
  0xdf   : > { %v1186_v41 = vadd.f32 %v1149_v46, %v861_v26 }
  0xe0   : > { %2329 = vmatmul.msk.bf16.gmra.mxu2 %vm785_vm14, %v3026_v54  ;;  %v3456_v44 = vadd.f32 %v1545_v39, %v1472_v58 }
  0xe1   : > { %2309 = vmatmul.msk.bf16.gmra.mxu1 %vm785_vm14, %v3184_v20 }
  0xe2   : > { %2349 = vmatmul.msk.bf16.gmra.mxu3 %vm785_vm14, %v3207_v61 }
  0xe3   : > { %v1346_v23 = vpop.f32.mrf.mxu2 }
  0xe4   : > { %v1383_v28 = vadd.f32 %v1346_v23, %v1186_v41 }
  0xe5   : > { %v1548_v14 = vpop.f32.mrf.mxu0  ;;  %v1436_v38 = vpop.f32.mrf.mxu3 }
  0xe6   : > { %v1473_v63 = vadd.f32 %v1436_v38, %v1383_v28  ;;  %v1151_v0 = vpop.f32.mrf.mxu1 }
  0xe7   : > { %v1187_v31 = vadd.f32 %v1151_v0, %v862_v45 }
  0xe8   : > { %2370 = vmatmul.msk.bf16.gmra.mxu0 %vm785_vm14, %v3226_v16  ;;  %v3463_v54 = vadd.f32 %v1548_v14, %v1473_v63 }
  0xeb   : > { %v1348_v20 = vpop.f32.mrf.mxu2 }
  0xec   : > { %v1384_v55 = vadd.f32 %v1348_v20, %v1187_v31 }
  0xed   : > { %v1550_v61 = vpop.f32.mrf.mxu0  ;;  %v1438_v30 = vpop.f32.mrf.mxu3 }
  0xee   : > { %v1474_v6 = vadd.f32 %v1438_v30, %v1384_v55  ;;  %v1154_v15 = vpop.f32.mrf.mxu1 }
  0xef   : > { %v1188_v7 = vadd.f32 %v1154_v15, %v863_v24  ;;  %v364_v15 = vld [vmem:[%s2775_s8 + $0x6c] sm:$0xff]  }
  0xf0   : > { %2330 = vmatmul.msk.bf16.gmra.mxu2 %vm785_vm14, %v2918_v34  ;;  %v3471_v35 = vadd.f32 %v1550_v61, %v1474_v6 }
  0xf1   : > { %2310 = vmatmul.msk.bf16.gmra.mxu1 %vm785_vm14, %v3226_v16 }
  0xf2   : > { %2350 = vmatmul.msk.bf16.gmra.mxu3 %vm785_vm14, %v3246_v52  ;;  %v865_v52 = vadd.f32 %v3376_v48, %v3404_v32  ;;  %v866_v32 = vadd.f32 %v3376_v48, %v3426_v42  ;;  %v395_v48 = vunpack.c.h.bf16 %v364_v15 }
  0xf3   : > { %v1351_v33 = vpop.f32.mrf.mxu2 }
  0xf4   : > { %v1385_v12 = vadd.f32 %v1351_v33, %v1188_v7 }
  0xf5   : > { %v1553_v26 = vpop.f32.mrf.mxu0  ;;  %v1441_v39 = vpop.f32.mrf.mxu3 }
  0xf6   : > { %v1475_v59 = vadd.f32 %v1441_v39, %v1385_v12  ;;  %v1156_v58 = vpop.f32.mrf.mxu1  ;;  %v394_v12 = vunpack.c.l.bf16 %v364_v15  ;;  %v2511_v39 = vld [vmem:[%s2743_s14] ss:$0 sm:$0xff]  ;;  %s2186_s14 = sshll.u32 %s2731_s29, 5 }
  0xf7   : > { %v1189_v46 = vadd.f32 %v1156_v58, %v864_v4 }
  0xf8   : > { %2371 = vmatmul.msk.bf16.gmra.mxu0 %vm785_vm14, %v3264_v40  ;;  %v3479_v34 = vadd.f32 %v1553_v26, %v1475_v59  ;;  %v429_v59 = vmul.f32 %v2511_v39, %v395_v48 }
  0xfb   : > { %v1353_v16 = vpop.f32.mrf.mxu2 }
  0xfc   : > { %v1386_v41 = vadd.f32 %v1353_v16, %v1189_v46  ;;  %v504_v46 = vadd.s32 9, %v2725_v2  ;;  %v366_v16 = vld [vmem:[%s2775_s8 + $0x74] sm:$0x1] }
  0xfd   : > { %v1555_v23 = vpop.f32.mrf.mxu0  ;;  %v1443_v28 = vpop.f32.mrf.mxu3 }
  0xfe   : > { %v1476_v45 = vadd.f32 %v1443_v28, %v1386_v41  ;;  %v1159_v14 = vpop.f32.mrf.mxu1  ;;  %v2512_v28 = vld [vmem:[%s2756_s27] ss:$0 sm:$0xff]  ;;  %vm518_vm13 = vcmp.ge.s32.totalorder %v504_v46, 1  ;;  %vm528_vm10 = vcmp.lt.s32.totalorder %v504_v46, 17  ;;  %s2185_s27 = sshll.u32 %s3788_s18, 1  ;;  %s2182_s18 = sshll.u32 %s306_s30, 7 }
  0xff   : > { %v1190_v8 = vadd.f32 %v1159_v14, %v865_v52  ;;  %v396_v14 = vunpack.c.l.bf16 %v366_v16  ;;  %vm3516_vm7 = vmand %vm518_vm13, %vm528_vm10  ;;  %s327_s8 = sadd.s32 %s2186_s14, %s2185_s27  ;;  %s3610_s29 = scalar_lea.vmem [#allocation2], %s2182_s18 }
 0x100   : > { %2331 = vmatmul.msk.bf16.gmra.mxu2 %vm785_vm14, %v3035_v60  ;;  %v3487_v38 = vadd.f32 %v1555_v23, %v1476_v45  ;;  %vm569_vm8 = vmand %vm3516_vm7, %vm3772_vm11  ;;  %s2187_s7 = sshll.u32 %s327_s8, 3  ;;  %s2056_s27 = scalar_lea.hbm %s3725_s6, %s2381_s20 }
 0x101   : > { %2311 = vmatmul.msk.bf16.gmra.mxu1 %vm785_vm14, %v3264_v40  ;;  %vm604_vm12 = vmand %vm3516_vm7, %vm574_vm3  ;;  %s3604_s13 = scalar_lea.vmem %s3724_s5, %s2187_s7  ;;  %s2057_s14 = sshll.u32 %s3610_s29, 4  ;;  %s2058_s14 = int_to_ptr.vmem [resolvable:$true] %s2057_s14 }
 0x102   : > { %2351 = vmatmul.msk.bf16.gmra.mxu3 %vm785_vm14, %v3287_v53  ;;  %s2059_s8 = sshll.u32 %s2056_s27, 4  ;;  %s2042_s7 = scalar_lea.sflag [#allocation3], %s306_s30  ;;  %s2060_s8 = int_to_ptr.hbm [resolvable:$true] %s2059_s8 }
 0x103   : > { %v1356_v63 = vpop.f32.mrf.mxu2  ;;  %s2527_s9 = sshra.s32 %s2060_s8, 4  ;;  %s2528_s9 = int_to_ptr.hbm [resolvable:$true] %s2527_s9 }
 0x104   : > { %v1387_v0 = vadd.f32 %v1356_v63, %v1190_v8  ;;  %s2529_s12 = scalar_lea.hbm %s2528_s9, 128  ;;  %p2534_p4 = scmp.lt.s32.totalorder %s2528_s9, %s3725_s6 }
 0x105   : > { %v1558_v31 = vpop.f32.mrf.mxu0  ;;  %v1446_v20 = vpop.f32.mrf.mxu3  ;;  %p2530_p0 = scmp.ne.s32.totalorder %s2528_s9, %s2529_s12 }
 0x106   : > { %v1477_v55 = vadd.f32 %v1446_v20, %v1387_v0  ;;  %v1161_v24 = vpop.f32.mrf.mxu1 }
 0x107   : > { %v1191_v61 = vadd.f32 %v1161_v24, %v866_v32  ;;  %p2531_p1 = pnand %p2530_p0, %p2697_p3 }
 0x108   : > { %2372 = vmatmul.msk.bf16.gmra.mxu0 %vm785_vm14, %v3295_v19  ;;  %v3495_v60 = vadd.f32 %v1558_v31, %v1477_v55  ;;  %v430_v31 = vmul.f32 %v2511_v39, %v396_v14 }
 0x109   : > { %p2532_p2 = pneg %p2531_p1 }
 0x10b   : > { %v1358_v40 = vpop.f32.mrf.mxu2 }
 0x10c   : > { %v1388_v30 = vadd.f32 %v1358_v40, %v1191_v61 }
 0x10d   : > { %v1560_v6 = vpop.f32.mrf.mxu0  ;;  %v1448_v53 = vpop.f32.mrf.mxu3 }
 0x10e   : > { %v1478_v7 = vadd.f32 %v1448_v53, %v1388_v30  ;;  %v1164_v33 = vpop.f32.mrf.mxu1 }
 0x10f   : > { %v1192_v42 = vadd.f32 %v1164_v33, %v3381_v57  ;;  %v428_v57 = vmul.f32 %v2511_v39, %v394_v12 }
 0x110   : > { %2332 = vmatmul.msk.bf16.gmra.mxu2 %vm785_vm14, %v2939_v49  ;;  %v3503_v4 = vadd.f32 %v1560_v6, %v1478_v7  ;;  %v464_v6 = vadd.f32 %v2512_v28, %v430_v31 }
 0x111   : > { %2312 = vmatmul.msk.bf16.gmra.mxu1 %vm785_vm14, %v3295_v19  ;;  %v463_v19 = vadd.f32 %v2512_v28, %v429_v59 }
 0x112   : > { %2352 = vmatmul.msk.bf16.gmra.mxu3 %vm785_vm14, %v3328_v56  ;;  %v462_v56 = vadd.f32 %v2512_v28, %v428_v57 }
 0x113   : > { %v1361_v26 = vpop.f32.mrf.mxu2  ;;  %v493_v32 = vmax.f32 %v463_v19, 0.0 }
 0x114   : > { %v1389_v58 = vadd.f32 %v1361_v26, %v1192_v42  ;;  %v492_v20 = vmax.f32 %v462_v56, 0.0  ;;  %v1602_v42 = vrot.slane %v3346_v21, 5  ;;  %v2295_v21 = vrot.slane %v3344_v3, 9 }
 0x115   : > { %v1563_v41 = vpop.f32.mrf.mxu0  ;;  %v1451_v49 = vpop.f32.mrf.mxu3  ;;  %v693_v30 = vsel %vm3516_vm7, %v493_v32, 0.0 }
 0x116   : > { %v1479_v52 = vadd.f32 %v1451_v49, %v1389_v58  ;;  %v1166_v23 = vpop.f32.mrf.mxu1  ;;  %v692_v53 = vsel %vm569_vm8, %v492_v20, 0.0  ;;  %v3535_v7 = vpack.c.bf16 %v693_v30, %v693_v30  ;;  %v1604_v16 = vrot.slane %v1602_v42, 4 }
 0x117   : > { %v1193_v45 = vadd.f32 %v1166_v23, %v3400_v25  ;;  %v3537_v33 = vpack.c.bf16 %v692_v53, %v692_v53 }
 0x118   : > { %2373 = vmatmul.msk.bf16.gmra.mxu0 %vm785_vm14, %v3352_v22  ;;  %v3514_v8 = vadd.f32 %v1563_v41, %v1479_v52  ;;  %v1799_v39 = vshrl.u32 %v3535_v7, 16  ;;  %v1605_v41 = vrot.slane %v3371_v47, 5 }
 0x119   : > { %v1786_v46 = vshrl.u32 %v3537_v33, 16  ;;  %v1789_v18 = vshll.u32 %v3537_v33, 16 }
 0x11a   : > { %v1606_v63 = vsel %vm3089_vm4, %v1604_v16, %v1605_v41 }
 0x11b   : > { %v1363_v2 = vpop.f32.mrf.mxu2  ;;  %v1791_v19 = vrot.slane %v1789_v18, 5 }
 0x11c   : > { %v1390_v0 = vadd.f32 %v1363_v2, %v1193_v45  ;;  %v1801_v45 = vrot.slane %v1799_v39, 4  ;;  %v1603_v2 = vsel %vm3089_vm4, %v2295_v21, %v1602_v42  ;;  %v1703_v42 = vunpack.c.l.b16 %v3535_v7 }
 0x11d   : > { %v1565_v55 = vpop.f32.mrf.mxu0  ;;  %v1453_v25 = vpop.f32.mrf.mxu3 }
 0x11e   : > { %v1480_v24 = vadd.f32 %v1453_v25, %v1390_v0  ;;  %v1169_v61 = vpop.f32.mrf.mxu1  ;;  %v1613_v25 = vunpack.c.l.b16 %v1606_v63 }
 0x11f   : > { %v1194_v40 = vadd.f32 %v1169_v61, %v3422_v29 }
 0x120   : > { %2333 = vmatmul.msk.bf16.gmra.mxu2 %vm785_vm14, %v3060_v11  ;;  %v3531_v15 = vadd.f32 %v1565_v55, %v1480_v24  ;;  %v494_v11 = vmax.f32 %v464_v6, 0.0  ;;  %v1612_v55 = vunpack.c.l.b16 %v1603_v2 }
 0x121   : > { %2313 = vmatmul.msk.bf16.gmra.mxu1 %vm785_vm14, %v3352_v22 }
 0x122   : > { %2353 = vmatmul.msk.bf16.gmra.mxu3 %vm785_vm14, %v3383_v27  ;;  %v1795_v27 = vshll.u32 %v3535_v7, 16  ;;  %v694_v58 = vsel %vm604_vm12, %v494_v11, 0.0  ;;  %v1614_v53 = vpack.c.b16 %v1613_v25, %v1612_v55 }
 0x123   : > { %v1366_v5 = vpop.f32.mrf.mxu2  ;;  %v724_v52 = vpack.c.bf16 %v694_v58, %v694_v58 }
 0x124   : > { %v1391_v29 = vadd.f32 %v1366_v5, %v1194_v40  ;;  %v1797_v23 = vrot.slane %v1795_v27, 5  ;;  %v2356_v27 = vrot.slane %v3537_v33, 9 }
 0x125   : > { %v1568_v48 = vpop.f32.mrf.mxu0  ;;  %v1456_v22 = vpop.f32.mrf.mxu3  ;;  %v1805_v20 = vshll.u32 %v724_v52, 16 }
 0x126   : > { %v1481_v12 = vadd.f32 %v1456_v22, %v1391_v29  ;;  %v1171_v26 = vpop.f32.mrf.mxu1  ;;  %v1802_v31 = vor.u32 %v1801_v45, %v1797_v23  ;;  %v1900_v29 = vrot.slane %v3535_v7, 5 }
 0x127   : > { %v1195_v59 = vadd.f32 %v1171_v26, %v3434_v13  ;;  %v1788_v13 = vrot.slane %v1786_v46, 4  ;;  %v1807_v6 = vrot.slane %v1805_v20, 5 }
 0x128   : > { %2374 = vmatmul.msk.bf16.gmra.mxu0 %vm785_vm14, %v3402_v1  ;;  %v3551_v57 = vadd.f32 %v1568_v48, %v1481_v12  ;;  %v1902_v39 = vrot.slane %v1900_v29, 4  ;;  %v1901_v17 = vsel %vm3089_vm4, %v2356_v27, %v1900_v29  ;;  %v1994_v27 = vld [vmem:[%s3604_s13 + $0x8] sm:$0xff] }
 0x129   : > { %v1792_v47 = vor.u32 %v1791_v19, %v1788_v13 }
 0x12b   : > { %v1368_v49 = vpop.f32.mrf.mxu2  ;;  %v1793_v30 = vrot.slane %v1792_v47, 4 }
 0x12c   : > { %v1392_v28 = vadd.f32 %v1368_v49, %v1195_v59  ;;  %v1903_v59 = vrot.slane %v724_v52, 5  ;;  %v1910_v52 = vunpack.c.l.b16 %v1901_v17 }
 0x12d   : > { %v1570_v14 = vpop.f32.mrf.mxu0  ;;  %v1458_v56 = vpop.f32.mrf.mxu3 }
 0x12e   : > { %v1482_v0 = vadd.f32 %v1458_v56, %v1392_v28  ;;  %v1174_v3 = vpop.f32.mrf.mxu1  ;;  %v1904_v41 = vsel %vm3089_vm4, %v1902_v39, %v1903_v59 }
 0x12f   : > { %v1196_v32 = vadd.f32 %v1174_v3, %v3393_v62  ;;  %v1803_v62 = vrot.slane %v1802_v31, 4  ;;  %v1911_v13 = vunpack.c.l.b16 %v1904_v41 }
 0x130   : > { %2334 = vmatmul.msk.bf16.gmra.mxu2 %vm785_vm14, %v3413_v43  ;;  %v3564_v24 = vadd.f32 %v1570_v14, %v1482_v0 }
 0x131   : > { %2314 = vmatmul.msk.bf16.gmra.mxu1 %vm785_vm14, %v3402_v1  ;;  %v1702_v1 = vunpack.c.l.b16 %v3537_v33  ;;  %v1808_v12 = vsel %vm3085_vm2, %v1803_v62, %v1807_v6  ;;  %v1912_v14 = vpack.c.b16 %v1911_v13, %v1910_v52 }
 0x132   : > { %2354 = vmatmul.msk.bf16.gmra.mxu3 %vm785_vm14, %v3424_v51  ;;  %v1798_v51 = vsel %vm3085_vm2, %v1793_v30, %v1797_v23  ;;  %v1815_v18 = vunpack.c.l.b16 %v1808_v12 }
 0x133   : > { %v1371_v61 = vpop.f32.mrf.mxu2  ;;  %v1814_v46 = vunpack.c.l.b16 %v1798_v51  ;;  %v1704_v21 = vpack.c.b16 %v1703_v42, %v1702_v1 }
 0x134   : > { %v1393_v40 = vadd.f32 %v1371_v61, %v1196_v32 }
 0x135   : > { %v1573_v43 = vpop.f32.mrf.mxu0  ;;  %v1461_v5 = vpop.f32.mrf.mxu3  ;;  %v1816_v28 = vpack.c.b16 %v1815_v18, %v1814_v46 }
 0x136   : > { %v1483_v11 = vadd.f32 %v1461_v5, %v1393_v40  ;;  %v1176_v48 = vpop.f32.mrf.mxu1  ;;  %v1993_v5 = vld [vmem:[%s3604_s13] sm:$0xff] }
 0x137   : > { %v1197_v22 = vadd.f32 %v1176_v48, %v3411_v36 }
 0x138   : > { %2375 = vmatmul.msk.bf16.gmra.mxu0 %vm785_vm14, %v1614_v53  ;;  %v3577_v26 = vadd.f32 %v1573_v43, %v1483_v11 }
 0x13b   : > { %v1373_v58 = vpop.f32.mrf.mxu2 }
 0x13c   : > { %v1394_v36 = vadd.f32 %v1373_v58, %v1197_v22 }
 0x13d   : > { %v1575_v7 = vpop.f32.mrf.mxu0  ;;  %v1463_v16 = vpop.f32.mrf.mxu3 }
 0x13e   : > { %v1484_v49 = vadd.f32 %v1463_v16, %v1394_v36  ;;  %v1179_v23 = vpop.f32.mrf.mxu1  ;;  %v1995_v16 = vld [vmem:[%s3604_s13 + $0x10] sm:$0xff] }
 0x13f   : > { %v1198_v33 = vadd.f32 %v1179_v23, %v3429_v10 }
 0x140   : > { %2335 = vmatmul.msk.bf16.gmra.mxu2 %vm785_vm14, %v1704_v21  ;;  %v3587_v19 = vadd.f32 %v1575_v7, %v1484_v49 }
 0x141   : > { %2315 = vmatmul.msk.bf16.gmra.mxu1 %vm785_vm14, %v1614_v53 }
 0x142   : > { %2355 = vmatmul.msk.bf16.gmra.mxu3 %vm785_vm14, %v1816_v28 }
 0x143   : > { %v1376_v45 = vpop.f32.mrf.mxu2 }
 0x144   : > { %v1395_v50 = vadd.f32 %v1376_v45, %v1198_v33  ;;  %v1996_v45 = vld [vmem:[%s3604_s13 + $0x18] sm:$0xff] }
 0x145   : > { %v1578_v56 = vpop.f32.mrf.mxu0  ;;  %v1466_v2 = vpop.f32.mrf.mxu3 }
 0x146   : > { %v1485_v63 = vadd.f32 %v1466_v2, %v1395_v50  ;;  %v1181_v10 = vpop.f32.mrf.mxu1 }
 0x147   : > { %v1199_v0 = vadd.f32 %v1181_v10, %v3438_v9 }
 0x148   : > { %2376 = vmatmul.msk.bf16.gmra.mxu0 %vm785_vm14, %v1912_v14  ;;  %v3594_v3 = vadd.f32 %v1578_v56, %v1485_v63 }
 0x14b   : > { %v1378_v32 = vpop.f32.mrf.mxu2 }
 0x14c   : > { %v1396_v47 = vadd.f32 %v1378_v32, %v1199_v0 }
 0x14d   : > { %v1580_v31 = vpop.f32.mrf.mxu0  ;;  %v1468_v20 = vpop.f32.mrf.mxu3 }
 0x14e   : > { %v1486_v55 = vadd.f32 %v1468_v20, %v1396_v47  ;;  %v1639_v25 = vpop.f32.mrf.mxu1  ;;  %v1997_v47 = vld [vmem:[%s3604_s13 + $0x20] sm:$0xff] }
 0x14f   : > { %v1679_v9 = vadd.f32 %v1639_v25, %v3449_v37 }
 0x150   : > { %v3597_v61 = vadd.f32 %v1580_v31, %v1486_v55 }
 0x153   : > { %v1729_v40 = vpop.f32.mrf.mxu2 }
 0x154   : > { %v1769_v30 = vadd.f32 %v1729_v40, %v1679_v9 }
 0x155   : > { %v1937_v62 = vpop.f32.mrf.mxu0  ;;  %v1841_v6 = vpop.f32.mrf.mxu3 }
 0x156   : > { %v1881_v53 = vadd.f32 %v1841_v6, %v1769_v30  ;;  %v1641_v43 = vpop.f32.mrf.mxu1  ;;  %v1998_v6 = vld [vmem:[%s3604_s13 + $0x28] sm:$0xff] }
 0x157   : > { %v1680_v37 = vadd.f32 %v1641_v43, %v3456_v44 }
 0x158   : > { %v1977_v29 = vadd.f32 %v1937_v62, %v1881_v53 }
 0x15a   : > { %v2009_v11 = vadd.f32 %v1993_v5, %v1977_v29 }
 0x15b   : > { %v1731_v48 = vpop.f32.mrf.mxu2 }
 0x15c   : > { %v1770_v1 = vadd.f32 %v1731_v48, %v1680_v37  ;;  %2025 = vst.msk [vmem:[%s3610_s29] sm:$0xff] %vm785_vm14, %v2009_v11 }
 0x15d   : > { %v1939_v22 = vpop.f32.mrf.mxu0  ;;  %v1843_v42 = vpop.f32.mrf.mxu3 }
 0x15e   : > { %v1882_v51 = vadd.f32 %v1843_v42, %v1770_v1  ;;  %v1644_v12 = vpop.f32.mrf.mxu1 }
 0x15f   : > { %v1681_v59 = vadd.f32 %v1644_v12, %v3463_v54 }
 0x160   : > { %v1978_v39 = vadd.f32 %v1939_v22, %v1882_v51  ;;  %v1999_v22 = vld [vmem:[%s3604_s13 + $0x30] sm:$0xff] }
 0x162   : > { %v2010_v44 = vadd.f32 %v1994_v27, %v1978_v39 }
 0x163   : > { %v1734_v58 = vpop.f32.mrf.mxu2 }
 0x164   : > { %v1771_v46 = vadd.f32 %v1734_v58, %v1681_v59  ;;  %2026 = vst.msk [vmem:[%s3610_s29 + $0x8] sm:$0xff] %vm785_vm14, %v2010_v44 }
 0x165   : > { %v1942_v18 = vpop.f32.mrf.mxu0  ;;  %v1846_v36 = vpop.f32.mrf.mxu3 }
 0x166   : > { %v1883_v21 = vadd.f32 %v1846_v36, %v1771_v46  ;;  %v1646_v7 = vpop.f32.mrf.mxu1  ;;  %v2000_v46 = vld [vmem:[%s3604_s13 + $0x38] sm:$0xff] }
 0x167   : > { %v1682_v41 = vadd.f32 %v1646_v7, %v3471_v35 }
 0x168   : > { %v1979_v17 = vadd.f32 %v1942_v18, %v1883_v21 }
 0x16a   : > { %v2011_v49 = vadd.f32 %v1995_v16, %v1979_v17 }
 0x16b   : > { %v1736_v23 = vpop.f32.mrf.mxu2 }
 0x16c   : > { %v1772_v28 = vadd.f32 %v1736_v23, %v1682_v41  ;;  %2027 = vst.msk [vmem:[%s3610_s29 + $0x10] sm:$0xff] %vm785_vm14, %v2011_v49  ;;  %v2001_v23 = vld [vmem:[%s3604_s13 + $0x40] sm:$0xff] }
 0x16d   : > { %v1944_v54 = vpop.f32.mrf.mxu0  ;;  %v1848_v33 = vpop.f32.mrf.mxu3 }
 0x16e   : > { %v1884_v52 = vadd.f32 %v1848_v33, %v1772_v28  ;;  %v1649_v13 = vpop.f32.mrf.mxu1 }
 0x16f   : > { %v1683_v14 = vadd.f32 %v1649_v13, %v3479_v34 }
 0x170   : > { %v1980_v50 = vadd.f32 %v1944_v54, %v1884_v52 }
 0x172   : > { %v2012_v56 = vadd.f32 %v1996_v45, %v1980_v50 }
 0x173   : > { %v1739_v2 = vpop.f32.mrf.mxu2 }
 0x174   : > { %v1773_v63 = vadd.f32 %v1739_v2, %v1683_v14  ;;  %2028 = vst.msk [vmem:[%s3610_s29 + $0x18] sm:$0xff] %vm785_vm14, %v2012_v56  ;;  %v2002_v56 = vld [vmem:[%s3604_s13 + $0x48] sm:$0xff] }
 0x175   : > { %v1947_v35 = vpop.f32.mrf.mxu0  ;;  %v1851_v10 = vpop.f32.mrf.mxu3 }
 0x176   : > { %v1885_v0 = vadd.f32 %v1851_v10, %v1773_v63  ;;  %v1651_v32 = vpop.f32.mrf.mxu1 }
 0x177   : > { %v1684_v20 = vadd.f32 %v1651_v32, %v3487_v38 }
 0x178   : > { %v1981_v31 = vadd.f32 %v1947_v35, %v1885_v0 }
 0x17a   : > { %v2013_v55 = vadd.f32 %v1997_v47, %v1981_v31 }
 0x17b   : > { %v1741_v25 = vpop.f32.mrf.mxu2 }
 0x17c   : > { %v1774_v9 = vadd.f32 %v1741_v25, %v1684_v20  ;;  %2029 = vst.msk [vmem:[%s3610_s29 + $0x20] sm:$0xff] %vm785_vm14, %v2013_v55  ;;  %v2003_v20 = vld [vmem:[%s3604_s13 + $0x50] sm:$0xff] }
 0x17d   : > { %v1949_v34 = vpop.f32.mrf.mxu0  ;;  %v1853_v40 = vpop.f32.mrf.mxu3 }
 0x17e   : > { %v1886_v30 = vadd.f32 %v1853_v40, %v1774_v9  ;;  %v1654_v62 = vpop.f32.mrf.mxu1 }
 0x17f   : > { %v1685_v43 = vadd.f32 %v1654_v62, %v3495_v60 }
 0x180   : > { %v1982_v53 = vadd.f32 %v1949_v34, %v1886_v30 }
 0x182   : > { %v2014_v5 = vadd.f32 %v1998_v6, %v1982_v53  ;;  %v2004_v53 = vld [vmem:[%s3604_s13 + $0x58] sm:$0xff] }
 0x183   : > { %v1744_v29 = vpop.f32.mrf.mxu2 }
 0x184   : > { %v1775_v37 = vadd.f32 %v1744_v29, %v1685_v43  ;;  %2030 = vst.msk [vmem:[%s3610_s29 + $0x28] sm:$0xff] %vm785_vm14, %v2014_v5 }
 0x185   : > { %v1952_v38 = vpop.f32.mrf.mxu0  ;;  %v1856_v11 = vpop.f32.mrf.mxu3 }
 0x186   : > { %v1887_v48 = vadd.f32 %v1856_v11, %v1775_v37  ;;  %v1656_v1 = vpop.f32.mrf.mxu1 }
 0x187   : > { %v1686_v51 = vadd.f32 %v1656_v1, %v3503_v4 }
 0x188   : > { %v1983_v42 = vadd.f32 %v1952_v38, %v1887_v48 }
 0x18a   : > { %v2015_v12 = vadd.f32 %v1999_v22, %v1983_v42  ;;  %v2005_v22 = vld [vmem:[%s3604_s13 + $0x60] sm:$0xff] }
 0x18b   : > { %v1746_v27 = vpop.f32.mrf.mxu2 }
 0x18c   : > { %v1776_v39 = vadd.f32 %v1746_v27, %v1686_v51  ;;  %2031 = vst.msk [vmem:[%s3610_s29 + $0x30] sm:$0xff] %vm785_vm14, %v2015_v12 }
 0x18d   : > { %v1954_v60 = vpop.f32.mrf.mxu0  ;;  %v1858_v59 = vpop.f32.mrf.mxu3 }
 0x18e   : > { %v1888_v44 = vadd.f32 %v1858_v59, %v1776_v39  ;;  %v1659_v58 = vpop.f32.mrf.mxu1 }
 0x18f   : > { %v1687_v36 = vadd.f32 %v1659_v58, %v3514_v8  ;;  %v2006_v58 = vld [vmem:[%s3604_s13 + $0x68] sm:$0xff] }
 0x190   : > { %v1984_v18 = vadd.f32 %v1954_v60, %v1888_v44 }
 0x192   : > { %v2016_v21 = vadd.f32 %v2000_v46, %v1984_v18 }
 0x193   : > { %v1749_v7 = vpop.f32.mrf.mxu2 }
 0x194   : > { %v1777_v16 = vadd.f32 %v1749_v7, %v1687_v36  ;;  %2032 = vst.msk [vmem:[%s3610_s29 + $0x38] sm:$0xff] %vm785_vm14, %v2016_v21 }
 0x195   : > { %v1957_v4 = vpop.f32.mrf.mxu0  ;;  %v1861_v17 = vpop.f32.mrf.mxu3 }
 0x196   : > { %v1889_v41 = vadd.f32 %v1861_v17, %v1777_v16  ;;  %v1661_v49 = vpop.f32.mrf.mxu1 }
 0x197   : > { %v1688_v54 = vadd.f32 %v1661_v49, %v3531_v15 }
 0x198   : > { %v1985_v28 = vadd.f32 %v1957_v4, %v1889_v41  ;;  %v2007_v41 = vld [vmem:[%s3604_s13 + $0x70] sm:$0xff] }
 0x19a   : > { %v2017_v33 = vadd.f32 %v2001_v23, %v1985_v28 }
 0x19b   : > { %v1751_v52 = vpop.f32.mrf.mxu2 }
 0x19c   : > { %v1778_v13 = vadd.f32 %v1751_v52, %v1688_v54  ;;  %2033 = vst.msk [vmem:[%s3610_s29 + $0x40] sm:$0xff] %vm785_vm14, %v2017_v33 }
 0x19d   : > { %v1959_v8 = vpop.f32.mrf.mxu0  ;;  %v1863_v45 = vpop.f32.mrf.mxu3 }
 0x19e   : > { %v1890_v50 = vadd.f32 %v1863_v45, %v1778_v13  ;;  %v1664_v14 = vpop.f32.mrf.mxu1 }
 0x19f   : > { %v1689_v63 = vadd.f32 %v1664_v14, %v3551_v57 }
 0x1a0   : > { %v1986_v2 = vadd.f32 %v1959_v8, %v1890_v50  ;;  %v2008_v8 = vld [vmem:[%s3604_s13 + $0x78] sm:$0xff]  ;;  %s2533_s13 = scalar_lea.hbm %s3725_s6, 512 }
 0x1a1   : > { %p2535_p5 = scmp.lt.s32.totalorder %s2533_s13, %s2529_s12 }
 0x1a2   : > { %v2018_v35 = vadd.f32 %v2002_v56, %v1986_v2 }
 0x1a3   : > { %v1754_v10 = vpop.f32.mrf.mxu2  ;;  %p2536_p6 = por %p2535_p5, %p2534_p4 }
 0x1a4   : > { %v1779_v0 = vadd.f32 %v1754_v10, %v1689_v63  ;;  %2034 = vst.msk [vmem:[%s3610_s29 + $0x48] sm:$0xff] %vm785_vm14, %v2018_v35 }
 0x1a5   : > { %v1962_v15 = vpop.f32.mrf.mxu0  ;;  %v1866_v32 = vpop.f32.mrf.mxu3  ;;  %p2537_p7 = pnand %p2536_p6, %p2532_p2 }
 0x1a6   : > { %v1891_v47 = vadd.f32 %v1866_v32, %v1779_v0  ;;  %v1666_v31 = vpop.f32.mrf.mxu1 }
 0x1a7   : > { %v1690_v25 = vadd.f32 %v1666_v31, %v3564_v24 }
 0x1a8   : > { %v1987_v55 = vadd.f32 %v1962_v15, %v1891_v47 }
 0x1aa   : > { %v2019_v9 = vadd.f32 %v2003_v20, %v1987_v55 }
 0x1ab   : > { %v1756_v34 = vpop.f32.mrf.mxu2 }
 0x1ac   : > { %v1780_v40 = vadd.f32 %v1756_v34, %v1690_v25  ;;  %2035 = vst.msk [vmem:[%s3610_s29 + $0x50] sm:$0xff] %vm785_vm14, %v2019_v9 }
 0x1ad   : > { %v1964_v57 = vpop.f32.mrf.mxu0  ;;  %v1868_v30 = vpop.f32.mrf.mxu3 }
 0x1ae   : > { %v1892_v62 = vadd.f32 %v1868_v30, %v1780_v40  ;;  %v1669_v6 = vpop.f32.mrf.mxu1 }
 0x1af   : > { %v1691_v5 = vadd.f32 %v1669_v6, %v3577_v26 }
 0x1b0   : > { %v1988_v43 = vadd.f32 %v1964_v57, %v1892_v62 }
 0x1b2   : > { %v2020_v29 = vadd.f32 %v2004_v53, %v1988_v43 }
 0x1b3   : > { %v1759_v37 = vpop.f32.mrf.mxu2 }
 0x1b4   : > { %v1781_v38 = vadd.f32 %v1759_v37, %v1691_v5  ;;  %2036 = vst.msk [vmem:[%s3610_s29 + $0x58] sm:$0xff] %vm785_vm14, %v2020_v29 }
 0x1b5   : > { %v1967_v24 = vpop.f32.mrf.mxu0  ;;  %v1871_v11 = vpop.f32.mrf.mxu3 }
 0x1b6   : > { %v1893_v48 = vadd.f32 %v1871_v11, %v1781_v38  ;;  %v1671_v1 = vpop.f32.mrf.mxu1 }
 0x1b7   : > { %v1692_v51 = vadd.f32 %v1671_v1, %v3587_v19 }
 0x1b8   : > { %v1989_v42 = vadd.f32 %v1967_v24, %v1893_v48 }
 0x1ba   : > { %v2021_v12 = vadd.f32 %v2005_v22, %v1989_v42 }
 0x1bb   : > { %v1761_v27 = vpop.f32.mrf.mxu2 }
 0x1bc   : > { %v1782_v26 = vadd.f32 %v1761_v27, %v1692_v51  ;;  %2037 = vst.msk [vmem:[%s3610_s29 + $0x60] sm:$0xff] %vm785_vm14, %v2021_v12 }
 0x1bd   : > { %v1969_v39 = vpop.f32.mrf.mxu0  ;;  %v1873_v60 = vpop.f32.mrf.mxu3 }
 0x1be   : > { %v1894_v59 = vadd.f32 %v1873_v60, %v1782_v26  ;;  %v1674_v44 = vpop.f32.mrf.mxu1 }
 0x1bf   : > { %v1693_v18 = vadd.f32 %v1674_v44, %v3594_v3 }
 0x1c0   : > { %v1990_v46 = vadd.f32 %v1969_v39, %v1894_v59 }
 0x1c2   : > { %v2022_v36 = vadd.f32 %v2006_v58, %v1990_v46 }
 0x1c3   : > { %v1764_v21 = vpop.f32.mrf.mxu2 }
 0x1c4   : > { %v1783_v7 = vadd.f32 %v1764_v21, %v1693_v18  ;;  %2038 = vst.msk [vmem:[%s3610_s29 + $0x68] sm:$0xff] %vm785_vm14, %v2022_v36 }
 0x1c5   : > { %v1972_v19 = vpop.f32.mrf.mxu0  ;;  %v1876_v16 = vpop.f32.mrf.mxu3 }
 0x1c6   : > { %v1895_v4 = vadd.f32 %v1876_v16, %v1783_v7  ;;  %v1676_v17 = vpop.f32.mrf.mxu1 }
 0x1c7   : > { %v1694_v23 = vadd.f32 %v1676_v17, %v3597_v61 }
 0x1c8   : > { %v1991_v49 = vadd.f32 %v1972_v19, %v1895_v4 }
 0x1ca   : > { %v2023_v3 = vadd.f32 %v2007_v41, %v1991_v49 }
 0x1cb   : > { %v1766_v28 = vpop.f32.mrf.mxu2 }
 0x1cc   : > { %v1784_v54 = vadd.f32 %v1766_v28, %v1694_v23  ;;  %2039 = vst.msk [vmem:[%s3610_s29 + $0x70] sm:$0xff] %vm785_vm14, %v2023_v3 }
 0x1cd   : > { %v1878_v33 = vpop.f32.mrf.mxu3  ;;  %v1974_v13 = vpop.f32.mrf.mxu0 }
 0x1ce   : > { %v1896_v52 = vadd.f32 %v1878_v33, %v1784_v54 }
 0x1d0   : > { %v1992_v61 = vadd.f32 %v1974_v13, %v1896_v52 }
 0x1d2   : > { %v2024_v45 = vadd.f32 %v2008_v8, %v1992_v61 }
 0x1d4   : > { %2040 = vst.msk [vmem:[%s3610_s29 + $0x78] sm:$0xff] %vm785_vm14, %v2024_v45 }
 0x1d5   : > { %2540 = shalt.err (!%p2537_p7)
}
 0x1d6   : > { %s2609_s30 = smov 128   ;;  %s2610_s29 = smov 8  }
 0x1d7   : > { %2435 = dma.vmem_to_hbm [thread:$0]  (%p2697_p3), %s2058_s14, 2048, %s2060_s8, %s2042_s7, %s2609_s30, %s2609_s30, %s2610_s29  }
 0x1d8 PF: > { %p2441_p9 = scmp.ge.s32.totalorder %s2607_s28, 2  ;;  %s2074_s20 = sand.u32 1, %s2579_s21  }
 0x1d9   : > { %s2075_s24 = scalar_lea.sflag [#allocation3], %s2074_s20 }
 0x1da   : > { %p2438_p10 = pnand %p2441_p9, %p2706_p8 }
 0x1dc   : > { %p2439_p11 = pneg %p2438_p10 }
 0x1de   : > { %2574 = dma.done.wait (%p2439_p11), %s2075_s24, 2048  }
 0x1df   : > { %2576 = vsyncadd (%p2439_p11), %s2075_s24, 4294965248  ;;  %s19_s28 = sadd.s32 1, %s2607_s28   ;;  %s3773_s25 = sld [smem:[#allocation5_spill]] }
 0x1e0   : > { %p16_p12 = scmp.ge.s32.totalorder %s19_s28, 6   ;;  %s3774_s10 = sld [smem:[#allocation6_spill]] }
 0x1e1   : > { %s3775_s27 = sld [smem:[#allocation7_spill]]  ;;  %s3776_s21 = smov %s2583_s22 }
 0x1e2   : > { %s3777_s22 = smov %s2587_s23  ;;  %s3778_s23 = smov %s2715_s15 }
 0x1e3   : > { %s3779_s24 = smov %s2599_s26  ;;  %18 = sbr.rel (!%p16_p12) target bundleno = 5 (0x5), region = 97 }
 0x1e6   : > { %s3780_s26 = smov %s3774_s10 }
 0x1e8   :  { %2081 = vsyncpa [#allocation3], 1 }
 0x1e9   :  { %2083 = vsyncpa [#allocation3 + $0x1], 1 }

</bundles_post_ra>
